<compile_context>
chip_gen: v7x
topology: tpu7x:2x2x1
jax: 0.10.0
libtpu: 0.0.40
codegen_flags: <defaults>
</compile_context>

<pallas_src>
import math
from functools import partial

import jax
import jax.numpy as jnp
from jax import lax
from jax.experimental import pallas as pl
from jax.experimental.pallas import tpu as pltpu


def _eye(d, dtype=jnp.float32):
    r = lax.broadcasted_iota(jnp.int32, (d, d), 0)
    c = lax.broadcasted_iota(jnp.int32, (d, d), 1)
    return (r == c).astype(dtype)


def _gmm_kernel(x_ref, means_in_ref, covs_in_ref, wts_ref,
                loss_ref, means_ref, covs_ref, prev_ref,
                *, eps, max_depth, training):
    N, D = x_ref.shape
    K = means_in_ref.shape[0]

    # ---- constants built once (JAX does not CSE broadcast/iota; keep them
    #      out of the while-loop body / unrolled K loops) --------------------
    eye = _eye(D)
    jitter = jnp.float32(1e-6) * eye
    row_idx_aug = lax.broadcasted_iota(jnp.int32, (D, 2 * D), 0)
    x = x_ref[...]                                              # (N, D)
    ones_col = jnp.ones((N, 1), jnp.float32)
    x1 = jnp.concatenate([x, ones_col], axis=1)                 # (N, D+1)
    zeros_colK = jnp.zeros((K, 1), jnp.float32)
    log2pi_const = jnp.float32(D * math.log(2.0 * math.pi))
    eps_sq = jnp.float32(eps) * jnp.float32(eps)

    # Current parameters live in the VMEM output refs for the whole kernel.
    means_ref[...] = means_in_ref[...]
    covs_ref[...] = covs_in_ref[...]
    prev_ref[...] = means_in_ref[...]

    def gj_inverse(a):
        """Gauss-Jordan inverse of a PD (D, D) matrix.

        Returns (inverse, pivots); sum(log(pivots)) == logdet(a)."""
        aug = jnp.concatenate([a, eye], axis=1)                 # (D, 2D)
        pivs = []
        for j in range(D):                                      # D static, unrolled
            pivot = aug[j:j + 1, j:j + 1]                       # (1, 1)
            pivs.append(pivot)
            prow = aug[j:j + 1, :] / pivot                      # (1, 2D)
            col = aug[:, j:j + 1]                               # (D, 1)
            aug = jnp.where(row_idx_aug == j, prow, aug - col * prow)
        return aug[:, D:], jnp.concatenate(pivs, axis=1)        # (D, D), (1, D)

    def em_step():
        """One update_parameters(x); reads & writes means_ref / covs_ref."""
        means = means_ref[...]                                  # (K, D) old means
        inv_list = [gj_inverse(covs_ref[pl.ds(i * D, D), :])[0] for i in range(K)]
        inv_all = jnp.concatenate(inv_list, axis=1)             # (D, K*D)
        # Batched MXU calls instead of K lane-sparse ones.
        m_all = jnp.dot(x, inv_all, preferred_element_type=jnp.float32)       # (N, K*D)
        mu_all = jnp.dot(means, inv_all, preferred_element_type=jnp.float32)  # (K, K*D)
        means1 = jnp.concatenate([means, zeros_colK], axis=1)                 # (K, D+1)
        for i in range(K):                                      # K static, unrolled
            d1 = x1 - means1[i:i + 1, :]                        # (N, D+1) = [diff | 1]
            diff = d1[:, :D]                                    # (N, D), uses OLD mean
            m = m_all[:, i * D:(i + 1) * D] - mu_all[i:i + 1, i * D:(i + 1) * D]
            w = jnp.sum(m * diff, axis=1, keepdims=True)        # (N, 1) mahalanobis
            # One Gram matmul yields weighted outer product, weighted diff sum
            # and sum(w):  G = (w*[diff|1])^T @ [diff|1]  -> (D+1, D+1)
            g = lax.dot_general(w * d1, d1, (((0,), (0,)), ((), ())),
                                preferred_element_type=jnp.float32)
            sw = g[D:D + 1, D:D + 1]                            # (1, 1) = sum(w)
            new_mean = means[i:i + 1, :] + g[D:D + 1, :D] / sw  # == sum(w*x)/sw
            new_cov = g[:D, :D] / sw + jitter
            means_ref[pl.ds(i, 1), :] = new_mean                # write in place
            covs_ref[pl.ds(i * D, D), :] = new_cov

    # ---- convergence loop, fully in-kernel (params never leave VMEM) ------
    def cond_fn(carry):
        depth, done = carry
        return jnp.logical_and(done == 0, depth < max_depth)

    def body_fn(carry):
        depth, _ = carry
        em_step()
        new_means = means_ref[...]
        dm = new_means - prev_ref[...]
        done = (jnp.sum(dm * dm) <= eps_sq).astype(jnp.int32)   # ||.||_F <= eps
        prev_ref[...] = new_means
        return depth + 1, done

    lax.while_loop(cond_fn, body_fn,
                   (jnp.array(0, jnp.int32), jnp.array(0, jnp.int32)))

    if training:  # attach_gradients branch: one more update before the loss
        em_step()

    # ---- loss: -sum_n sum_i w_i * MVN(mu_i, Sigma_i).log_prob(x_n)
    #      == 0.5 * sum_i w_i * (Maha_sum_i + N*(logdet_i + D*log(2*pi))) ----
    means = means_ref[...]
    loss = jnp.zeros((1, 1), jnp.float32)
    for i in range(K):
        inv_i, piv_i = gj_inverse(covs_ref[pl.ds(i * D, D), :])
        logdet = jnp.sum(jnp.log(piv_i), axis=1, keepdims=True)       # (1, 1)
        diff = x - means[i:i + 1, :]
        m = jnp.dot(diff, inv_i, preferred_element_type=jnp.float32)  # (N, D)
        maha = jnp.sum(jnp.sum(m * diff, axis=1, keepdims=True),
                       axis=0, keepdims=True)                         # (1, 1)
        loss = loss + wts_ref[i] * jnp.float32(0.5) * (
            maha + jnp.float32(N) * (logdet + log2pi_const))
    loss_ref[...] = loss


def gmm_forward(x, means, covs, mix_w, *, eps=1e-3, max_depth=100,
                training=True):
    """Mirrors GaussianMixtureLayer.forward (training branch by default)."""
    N, D = x.shape
    K = means.shape[0]
    kernel = partial(_gmm_kernel, eps=float(eps), max_depth=int(max_depth),
                     training=bool(training))
    # NOTE: for large N this should grow a grid axis over rows with partial
    # Gram accumulation; at this module's scale a single gridless call is best.
    loss, means_f, covs_f = pl.pallas_call(
        kernel,
        out_shape=(jax.ShapeDtypeStruct((1, 1), jnp.float32),
                   jax.ShapeDtypeStruct((K, D), jnp.float32),
                   jax.ShapeDtypeStruct((K * D, D), jnp.float32)),
        in_specs=[pl.BlockSpec(memory_space=pltpu.MemorySpace.VMEM),
                  pl.BlockSpec(memory_space=pltpu.MemorySpace.VMEM),
                  pl.BlockSpec(memory_space=pltpu.MemorySpace.VMEM),
                  pl.BlockSpec(memory_space=pltpu.MemorySpace.SMEM)],
        out_specs=(pl.BlockSpec(memory_space=pltpu.MemorySpace.VMEM),
                   pl.BlockSpec(memory_space=pltpu.MemorySpace.VMEM),
                   pl.BlockSpec(memory_space=pltpu.MemorySpace.VMEM)),
        scratch_shapes=[pltpu.VMEM((K, D), jnp.float32)],   # prev_means
    )(x.astype(jnp.float32),
      means.astype(jnp.float32),
      covs.reshape(K * D, D).astype(jnp.float32),
      mix_w.reshape(K).astype(jnp.float32))
    return loss[0, 0], means_f, covs_f.reshape(K, D, D)


if __name__ == "__main__":
    key = jax.random.PRNGKey(0)
    k_means, k_x = jax.random.split(key)

    # module config: n_components=3, n_features=8, eps=1e-3, max_depth=100
    K, D, N = 3, 8, 64

    means0 = jax.random.normal(k_means, (K, D), dtype=jnp.float32)    # randn(K, D)
    covs0 = jnp.tile(jnp.eye(D, dtype=jnp.float32)[None], (K, 1, 1))  # eye expand
    mix_w = jnp.ones((K,), dtype=jnp.float32) / K                     # ones/K

    x = jax.random.normal(k_x, (N, D), dtype=jnp.float32)

    fwd = jax.jit(partial(gmm_forward, eps=1e-3, max_depth=100, training=True))
    loss, means_f, covs_f = fwd(x, means0, covs0, mix_w)
    jax.block_until_ready((loss, means_f, covs_f))
    print("KERNEL_OK")
</pallas_src>

<mosaic_0001>
module attributes {stable_mosaic.version = 11 : i64} {
  func.func @_gmm_kernel(%arg0: memref<64x8xf32, #tpu.memory_space<vmem>>, %arg1: memref<3x8xf32, #tpu.memory_space<vmem>>, %arg2: memref<24x8xf32, #tpu.memory_space<vmem>>, %arg3: memref<3xf32, #tpu.memory_space<smem>>, %arg4: memref<1x1xf32, #tpu.memory_space<vmem>>, %arg5: memref<3x8xf32, #tpu.memory_space<vmem>>, %arg6: memref<24x8xf32, #tpu.memory_space<vmem>>, %arg7: memref<3x8xf32, #tpu.memory_space<vmem>>) attributes {dimension_semantics = [], scalar_prefetch = 0 : i64, scratch_operands = 1 : i64, tpu.core_type = #tpu.core_type<tc>} {
    %0 = tpu.iota {dimensions = array<i32: 0>} : vector<8x8xi32>
    %1 = tpu.iota {dimensions = array<i32: 1>} : vector<8x8xi32>
    %2 = arith.cmpi eq, %0, %1 : vector<8x8xi32>
    %3 = arith.extui %2 : vector<8x8xi1> to vector<8x8xi32>
    %4 = arith.sitofp %3 : vector<8x8xi32> to vector<8x8xf32>
    %cst = arith.constant 9.99999997E-7 : f32
    %5 = vector.broadcast %cst : f32 to vector<8x8xf32>
    %6 = arith.mulf %5, %4 : vector<8x8xf32>
    %7 = tpu.iota {dimensions = array<i32: 0>} : vector<8x16xi32>
    %c0 = arith.constant 0 : index
    %c0_0 = arith.constant 0 : index
    %8 = vector.load %arg0[%c0, %c0_0] : memref<64x8xf32, #tpu.memory_space<vmem>>, vector<64x8xf32>
    %cst_1 = arith.constant 1.000000e+00 : f32
    %9 = vector.broadcast %cst_1 : f32 to vector<64x1xf32>
    %10 = tpu.concatenate %8, %9 in 1 : vector<64x8xf32>, vector<64x1xf32> -> vector<64x9xf32>
    %cst_2 = arith.constant 0.000000e+00 : f32
    %11 = vector.broadcast %cst_2 : f32 to vector<3x1xf32>
    %cst_3 = arith.constant 1.000000e-03 : f32
    %cst_4 = arith.constant 1.000000e-03 : f32
    %12 = arith.mulf %cst_3, %cst_4 : f32
    %c0_5 = arith.constant 0 : index
    %c0_6 = arith.constant 0 : index
    %13 = vector.load %arg1[%c0_5, %c0_6] : memref<3x8xf32, #tpu.memory_space<vmem>>, vector<3x8xf32>
    %c0_7 = arith.constant 0 : index
    %c0_8 = arith.constant 0 : index
    %14 = vector.load %arg5[%c0_7, %c0_8] : memref<3x8xf32, #tpu.memory_space<vmem>>, vector<3x8xf32>
    tpu.vector_store %arg5[%c0_7, %c0_8], %13 {strides = array<i32>} : memref<3x8xf32, #tpu.memory_space<vmem>>, vector<3x8xf32>,
    %c0_9 = arith.constant 0 : index
    %c0_10 = arith.constant 0 : index
    %15 = vector.load %arg2[%c0_9, %c0_10] : memref<24x8xf32, #tpu.memory_space<vmem>>, vector<24x8xf32>
    %c0_11 = arith.constant 0 : index
    %c0_12 = arith.constant 0 : index
    %16 = vector.load %arg6[%c0_11, %c0_12] : memref<24x8xf32, #tpu.memory_space<vmem>>, vector<24x8xf32>
    tpu.vector_store %arg6[%c0_11, %c0_12], %15 {strides = array<i32>} : memref<24x8xf32, #tpu.memory_space<vmem>>, vector<24x8xf32>,
    %c0_13 = arith.constant 0 : index
    %c0_14 = arith.constant 0 : index
    %17 = vector.load %arg1[%c0_13, %c0_14] : memref<3x8xf32, #tpu.memory_space<vmem>>, vector<3x8xf32>
    %c0_15 = arith.constant 0 : index
    %c0_16 = arith.constant 0 : index
    %18 = vector.load %arg7[%c0_15, %c0_16] : memref<3x8xf32, #tpu.memory_space<vmem>>, vector<3x8xf32>
    tpu.vector_store %arg7[%c0_15, %c0_16], %17 {strides = array<i32>} : memref<3x8xf32, #tpu.memory_space<vmem>>, vector<3x8xf32>,
    %c0_i32 = arith.constant 0 : i32
    %c0_i32_17 = arith.constant 0 : i32
    %19:2 = scf.while (%arg8 = %c0_i32, %arg9 = %c0_i32_17) : (i32, i32) -> (i32, i32) {
      %c0_i32_118 = arith.constant 0 : i32
      %865 = arith.cmpi eq, %arg9, %c0_i32_118 : i32
      %c100_i32 = arith.constant 100 : i32
      %866 = arith.cmpi slt, %arg8, %c100_i32 : i32
      %867 = arith.andi %865, %866 : i1
      scf.condition(%867) %arg8, %arg9 : i32, i32
    } do {
    ^bb0(%arg8: i32, %arg9: i32):
      %c0_118 = arith.constant 0 : index
      %c0_119 = arith.constant 0 : index
      %865 = vector.load %arg5[%c0_118, %c0_119] : memref<3x8xf32, #tpu.memory_space<vmem>>, vector<3x8xf32>
      %c0_120 = arith.constant 0 : index
      %c0_121 = arith.constant 0 : index
      %866 = vector.load %arg6[%c0_120, %c0_121] : memref<24x8xf32, #tpu.memory_space<vmem>>, vector<8x8xf32>
      %867 = tpu.concatenate %866, %4 in 1 : vector<8x8xf32>, vector<8x8xf32> -> vector<8x16xf32>
      %868 = vector.extract_strided_slice %867 {offsets = [0, 0], sizes = [1, 1], strides = [1, 1]} : vector<8x16xf32> to vector<1x1xf32>
      %869 = vector.extract_strided_slice %867 {offsets = [0, 0], sizes = [1, 16], strides = [1, 1]} : vector<8x16xf32> to vector<1x16xf32>
      %870 = vector.broadcast %868 : vector<1x1xf32> to vector<1x16xf32>
      %871 = arith.divf %869, %870 : vector<1x16xf32>
      %872 = vector.extract_strided_slice %867 {offsets = [0, 0], sizes = [8, 1], strides = [1, 1]} : vector<8x16xf32> to vector<8x1xf32>
      %c0_i32_122 = arith.constant 0 : i32
      %873 = vector.broadcast %c0_i32_122 : i32 to vector<8x16xi32>
      %874 = arith.cmpi eq, %7, %873 : vector<8x16xi32>
      %875 = vector.broadcast %872 : vector<8x1xf32> to vector<8x16xf32>
      %876 = vector.broadcast %871 : vector<1x16xf32> to vector<8x16xf32>
      %877 = arith.mulf %875, %876 : vector<8x16xf32>
      %878 = arith.subf %867, %877 : vector<8x16xf32>
      %879 = vector.shape_cast %871 : vector<1x16xf32> to vector<1x16xf32>
      %880 = vector.broadcast %879 : vector<1x16xf32> to vector<8x16xf32>
      %881 = arith.select %874, %880, %878 : vector<8x16xi1>, vector<8x16xf32>
      %882 = vector.extract_strided_slice %881 {offsets = [1, 1], sizes = [1, 1], strides = [1, 1]} : vector<8x16xf32> to vector<1x1xf32>
      %883 = vector.extract_strided_slice %881 {offsets = [1, 0], sizes = [1, 16], strides = [1, 1]} : vector<8x16xf32> to vector<1x16xf32>
      %884 = vector.broadcast %882 : vector<1x1xf32> to vector<1x16xf32>
      %885 = arith.divf %883, %884 : vector<1x16xf32>
      %886 = vector.extract_strided_slice %881 {offsets = [0, 1], sizes = [8, 1], strides = [1, 1]} : vector<8x16xf32> to vector<8x1xf32>
      %c1_i32_123 = arith.constant 1 : i32
      %887 = vector.broadcast %c1_i32_123 : i32 to vector<8x16xi32>
      %888 = arith.cmpi eq, %7, %887 : vector<8x16xi32>
      %889 = vector.broadcast %886 : vector<8x1xf32> to vector<8x16xf32>
      %890 = vector.broadcast %885 : vector<1x16xf32> to vector<8x16xf32>
      %891 = arith.mulf %889, %890 : vector<8x16xf32>
      %892 = arith.subf %881, %891 : vector<8x16xf32>
      %893 = vector.shape_cast %885 : vector<1x16xf32> to vector<1x16xf32>
      %894 = vector.broadcast %893 : vector<1x16xf32> to vector<8x16xf32>
      %895 = arith.select %888, %894, %892 : vector<8x16xi1>, vector<8x16xf32>
      %896 = vector.extract_strided_slice %895 {offsets = [2, 2], sizes = [1, 1], strides = [1, 1]} : vector<8x16xf32> to vector<1x1xf32>
      %897 = vector.extract_strided_slice %895 {offsets = [2, 0], sizes = [1, 16], strides = [1, 1]} : vector<8x16xf32> to vector<1x16xf32>
      %898 = vector.broadcast %896 : vector<1x1xf32> to vector<1x16xf32>
      %899 = arith.divf %897, %898 : vector<1x16xf32>
      %900 = vector.extract_strided_slice %895 {offsets = [0, 2], sizes = [8, 1], strides = [1, 1]} : vector<8x16xf32> to vector<8x1xf32>
      %c2_i32_124 = arith.constant 2 : i32
      %901 = vector.broadcast %c2_i32_124 : i32 to vector<8x16xi32>
      %902 = arith.cmpi eq, %7, %901 : vector<8x16xi32>
      %903 = vector.broadcast %900 : vector<8x1xf32> to vector<8x16xf32>
      %904 = vector.broadcast %899 : vector<1x16xf32> to vector<8x16xf32>
      %905 = arith.mulf %903, %904 : vector<8x16xf32>
      %906 = arith.subf %895, %905 : vector<8x16xf32>
      %907 = vector.shape_cast %899 : vector<1x16xf32> to vector<1x16xf32>
      %908 = vector.broadcast %907 : vector<1x16xf32> to vector<8x16xf32>
      %909 = arith.select %902, %908, %906 : vector<8x16xi1>, vector<8x16xf32>
      %910 = vector.extract_strided_slice %909 {offsets = [3, 3], sizes = [1, 1], strides = [1, 1]} : vector<8x16xf32> to vector<1x1xf32>
      %911 = vector.extract_strided_slice %909 {offsets = [3, 0], sizes = [1, 16], strides = [1, 1]} : vector<8x16xf32> to vector<1x16xf32>
      %912 = vector.broadcast %910 : vector<1x1xf32> to vector<1x16xf32>
      %913 = arith.divf %911, %912 : vector<1x16xf32>
      %914 = vector.extract_strided_slice %909 {offsets = [0, 3], sizes = [8, 1], strides = [1, 1]} : vector<8x16xf32> to vector<8x1xf32>
      %c3_i32_125 = arith.constant 3 : i32
      %915 = vector.broadcast %c3_i32_125 : i32 to vector<8x16xi32>
      %916 = arith.cmpi eq, %7, %915 : vector<8x16xi32>
      %917 = vector.broadcast %914 : vector<8x1xf32> to vector<8x16xf32>
      %918 = vector.broadcast %913 : vector<1x16xf32> to vector<8x16xf32>
      %919 = arith.mulf %917, %918 : vector<8x16xf32>
      %920 = arith.subf %909, %919 : vector<8x16xf32>
      %921 = vector.shape_cast %913 : vector<1x16xf32> to vector<1x16xf32>
      %922 = vector.broadcast %921 : vector<1x16xf32> to vector<8x16xf32>
      %923 = arith.select %916, %922, %920 : vector<8x16xi1>, vector<8x16xf32>
      %924 = vector.extract_strided_slice %923 {offsets = [4, 4], sizes = [1, 1], strides = [1, 1]} : vector<8x16xf32> to vector<1x1xf32>
      %925 = vector.extract_strided_slice %923 {offsets = [4, 0], sizes = [1, 16], strides = [1, 1]} : vector<8x16xf32> to vector<1x16xf32>
      %926 = vector.broadcast %924 : vector<1x1xf32> to vector<1x16xf32>
      %927 = arith.divf %925, %926 : vector<1x16xf32>
      %928 = vector.extract_strided_slice %923 {offsets = [0, 4], sizes = [8, 1], strides = [1, 1]} : vector<8x16xf32> to vector<8x1xf32>
      %c4_i32_126 = arith.constant 4 : i32
      %929 = vector.broadcast %c4_i32_126 : i32 to vector<8x16xi32>
      %930 = arith.cmpi eq, %7, %929 : vector<8x16xi32>
      %931 = vector.broadcast %928 : vector<8x1xf32> to vector<8x16xf32>
      %932 = vector.broadcast %927 : vector<1x16xf32> to vector<8x16xf32>
      %933 = arith.mulf %931, %932 : vector<8x16xf32>
      %934 = arith.subf %923, %933 : vector<8x16xf32>
      %935 = vector.shape_cast %927 : vector<1x16xf32> to vector<1x16xf32>
      %936 = vector.broadcast %935 : vector<1x16xf32> to vector<8x16xf32>
      %937 = arith.select %930, %936, %934 : vector<8x16xi1>, vector<8x16xf32>
      %938 = vector.extract_strided_slice %937 {offsets = [5, 5], sizes = [1, 1], strides = [1, 1]} : vector<8x16xf32> to vector<1x1xf32>
      %939 = vector.extract_strided_slice %937 {offsets = [5, 0], sizes = [1, 16], strides = [1, 1]} : vector<8x16xf32> to vector<1x16xf32>
      %940 = vector.broadcast %938 : vector<1x1xf32> to vector<1x16xf32>
      %941 = arith.divf %939, %940 : vector<1x16xf32>
      %942 = vector.extract_strided_slice %937 {offsets = [0, 5], sizes = [8, 1], strides = [1, 1]} : vector<8x16xf32> to vector<8x1xf32>
      %c5_i32_127 = arith.constant 5 : i32
      %943 = vector.broadcast %c5_i32_127 : i32 to vector<8x16xi32>
      %944 = arith.cmpi eq, %7, %943 : vector<8x16xi32>
      %945 = vector.broadcast %942 : vector<8x1xf32> to vector<8x16xf32>
      %946 = vector.broadcast %941 : vector<1x16xf32> to vector<8x16xf32>
      %947 = arith.mulf %945, %946 : vector<8x16xf32>
      %948 = arith.subf %937, %947 : vector<8x16xf32>
      %949 = vector.shape_cast %941 : vector<1x16xf32> to vector<1x16xf32>
      %950 = vector.broadcast %949 : vector<1x16xf32> to vector<8x16xf32>
      %951 = arith.select %944, %950, %948 : vector<8x16xi1>, vector<8x16xf32>
      %952 = vector.extract_strided_slice %951 {offsets = [6, 6], sizes = [1, 1], strides = [1, 1]} : vector<8x16xf32> to vector<1x1xf32>
      %953 = vector.extract_strided_slice %951 {offsets = [6, 0], sizes = [1, 16], strides = [1, 1]} : vector<8x16xf32> to vector<1x16xf32>
      %954 = vector.broadcast %952 : vector<1x1xf32> to vector<1x16xf32>
      %955 = arith.divf %953, %954 : vector<1x16xf32>
      %956 = vector.extract_strided_slice %951 {offsets = [0, 6], sizes = [8, 1], strides = [1, 1]} : vector<8x16xf32> to vector<8x1xf32>
      %c6_i32_128 = arith.constant 6 : i32
      %957 = vector.broadcast %c6_i32_128 : i32 to vector<8x16xi32>
      %958 = arith.cmpi eq, %7, %957 : vector<8x16xi32>
      %959 = vector.broadcast %956 : vector<8x1xf32> to vector<8x16xf32>
      %960 = vector.broadcast %955 : vector<1x16xf32> to vector<8x16xf32>
      %961 = arith.mulf %959, %960 : vector<8x16xf32>
      %962 = arith.subf %951, %961 : vector<8x16xf32>
      %963 = vector.shape_cast %955 : vector<1x16xf32> to vector<1x16xf32>
      %964 = vector.broadcast %963 : vector<1x16xf32> to vector<8x16xf32>
      %965 = arith.select %958, %964, %962 : vector<8x16xi1>, vector<8x16xf32>
      %966 = vector.extract_strided_slice %965 {offsets = [7, 7], sizes = [1, 1], strides = [1, 1]} : vector<8x16xf32> to vector<1x1xf32>
      %967 = vector.extract_strided_slice %965 {offsets = [7, 0], sizes = [1, 16], strides = [1, 1]} : vector<8x16xf32> to vector<1x16xf32>
      %968 = vector.broadcast %966 : vector<1x1xf32> to vector<1x16xf32>
      %969 = arith.divf %967, %968 : vector<1x16xf32>
      %970 = vector.extract_strided_slice %965 {offsets = [0, 7], sizes = [8, 1], strides = [1, 1]} : vector<8x16xf32> to vector<8x1xf32>
      %c7_i32_129 = arith.constant 7 : i32
      %971 = vector.broadcast %c7_i32_129 : i32 to vector<8x16xi32>
      %972 = arith.cmpi eq, %7, %971 : vector<8x16xi32>
      %973 = vector.broadcast %970 : vector<8x1xf32> to vector<8x16xf32>
      %974 = vector.broadcast %969 : vector<1x16xf32> to vector<8x16xf32>
      %975 = arith.mulf %973, %974 : vector<8x16xf32>
      %976 = arith.subf %965, %975 : vector<8x16xf32>
      %977 = vector.shape_cast %969 : vector<1x16xf32> to vector<1x16xf32>
      %978 = vector.broadcast %977 : vector<1x16xf32> to vector<8x16xf32>
      %979 = arith.select %972, %978, %976 : vector<8x16xi1>, vector<8x16xf32>
      %980 = vector.extract_strided_slice %979 {offsets = [0, 8], sizes = [8, 8], strides = [1, 1]} : vector<8x16xf32> to vector<8x8xf32>
      %981 = tpu.concatenate %868, %882, %896, %910, %924, %938, %952, %966 in 1 : vector<1x1xf32>, vector<1x1xf32>, vector<1x1xf32>, vector<1x1xf32>, vector<1x1xf32>, vector<1x1xf32>, vector<1x1xf32>, vector<1x1xf32> -> vector<1x8xf32>
      %c8_130 = arith.constant 8 : index
      %c0_131 = arith.constant 0 : index
      %982 = vector.load %arg6[%c8_130, %c0_131] : memref<24x8xf32, #tpu.memory_space<vmem>>, vector<8x8xf32>
      %983 = tpu.concatenate %982, %4 in 1 : vector<8x8xf32>, vector<8x8xf32> -> vector<8x16xf32>
      %984 = vector.extract_strided_slice %983 {offsets = [0, 0], sizes = [1, 1], strides = [1, 1]} : vector<8x16xf32> to vector<1x1xf32>
      %985 = vector.extract_strided_slice %983 {offsets = [0, 0], sizes = [1, 16], strides = [1, 1]} : vector<8x16xf32> to vector<1x16xf32>
      %986 = vector.broadcast %984 : vector<1x1xf32> to vector<1x16xf32>
      %987 = arith.divf %985, %986 : vector<1x16xf32>
      %988 = vector.extract_strided_slice %983 {offsets = [0, 0], sizes = [8, 1], strides = [1, 1]} : vector<8x16xf32> to vector<8x1xf32>
      %c0_i32_132 = arith.constant 0 : i32
      %989 = vector.broadcast %c0_i32_132 : i32 to vector<8x16xi32>
      %990 = arith.cmpi eq, %7, %989 : vector<8x16xi32>
      %991 = vector.broadcast %988 : vector<8x1xf32> to vector<8x16xf32>
      %992 = vector.broadcast %987 : vector<1x16xf32> to vector<8x16xf32>
      %993 = arith.mulf %991, %992 : vector<8x16xf32>
      %994 = arith.subf %983, %993 : vector<8x16xf32>
      %995 = vector.shape_cast %987 : vector<1x16xf32> to vector<1x16xf32>
      %996 = vector.broadcast %995 : vector<1x16xf32> to vector<8x16xf32>
      %997 = arith.select %990, %996, %994 : vector<8x16xi1>, vector<8x16xf32>
      %998 = vector.extract_strided_slice %997 {offsets = [1, 1], sizes = [1, 1], strides = [1, 1]} : vector<8x16xf32> to vector<1x1xf32>
      %999 = vector.extract_strided_slice %997 {offsets = [1, 0], sizes = [1, 16], strides = [1, 1]} : vector<8x16xf32> to vector<1x16xf32>
      %1000 = vector.broadcast %998 : vector<1x1xf32> to vector<1x16xf32>
      %1001 = arith.divf %999, %1000 : vector<1x16xf32>
      %1002 = vector.extract_strided_slice %997 {offsets = [0, 1], sizes = [8, 1], strides = [1, 1]} : vector<8x16xf32> to vector<8x1xf32>
      %c1_i32_133 = arith.constant 1 : i32
      %1003 = vector.broadcast %c1_i32_133 : i32 to vector<8x16xi32>
      %1004 = arith.cmpi eq, %7, %1003 : vector<8x16xi32>
      %1005 = vector.broadcast %1002 : vector<8x1xf32> to vector<8x16xf32>
      %1006 = vector.broadcast %1001 : vector<1x16xf32> to vector<8x16xf32>
      %1007 = arith.mulf %1005, %1006 : vector<8x16xf32>
      %1008 = arith.subf %997, %1007 : vector<8x16xf32>
      %1009 = vector.shape_cast %1001 : vector<1x16xf32> to vector<1x16xf32>
      %1010 = vector.broadcast %1009 : vector<1x16xf32> to vector<8x16xf32>
      %1011 = arith.select %1004, %1010, %1008 : vector<8x16xi1>, vector<8x16xf32>
      %1012 = vector.extract_strided_slice %1011 {offsets = [2, 2], sizes = [1, 1], strides = [1, 1]} : vector<8x16xf32> to vector<1x1xf32>
      %1013 = vector.extract_strided_slice %1011 {offsets = [2, 0], sizes = [1, 16], strides = [1, 1]} : vector<8x16xf32> to vector<1x16xf32>
      %1014 = vector.broadcast %1012 : vector<1x1xf32> to vector<1x16xf32>
      %1015 = arith.divf %1013, %1014 : vector<1x16xf32>
      %1016 = vector.extract_strided_slice %1011 {offsets = [0, 2], sizes = [8, 1], strides = [1, 1]} : vector<8x16xf32> to vector<8x1xf32>
      %c2_i32_134 = arith.constant 2 : i32
      %1017 = vector.broadcast %c2_i32_134 : i32 to vector<8x16xi32>
      %1018 = arith.cmpi eq, %7, %1017 : vector<8x16xi32>
      %1019 = vector.broadcast %1016 : vector<8x1xf32> to vector<8x16xf32>
      %1020 = vector.broadcast %1015 : vector<1x16xf32> to vector<8x16xf32>
      %1021 = arith.mulf %1019, %1020 : vector<8x16xf32>
      %1022 = arith.subf %1011, %1021 : vector<8x16xf32>
      %1023 = vector.shape_cast %1015 : vector<1x16xf32> to vector<1x16xf32>
      %1024 = vector.broadcast %1023 : vector<1x16xf32> to vector<8x16xf32>
      %1025 = arith.select %1018, %1024, %1022 : vector<8x16xi1>, vector<8x16xf32>
      %1026 = vector.extract_strided_slice %1025 {offsets = [3, 3], sizes = [1, 1], strides = [1, 1]} : vector<8x16xf32> to vector<1x1xf32>
      %1027 = vector.extract_strided_slice %1025 {offsets = [3, 0], sizes = [1, 16], strides = [1, 1]} : vector<8x16xf32> to vector<1x16xf32>
      %1028 = vector.broadcast %1026 : vector<1x1xf32> to vector<1x16xf32>
      %1029 = arith.divf %1027, %1028 : vector<1x16xf32>
      %1030 = vector.extract_strided_slice %1025 {offsets = [0, 3], sizes = [8, 1], strides = [1, 1]} : vector<8x16xf32> to vector<8x1xf32>
      %c3_i32_135 = arith.constant 3 : i32
      %1031 = vector.broadcast %c3_i32_135 : i32 to vector<8x16xi32>
      %1032 = arith.cmpi eq, %7, %1031 : vector<8x16xi32>
      %1033 = vector.broadcast %1030 : vector<8x1xf32> to vector<8x16xf32>
      %1034 = vector.broadcast %1029 : vector<1x16xf32> to vector<8x16xf32>
      %1035 = arith.mulf %1033, %1034 : vector<8x16xf32>
      %1036 = arith.subf %1025, %1035 : vector<8x16xf32>
      %1037 = vector.shape_cast %1029 : vector<1x16xf32> to vector<1x16xf32>
      %1038 = vector.broadcast %1037 : vector<1x16xf32> to vector<8x16xf32>
      %1039 = arith.select %1032, %1038, %1036 : vector<8x16xi1>, vector<8x16xf32>
      %1040 = vector.extract_strided_slice %1039 {offsets = [4, 4], sizes = [1, 1], strides = [1, 1]} : vector<8x16xf32> to vector<1x1xf32>
      %1041 = vector.extract_strided_slice %1039 {offsets = [4, 0], sizes = [1, 16], strides = [1, 1]} : vector<8x16xf32> to vector<1x16xf32>
      %1042 = vector.broadcast %1040 : vector<1x1xf32> to vector<1x16xf32>
      %1043 = arith.divf %1041, %1042 : vector<1x16xf32>
      %1044 = vector.extract_strided_slice %1039 {offsets = [0, 4], sizes = [8, 1], strides = [1, 1]} : vector<8x16xf32> to vector<8x1xf32>
      %c4_i32_136 = arith.constant 4 : i32
      %1045 = vector.broadcast %c4_i32_136 : i32 to vector<8x16xi32>
      %1046 = arith.cmpi eq, %7, %1045 : vector<8x16xi32>
      %1047 = vector.broadcast %1044 : vector<8x1xf32> to vector<8x16xf32>
      %1048 = vector.broadcast %1043 : vector<1x16xf32> to vector<8x16xf32>
      %1049 = arith.mulf %1047, %1048 : vector<8x16xf32>
      %1050 = arith.subf %1039, %1049 : vector<8x16xf32>
      %1051 = vector.shape_cast %1043 : vector<1x16xf32> to vector<1x16xf32>
      %1052 = vector.broadcast %1051 : vector<1x16xf32> to vector<8x16xf32>
      %1053 = arith.select %1046, %1052, %1050 : vector<8x16xi1>, vector<8x16xf32>
      %1054 = vector.extract_strided_slice %1053 {offsets = [5, 5], sizes = [1, 1], strides = [1, 1]} : vector<8x16xf32> to vector<1x1xf32>
      %1055 = vector.extract_strided_slice %1053 {offsets = [5, 0], sizes = [1, 16], strides = [1, 1]} : vector<8x16xf32> to vector<1x16xf32>
      %1056 = vector.broadcast %1054 : vector<1x1xf32> to vector<1x16xf32>
      %1057 = arith.divf %1055, %1056 : vector<1x16xf32>
      %1058 = vector.extract_strided_slice %1053 {offsets = [0, 5], sizes = [8, 1], strides = [1, 1]} : vector<8x16xf32> to vector<8x1xf32>
      %c5_i32_137 = arith.constant 5 : i32
      %1059 = vector.broadcast %c5_i32_137 : i32 to vector<8x16xi32>
      %1060 = arith.cmpi eq, %7, %1059 : vector<8x16xi32>
      %1061 = vector.broadcast %1058 : vector<8x1xf32> to vector<8x16xf32>
      %1062 = vector.broadcast %1057 : vector<1x16xf32> to vector<8x16xf32>
      %1063 = arith.mulf %1061, %1062 : vector<8x16xf32>
      %1064 = arith.subf %1053, %1063 : vector<8x16xf32>
      %1065 = vector.shape_cast %1057 : vector<1x16xf32> to vector<1x16xf32>
      %1066 = vector.broadcast %1065 : vector<1x16xf32> to vector<8x16xf32>
      %1067 = arith.select %1060, %1066, %1064 : vector<8x16xi1>, vector<8x16xf32>
      %1068 = vector.extract_strided_slice %1067 {offsets = [6, 6], sizes = [1, 1], strides = [1, 1]} : vector<8x16xf32> to vector<1x1xf32>
      %1069 = vector.extract_strided_slice %1067 {offsets = [6, 0], sizes = [1, 16], strides = [1, 1]} : vector<8x16xf32> to vector<1x16xf32>
      %1070 = vector.broadcast %1068 : vector<1x1xf32> to vector<1x16xf32>
      %1071 = arith.divf %1069, %1070 : vector<1x16xf32>
      %1072 = vector.extract_strided_slice %1067 {offsets = [0, 6], sizes = [8, 1], strides = [1, 1]} : vector<8x16xf32> to vector<8x1xf32>
      %c6_i32_138 = arith.constant 6 : i32
      %1073 = vector.broadcast %c6_i32_138 : i32 to vector<8x16xi32>
      %1074 = arith.cmpi eq, %7, %1073 : vector<8x16xi32>
      %1075 = vector.broadcast %1072 : vector<8x1xf32> to vector<8x16xf32>
      %1076 = vector.broadcast %1071 : vector<1x16xf32> to vector<8x16xf32>
      %1077 = arith.mulf %1075, %1076 : vector<8x16xf32>
      %1078 = arith.subf %1067, %1077 : vector<8x16xf32>
      %1079 = vector.shape_cast %1071 : vector<1x16xf32> to vector<1x16xf32>
      %1080 = vector.broadcast %1079 : vector<1x16xf32> to vector<8x16xf32>
      %1081 = arith.select %1074, %1080, %1078 : vector<8x16xi1>, vector<8x16xf32>
      %1082 = vector.extract_strided_slice %1081 {offsets = [7, 7], sizes = [1, 1], strides = [1, 1]} : vector<8x16xf32> to vector<1x1xf32>
      %1083 = vector.extract_strided_slice %1081 {offsets = [7, 0], sizes = [1, 16], strides = [1, 1]} : vector<8x16xf32> to vector<1x16xf32>
      %1084 = vector.broadcast %1082 : vector<1x1xf32> to vector<1x16xf32>
      %1085 = arith.divf %1083, %1084 : vector<1x16xf32>
      %1086 = vector.extract_strided_slice %1081 {offsets = [0, 7], sizes = [8, 1], strides = [1, 1]} : vector<8x16xf32> to vector<8x1xf32>
      %c7_i32_139 = arith.constant 7 : i32
      %1087 = vector.broadcast %c7_i32_139 : i32 to vector<8x16xi32>
      %1088 = arith.cmpi eq, %7, %1087 : vector<8x16xi32>
      %1089 = vector.broadcast %1086 : vector<8x1xf32> to vector<8x16xf32>
      %1090 = vector.broadcast %1085 : vector<1x16xf32> to vector<8x16xf32>
      %1091 = arith.mulf %1089, %1090 : vector<8x16xf32>
      %1092 = arith.subf %1081, %1091 : vector<8x16xf32>
      %1093 = vector.shape_cast %1085 : vector<1x16xf32> to vector<1x16xf32>
      %1094 = vector.broadcast %1093 : vector<1x16xf32> to vector<8x16xf32>
      %1095 = arith.select %1088, %1094, %1092 : vector<8x16xi1>, vector<8x16xf32>
      %1096 = vector.extract_strided_slice %1095 {offsets = [0, 8], sizes = [8, 8], strides = [1, 1]} : vector<8x16xf32> to vector<8x8xf32>
      %1097 = tpu.concatenate %984, %998, %1012, %1026, %1040, %1054, %1068, %1082 in 1 : vector<1x1xf32>, vector<1x1xf32>, vector<1x1xf32>, vector<1x1xf32>, vector<1x1xf32>, vector<1x1xf32>, vector<1x1xf32>, vector<1x1xf32> -> vector<1x8xf32>
      %c16_140 = arith.constant 16 : index
      %c0_141 = arith.constant 0 : index
      %1098 = vector.load %arg6[%c16_140, %c0_141] : memref<24x8xf32, #tpu.memory_space<vmem>>, vector<8x8xf32>
      %1099 = tpu.concatenate %1098, %4 in 1 : vector<8x8xf32>, vector<8x8xf32> -> vector<8x16xf32>
      %1100 = vector.extract_strided_slice %1099 {offsets = [0, 0], sizes = [1, 1], strides = [1, 1]} : vector<8x16xf32> to vector<1x1xf32>
      %1101 = vector.extract_strided_slice %1099 {offsets = [0, 0], sizes = [1, 16], strides = [1, 1]} : vector<8x16xf32> to vector<1x16xf32>
      %1102 = vector.broadcast %1100 : vector<1x1xf32> to vector<1x16xf32>
      %1103 = arith.divf %1101, %1102 : vector<1x16xf32>
      %1104 = vector.extract_strided_slice %1099 {offsets = [0, 0], sizes = [8, 1], strides = [1, 1]} : vector<8x16xf32> to vector<8x1xf32>
      %c0_i32_142 = arith.constant 0 : i32
      %1105 = vector.broadcast %c0_i32_142 : i32 to vector<8x16xi32>
      %1106 = arith.cmpi eq, %7, %1105 : vector<8x16xi32>
      %1107 = vector.broadcast %1104 : vector<8x1xf32> to vector<8x16xf32>
      %1108 = vector.broadcast %1103 : vector<1x16xf32> to vector<8x16xf32>
      %1109 = arith.mulf %1107, %1108 : vector<8x16xf32>
      %1110 = arith.subf %1099, %1109 : vector<8x16xf32>
      %1111 = vector.shape_cast %1103 : vector<1x16xf32> to vector<1x16xf32>
      %1112 = vector.broadcast %1111 : vector<1x16xf32> to vector<8x16xf32>
      %1113 = arith.select %1106, %1112, %1110 : vector<8x16xi1>, vector<8x16xf32>
      %1114 = vector.extract_strided_slice %1113 {offsets = [1, 1], sizes = [1, 1], strides = [1, 1]} : vector<8x16xf32> to vector<1x1xf32>
      %1115 = vector.extract_strided_slice %1113 {offsets = [1, 0], sizes = [1, 16], strides = [1, 1]} : vector<8x16xf32> to vector<1x16xf32>
      %1116 = vector.broadcast %1114 : vector<1x1xf32> to vector<1x16xf32>
      %1117 = arith.divf %1115, %1116 : vector<1x16xf32>
      %1118 = vector.extract_strided_slice %1113 {offsets = [0, 1], sizes = [8, 1], strides = [1, 1]} : vector<8x16xf32> to vector<8x1xf32>
      %c1_i32_143 = arith.constant 1 : i32
      %1119 = vector.broadcast %c1_i32_143 : i32 to vector<8x16xi32>
      %1120 = arith.cmpi eq, %7, %1119 : vector<8x16xi32>
      %1121 = vector.broadcast %1118 : vector<8x1xf32> to vector<8x16xf32>
      %1122 = vector.broadcast %1117 : vector<1x16xf32> to vector<8x16xf32>
      %1123 = arith.mulf %1121, %1122 : vector<8x16xf32>
      %1124 = arith.subf %1113, %1123 : vector<8x16xf32>
      %1125 = vector.shape_cast %1117 : vector<1x16xf32> to vector<1x16xf32>
      %1126 = vector.broadcast %1125 : vector<1x16xf32> to vector<8x16xf32>
      %1127 = arith.select %1120, %1126, %1124 : vector<8x16xi1>, vector<8x16xf32>
      %1128 = vector.extract_strided_slice %1127 {offsets = [2, 2], sizes = [1, 1], strides = [1, 1]} : vector<8x16xf32> to vector<1x1xf32>
      %1129 = vector.extract_strided_slice %1127 {offsets = [2, 0], sizes = [1, 16], strides = [1, 1]} : vector<8x16xf32> to vector<1x16xf32>
      %1130 = vector.broadcast %1128 : vector<1x1xf32> to vector<1x16xf32>
      %1131 = arith.divf %1129, %1130 : vector<1x16xf32>
      %1132 = vector.extract_strided_slice %1127 {offsets = [0, 2], sizes = [8, 1], strides = [1, 1]} : vector<8x16xf32> to vector<8x1xf32>
      %c2_i32_144 = arith.constant 2 : i32
      %1133 = vector.broadcast %c2_i32_144 : i32 to vector<8x16xi32>
      %1134 = arith.cmpi eq, %7, %1133 : vector<8x16xi32>
      %1135 = vector.broadcast %1132 : vector<8x1xf32> to vector<8x16xf32>
      %1136 = vector.broadcast %1131 : vector<1x16xf32> to vector<8x16xf32>
      %1137 = arith.mulf %1135, %1136 : vector<8x16xf32>
      %1138 = arith.subf %1127, %1137 : vector<8x16xf32>
      %1139 = vector.shape_cast %1131 : vector<1x16xf32> to vector<1x16xf32>
      %1140 = vector.broadcast %1139 : vector<1x16xf32> to vector<8x16xf32>
      %1141 = arith.select %1134, %1140, %1138 : vector<8x16xi1>, vector<8x16xf32>
      %1142 = vector.extract_strided_slice %1141 {offsets = [3, 3], sizes = [1, 1], strides = [1, 1]} : vector<8x16xf32> to vector<1x1xf32>
      %1143 = vector.extract_strided_slice %1141 {offsets = [3, 0], sizes = [1, 16], strides = [1, 1]} : vector<8x16xf32> to vector<1x16xf32>
      %1144 = vector.broadcast %1142 : vector<1x1xf32> to vector<1x16xf32>
      %1145 = arith.divf %1143, %1144 : vector<1x16xf32>
      %1146 = vector.extract_strided_slice %1141 {offsets = [0, 3], sizes = [8, 1], strides = [1, 1]} : vector<8x16xf32> to vector<8x1xf32>
      %c3_i32_145 = arith.constant 3 : i32
      %1147 = vector.broadcast %c3_i32_145 : i32 to vector<8x16xi32>
      %1148 = arith.cmpi eq, %7, %1147 : vector<8x16xi32>
      %1149 = vector.broadcast %1146 : vector<8x1xf32> to vector<8x16xf32>
      %1150 = vector.broadcast %1145 : vector<1x16xf32> to vector<8x16xf32>
      %1151 = arith.mulf %1149, %1150 : vector<8x16xf32>
      %1152 = arith.subf %1141, %1151 : vector<8x16xf32>
      %1153 = vector.shape_cast %1145 : vector<1x16xf32> to vector<1x16xf32>
      %1154 = vector.broadcast %1153 : vector<1x16xf32> to vector<8x16xf32>
      %1155 = arith.select %1148, %1154, %1152 : vector<8x16xi1>, vector<8x16xf32>
      %1156 = vector.extract_strided_slice %1155 {offsets = [4, 4], sizes = [1, 1], strides = [1, 1]} : vector<8x16xf32> to vector<1x1xf32>
      %1157 = vector.extract_strided_slice %1155 {offsets = [4, 0], sizes = [1, 16], strides = [1, 1]} : vector<8x16xf32> to vector<1x16xf32>
      %1158 = vector.broadcast %1156 : vector<1x1xf32> to vector<1x16xf32>
      %1159 = arith.divf %1157, %1158 : vector<1x16xf32>
      %1160 = vector.extract_strided_slice %1155 {offsets = [0, 4], sizes = [8, 1], strides = [1, 1]} : vector<8x16xf32> to vector<8x1xf32>
      %c4_i32_146 = arith.constant 4 : i32
      %1161 = vector.broadcast %c4_i32_146 : i32 to vector<8x16xi32>
      %1162 = arith.cmpi eq, %7, %1161 : vector<8x16xi32>
      %1163 = vector.broadcast %1160 : vector<8x1xf32> to vector<8x16xf32>
      %1164 = vector.broadcast %1159 : vector<1x16xf32> to vector<8x16xf32>
      %1165 = arith.mulf %1163, %1164 : vector<8x16xf32>
      %1166 = arith.subf %1155, %1165 : vector<8x16xf32>
      %1167 = vector.shape_cast %1159 : vector<1x16xf32> to vector<1x16xf32>
      %1168 = vector.broadcast %1167 : vector<1x16xf32> to vector<8x16xf32>
      %1169 = arith.select %1162, %1168, %1166 : vector<8x16xi1>, vector<8x16xf32>
      %1170 = vector.extract_strided_slice %1169 {offsets = [5, 5], sizes = [1, 1], strides = [1, 1]} : vector<8x16xf32> to vector<1x1xf32>
      %1171 = vector.extract_strided_slice %1169 {offsets = [5, 0], sizes = [1, 16], strides = [1, 1]} : vector<8x16xf32> to vector<1x16xf32>
      %1172 = vector.broadcast %1170 : vector<1x1xf32> to vector<1x16xf32>
      %1173 = arith.divf %1171, %1172 : vector<1x16xf32>
      %1174 = vector.extract_strided_slice %1169 {offsets = [0, 5], sizes = [8, 1], strides = [1, 1]} : vector<8x16xf32> to vector<8x1xf32>
      %c5_i32_147 = arith.constant 5 : i32
      %1175 = vector.broadcast %c5_i32_147 : i32 to vector<8x16xi32>
      %1176 = arith.cmpi eq, %7, %1175 : vector<8x16xi32>
      %1177 = vector.broadcast %1174 : vector<8x1xf32> to vector<8x16xf32>
      %1178 = vector.broadcast %1173 : vector<1x16xf32> to vector<8x16xf32>
      %1179 = arith.mulf %1177, %1178 : vector<8x16xf32>
      %1180 = arith.subf %1169, %1179 : vector<8x16xf32>
      %1181 = vector.shape_cast %1173 : vector<1x16xf32> to vector<1x16xf32>
      %1182 = vector.broadcast %1181 : vector<1x16xf32> to vector<8x16xf32>
      %1183 = arith.select %1176, %1182, %1180 : vector<8x16xi1>, vector<8x16xf32>
      %1184 = vector.extract_strided_slice %1183 {offsets = [6, 6], sizes = [1, 1], strides = [1, 1]} : vector<8x16xf32> to vector<1x1xf32>
      %1185 = vector.extract_strided_slice %1183 {offsets = [6, 0], sizes = [1, 16], strides = [1, 1]} : vector<8x16xf32> to vector<1x16xf32>
      %1186 = vector.broadcast %1184 : vector<1x1xf32> to vector<1x16xf32>
      %1187 = arith.divf %1185, %1186 : vector<1x16xf32>
      %1188 = vector.extract_strided_slice %1183 {offsets = [0, 6], sizes = [8, 1], strides = [1, 1]} : vector<8x16xf32> to vector<8x1xf32>
      %c6_i32_148 = arith.constant 6 : i32
      %1189 = vector.broadcast %c6_i32_148 : i32 to vector<8x16xi32>
      %1190 = arith.cmpi eq, %7, %1189 : vector<8x16xi32>
      %1191 = vector.broadcast %1188 : vector<8x1xf32> to vector<8x16xf32>
      %1192 = vector.broadcast %1187 : vector<1x16xf32> to vector<8x16xf32>
      %1193 = arith.mulf %1191, %1192 : vector<8x16xf32>
      %1194 = arith.subf %1183, %1193 : vector<8x16xf32>
      %1195 = vector.shape_cast %1187 : vector<1x16xf32> to vector<1x16xf32>
      %1196 = vector.broadcast %1195 : vector<1x16xf32> to vector<8x16xf32>
      %1197 = arith.select %1190, %1196, %1194 : vector<8x16xi1>, vector<8x16xf32>
      %1198 = vector.extract_strided_slice %1197 {offsets = [7, 7], sizes = [1, 1], strides = [1, 1]} : vector<8x16xf32> to vector<1x1xf32>
      %1199 = vector.extract_strided_slice %1197 {offsets = [7, 0], sizes = [1, 16], strides = [1, 1]} : vector<8x16xf32> to vector<1x16xf32>
      %1200 = vector.broadcast %1198 : vector<1x1xf32> to vector<1x16xf32>
      %1201 = arith.divf %1199, %1200 : vector<1x16xf32>
      %1202 = vector.extract_strided_slice %1197 {offsets = [0, 7], sizes = [8, 1], strides = [1, 1]} : vector<8x16xf32> to vector<8x1xf32>
      %c7_i32_149 = arith.constant 7 : i32
      %1203 = vector.broadcast %c7_i32_149 : i32 to vector<8x16xi32>
      %1204 = arith.cmpi eq, %7, %1203 : vector<8x16xi32>
      %1205 = vector.broadcast %1202 : vector<8x1xf32> to vector<8x16xf32>
      %1206 = vector.broadcast %1201 : vector<1x16xf32> to vector<8x16xf32>
      %1207 = arith.mulf %1205, %1206 : vector<8x16xf32>
      %1208 = arith.subf %1197, %1207 : vector<8x16xf32>
      %1209 = vector.shape_cast %1201 : vector<1x16xf32> to vector<1x16xf32>
      %1210 = vector.broadcast %1209 : vector<1x16xf32> to vector<8x16xf32>
      %1211 = arith.select %1204, %1210, %1208 : vector<8x16xi1>, vector<8x16xf32>
      %1212 = vector.extract_strided_slice %1211 {offsets = [0, 8], sizes = [8, 8], strides = [1, 1]} : vector<8x16xf32> to vector<8x8xf32>
      %1213 = tpu.concatenate %1100, %1114, %1128, %1142, %1156, %1170, %1184, %1198 in 1 : vector<1x1xf32>, vector<1x1xf32>, vector<1x1xf32>, vector<1x1xf32>, vector<1x1xf32>, vector<1x1xf32>, vector<1x1xf32>, vector<1x1xf32> -> vector<1x8xf32>
      %1214 = tpu.concatenate %980, %1096, %1212 in 1 : vector<8x8xf32>, vector<8x8xf32>, vector<8x8xf32> -> vector<8x24xf32>
      %cst_150 = arith.constant dense<0.000000e+00> : vector<64x24xf32>
      %1215 = tpu.matmul %8, %1214, %cst_150 {dimension_numbers = #tpu.dot_dimension_numbers<[1], [0], [0], [1], [0, 0, 1, 1], [], []>} : vector<64x8xf32>, vector<8x24xf32>, vector<64x24xf32> -> vector<64x24xf32>
      %cst_151 = arith.constant dense<0.000000e+00> : vector<3x24xf32>
      %1216 = tpu.matmul %865, %1214, %cst_151 {dimension_numbers = #tpu.dot_dimension_numbers<[1], [0], [0], [1], [0, 0, 1, 1], [], []>} : vector<3x8xf32>, vector<8x24xf32>, vector<3x24xf32> -> vector<3x24xf32>
      %1217 = tpu.concatenate %865, %11 in 1 : vector<3x8xf32>, vector<3x1xf32> -> vector<3x9xf32>
      %1218 = vector.extract_strided_slice %1217 {offsets = [0, 0], sizes = [1, 9], strides = [1, 1]} : vector<3x9xf32> to vector<1x9xf32>
      %1219 = vector.broadcast %1218 : vector<1x9xf32> to vector<64x9xf32>
      %1220 = arith.subf %10, %1219 : vector<64x9xf32>
      %1221 = vector.extract_strided_slice %1220 {offsets = [0, 0], sizes = [64, 8], strides = [1, 1]} : vector<64x9xf32> to vector<64x8xf32>
      %1222 = vector.extract_strided_slice %1215 {offsets = [0, 0], sizes = [64, 8], strides = [1, 1]} : vector<64x24xf32> to vector<64x8xf32>
      %1223 = vector.extract_strided_slice %1216 {offsets = [0, 0], sizes = [1, 8], strides = [1, 1]} : vector<3x24xf32> to vector<1x8xf32>
      %1224 = vector.broadcast %1223 : vector<1x8xf32> to vector<64x8xf32>
      %1225 = arith.subf %1222, %1224 : vector<64x8xf32>
      %1226 = arith.mulf %1225, %1221 : vector<64x8xf32>
      %cst_152 = arith.constant dense<0.000000e+00> : vector<64xf32>
      %1227 = vector.multi_reduction <add>, %1226, %cst_152 [1] : vector<64x8xf32> to vector<64xf32>
      %1228 = vector.shape_cast %1227 : vector<64xf32> to vector<64x1xf32>
      %1229 = vector.broadcast %1228 : vector<64x1xf32> to vector<64x9xf32>
      %1230 = arith.mulf %1229, %1220 : vector<64x9xf32>
      %cst_153 = arith.constant dense<0.000000e+00> : vector<9x9xf32>
      %1231 = tpu.matmul %1230, %1220, %cst_153 {dimension_numbers = #tpu.dot_dimension_numbers<[0], [0], [1], [1], [0, 1, 1, 1], [], []>} : vector<64x9xf32>, vector<64x9xf32>, vector<9x9xf32> -> vector<9x9xf32>
      %1232 = vector.extract_strided_slice %1231 {offsets = [8, 8], sizes = [1, 1], strides = [1, 1]} : vector<9x9xf32> to vector<1x1xf32>
      %1233 = vector.extract_strided_slice %865 {offsets = [0, 0], sizes = [1, 8], strides = [1, 1]} : vector<3x8xf32> to vector<1x8xf32>
      %1234 = vector.extract_strided_slice %1231 {offsets = [8, 0], sizes = [1, 8], strides = [1, 1]} : vector<9x9xf32> to vector<1x8xf32>
      %1235 = vector.broadcast %1232 : vector<1x1xf32> to vector<1x8xf32>
      %1236 = arith.divf %1234, %1235 : vector<1x8xf32>
      %1237 = arith.addf %1233, %1236 : vector<1x8xf32>
      %1238 = vector.extract_strided_slice %1231 {offsets = [0, 0], sizes = [8, 8], strides = [1, 1]} : vector<9x9xf32> to vector<8x8xf32>
      %1239 = vector.broadcast %1232 : vector<1x1xf32> to vector<8x8xf32>
      %1240 = arith.divf %1238, %1239 : vector<8x8xf32>
      %1241 = arith.addf %1240, %6 : vector<8x8xf32>
      %c0_154 = arith.constant 0 : index
      %c0_155 = arith.constant 0 : index
      %1242 = vector.load %arg5[%c0_154, %c0_155] : memref<3x8xf32, #tpu.memory_space<vmem>>, vector<1x8xf32>
      tpu.vector_store %arg5[%c0_154, %c0_155], %1237 {strides = array<i32>} : memref<3x8xf32, #tpu.memory_space<vmem>>, vector<1x8xf32>,
      %c0_156 = arith.constant 0 : index
      %c0_157 = arith.constant 0 : index
      %1243 = vector.load %arg6[%c0_156, %c0_157] : memref<24x8xf32, #tpu.memory_space<vmem>>, vector<8x8xf32>
      tpu.vector_store %arg6[%c0_156, %c0_157], %1241 {strides = array<i32>} : memref<24x8xf32, #tpu.memory_space<vmem>>, vector<8x8xf32>,
      %1244 = vector.extract_strided_slice %1217 {offsets = [1, 0], sizes = [1, 9], strides = [1, 1]} : vector<3x9xf32> to vector<1x9xf32>
      %1245 = vector.broadcast %1244 : vector<1x9xf32> to vector<64x9xf32>
      %1246 = arith.subf %10, %1245 : vector<64x9xf32>
      %1247 = vector.extract_strided_slice %1246 {offsets = [0, 0], sizes = [64, 8], strides = [1, 1]} : vector<64x9xf32> to vector<64x8xf32>
      %1248 = vector.extract_strided_slice %1215 {offsets = [0, 8], sizes = [64, 8], strides = [1, 1]} : vector<64x24xf32> to vector<64x8xf32>
      %1249 = vector.extract_strided_slice %1216 {offsets = [1, 8], sizes = [1, 8], strides = [1, 1]} : vector<3x24xf32> to vector<1x8xf32>
      %1250 = vector.broadcast %1249 : vector<1x8xf32> to vector<64x8xf32>
      %1251 = arith.subf %1248, %1250 : vector<64x8xf32>
      %1252 = arith.mulf %1251, %1247 : vector<64x8xf32>
      %cst_158 = arith.constant dense<0.000000e+00> : vector<64xf32>
      %1253 = vector.multi_reduction <add>, %1252, %cst_158 [1] : vector<64x8xf32> to vector<64xf32>
      %1254 = vector.shape_cast %1253 : vector<64xf32> to vector<64x1xf32>
      %1255 = vector.broadcast %1254 : vector<64x1xf32> to vector<64x9xf32>
      %1256 = arith.mulf %1255, %1246 : vector<64x9xf32>
      %cst_159 = arith.constant dense<0.000000e+00> : vector<9x9xf32>
      %1257 = tpu.matmul %1256, %1246, %cst_159 {dimension_numbers = #tpu.dot_dimension_numbers<[0], [0], [1], [1], [0, 1, 1, 1], [], []>} : vector<64x9xf32>, vector<64x9xf32>, vector<9x9xf32> -> vector<9x9xf32>
      %1258 = vector.extract_strided_slice %1257 {offsets = [8, 8], sizes = [1, 1], strides = [1, 1]} : vector<9x9xf32> to vector<1x1xf32>
      %1259 = vector.extract_strided_slice %865 {offsets = [1, 0], sizes = [1, 8], strides = [1, 1]} : vector<3x8xf32> to vector<1x8xf32>
      %1260 = vector.extract_strided_slice %1257 {offsets = [8, 0], sizes = [1, 8], strides = [1, 1]} : vector<9x9xf32> to vector<1x8xf32>
      %1261 = vector.broadcast %1258 : vector<1x1xf32> to vector<1x8xf32>
      %1262 = arith.divf %1260, %1261 : vector<1x8xf32>
      %1263 = arith.addf %1259, %1262 : vector<1x8xf32>
      %1264 = vector.extract_strided_slice %1257 {offsets = [0, 0], sizes = [8, 8], strides = [1, 1]} : vector<9x9xf32> to vector<8x8xf32>
      %1265 = vector.broadcast %1258 : vector<1x1xf32> to vector<8x8xf32>
      %1266 = arith.divf %1264, %1265 : vector<8x8xf32>
      %1267 = arith.addf %1266, %6 : vector<8x8xf32>
      %c1_160 = arith.constant 1 : index
      %c0_161 = arith.constant 0 : index
      %1268 = vector.load %arg5[%c1_160, %c0_161] : memref<3x8xf32, #tpu.memory_space<vmem>>, vector<1x8xf32>
      tpu.vector_store %arg5[%c1_160, %c0_161], %1263 {strides = array<i32>} : memref<3x8xf32, #tpu.memory_space<vmem>>, vector<1x8xf32>,
      %c8_162 = arith.constant 8 : index
      %c0_163 = arith.constant 0 : index
      %1269 = vector.load %arg6[%c8_162, %c0_163] : memref<24x8xf32, #tpu.memory_space<vmem>>, vector<8x8xf32>
      tpu.vector_store %arg6[%c8_162, %c0_163], %1267 {strides = array<i32>} : memref<24x8xf32, #tpu.memory_space<vmem>>, vector<8x8xf32>,
      %1270 = vector.extract_strided_slice %1217 {offsets = [2, 0], sizes = [1, 9], strides = [1, 1]} : vector<3x9xf32> to vector<1x9xf32>
      %1271 = vector.broadcast %1270 : vector<1x9xf32> to vector<64x9xf32>
      %1272 = arith.subf %10, %1271 : vector<64x9xf32>
      %1273 = vector.extract_strided_slice %1272 {offsets = [0, 0], sizes = [64, 8], strides = [1, 1]} : vector<64x9xf32> to vector<64x8xf32>
      %1274 = vector.extract_strided_slice %1215 {offsets = [0, 16], sizes = [64, 8], strides = [1, 1]} : vector<64x24xf32> to vector<64x8xf32>
      %1275 = vector.extract_strided_slice %1216 {offsets = [2, 16], sizes = [1, 8], strides = [1, 1]} : vector<3x24xf32> to vector<1x8xf32>
      %1276 = vector.broadcast %1275 : vector<1x8xf32> to vector<64x8xf32>
      %1277 = arith.subf %1274, %1276 : vector<64x8xf32>
      %1278 = arith.mulf %1277, %1273 : vector<64x8xf32>
      %cst_164 = arith.constant dense<0.000000e+00> : vector<64xf32>
      %1279 = vector.multi_reduction <add>, %1278, %cst_164 [1] : vector<64x8xf32> to vector<64xf32>
      %1280 = vector.shape_cast %1279 : vector<64xf32> to vector<64x1xf32>
      %1281 = vector.broadcast %1280 : vector<64x1xf32> to vector<64x9xf32>
      %1282 = arith.mulf %1281, %1272 : vector<64x9xf32>
      %cst_165 = arith.constant dense<0.000000e+00> : vector<9x9xf32>
      %1283 = tpu.matmul %1282, %1272, %cst_165 {dimension_numbers = #tpu.dot_dimension_numbers<[0], [0], [1], [1], [0, 1, 1, 1], [], []>} : vector<64x9xf32>, vector<64x9xf32>, vector<9x9xf32> -> vector<9x9xf32>
      %1284 = vector.extract_strided_slice %1283 {offsets = [8, 8], sizes = [1, 1], strides = [1, 1]} : vector<9x9xf32> to vector<1x1xf32>
      %1285 = vector.extract_strided_slice %865 {offsets = [2, 0], sizes = [1, 8], strides = [1, 1]} : vector<3x8xf32> to vector<1x8xf32>
      %1286 = vector.extract_strided_slice %1283 {offsets = [8, 0], sizes = [1, 8], strides = [1, 1]} : vector<9x9xf32> to vector<1x8xf32>
      %1287 = vector.broadcast %1284 : vector<1x1xf32> to vector<1x8xf32>
      %1288 = arith.divf %1286, %1287 : vector<1x8xf32>
      %1289 = arith.addf %1285, %1288 : vector<1x8xf32>
      %1290 = vector.extract_strided_slice %1283 {offsets = [0, 0], sizes = [8, 8], strides = [1, 1]} : vector<9x9xf32> to vector<8x8xf32>
      %1291 = vector.broadcast %1284 : vector<1x1xf32> to vector<8x8xf32>
      %1292 = arith.divf %1290, %1291 : vector<8x8xf32>
      %1293 = arith.addf %1292, %6 : vector<8x8xf32>
      %c2_166 = arith.constant 2 : index
      %c0_167 = arith.constant 0 : index
      %1294 = vector.load %arg5[%c2_166, %c0_167] : memref<3x8xf32, #tpu.memory_space<vmem>>, vector<1x8xf32>
      tpu.vector_store %arg5[%c2_166, %c0_167], %1289 {strides = array<i32>} : memref<3x8xf32, #tpu.memory_space<vmem>>, vector<1x8xf32>,
      %c16_168 = arith.constant 16 : index
      %c0_169 = arith.constant 0 : index
      %1295 = vector.load %arg6[%c16_168, %c0_169] : memref<24x8xf32, #tpu.memory_space<vmem>>, vector<8x8xf32>
      tpu.vector_store %arg6[%c16_168, %c0_169], %1293 {strides = array<i32>} : memref<24x8xf32, #tpu.memory_space<vmem>>, vector<8x8xf32>,
      %c0_170 = arith.constant 0 : index
      %c0_171 = arith.constant 0 : index
      %1296 = vector.load %arg5[%c0_170, %c0_171] : memref<3x8xf32, #tpu.memory_space<vmem>>, vector<3x8xf32>
      %c0_172 = arith.constant 0 : index
      %c0_173 = arith.constant 0 : index
      %1297 = vector.load %arg7[%c0_172, %c0_173] : memref<3x8xf32, #tpu.memory_space<vmem>>, vector<3x8xf32>
      %1298 = arith.subf %1296, %1297 : vector<3x8xf32>
      %1299 = arith.mulf %1298, %1298 : vector<3x8xf32>
      %1300 = vector.shape_cast %1299 : vector<3x8xf32> to vector<1x3x8xf32>
      %cst_174 = arith.constant dense<0.000000e+00> : vector<1xf32>
      %1301 = vector.multi_reduction <add>, %1300, %cst_174 [1, 2] : vector<1x3x8xf32> to vector<1xf32>
      %1302 = vector.shape_cast %1301 : vector<1xf32> to vector<1x1x1xf32>
      %1303 = vector.extract %1302[0, 0, 0] : f32 from vector<1x1x1xf32>
      %1304 = arith.cmpf ole, %1303, %12 : f32
      %1305 = arith.extui %1304 : i1 to i32
      %c0_175 = arith.constant 0 : index
      %c0_176 = arith.constant 0 : index
      %1306 = vector.load %arg7[%c0_175, %c0_176] : memref<3x8xf32, #tpu.memory_space<vmem>>, vector<3x8xf32>
      tpu.vector_store %arg7[%c0_175, %c0_176], %1296 {strides = array<i32>} : memref<3x8xf32, #tpu.memory_space<vmem>>, vector<3x8xf32>,
      %c1_i32_177 = arith.constant 1 : i32
      %1307 = arith.addi %arg8, %c1_i32_177 : i32
      scf.yield %1307, %1305 : i32, i32
    }
    %c0_18 = arith.constant 0 : index
    %c0_19 = arith.constant 0 : index
    %20 = vector.load %arg5[%c0_18, %c0_19] : memref<3x8xf32, #tpu.memory_space<vmem>>, vector<3x8xf32>
    %c0_20 = arith.constant 0 : index
    %c0_21 = arith.constant 0 : index
    %21 = vector.load %arg6[%c0_20, %c0_21] : memref<24x8xf32, #tpu.memory_space<vmem>>, vector<8x8xf32>
    %22 = tpu.concatenate %21, %4 in 1 : vector<8x8xf32>, vector<8x8xf32> -> vector<8x16xf32>
    %23 = vector.extract_strided_slice %22 {offsets = [0, 0], sizes = [1, 1], strides = [1, 1]} : vector<8x16xf32> to vector<1x1xf32>
    %24 = vector.extract_strided_slice %22 {offsets = [0, 0], sizes = [1, 16], strides = [1, 1]} : vector<8x16xf32> to vector<1x16xf32>
    %25 = vector.broadcast %23 : vector<1x1xf32> to vector<1x16xf32>
    %26 = arith.divf %24, %25 : vector<1x16xf32>
    %27 = vector.extract_strided_slice %22 {offsets = [0, 0], sizes = [8, 1], strides = [1, 1]} : vector<8x16xf32> to vector<8x1xf32>
    %c0_i32_22 = arith.constant 0 : i32
    %28 = vector.broadcast %c0_i32_22 : i32 to vector<8x16xi32>
    %29 = arith.cmpi eq, %7, %28 : vector<8x16xi32>
    %30 = vector.broadcast %27 : vector<8x1xf32> to vector<8x16xf32>
    %31 = vector.broadcast %26 : vector<1x16xf32> to vector<8x16xf32>
    %32 = arith.mulf %30, %31 : vector<8x16xf32>
    %33 = arith.subf %22, %32 : vector<8x16xf32>
    %34 = vector.shape_cast %26 : vector<1x16xf32> to vector<1x16xf32>
    %35 = vector.broadcast %34 : vector<1x16xf32> to vector<8x16xf32>
    %36 = arith.select %29, %35, %33 : vector<8x16xi1>, vector<8x16xf32>
    %37 = vector.extract_strided_slice %36 {offsets = [1, 1], sizes = [1, 1], strides = [1, 1]} : vector<8x16xf32> to vector<1x1xf32>
    %38 = vector.extract_strided_slice %36 {offsets = [1, 0], sizes = [1, 16], strides = [1, 1]} : vector<8x16xf32> to vector<1x16xf32>
    %39 = vector.broadcast %37 : vector<1x1xf32> to vector<1x16xf32>
    %40 = arith.divf %38, %39 : vector<1x16xf32>
    %41 = vector.extract_strided_slice %36 {offsets = [0, 1], sizes = [8, 1], strides = [1, 1]} : vector<8x16xf32> to vector<8x1xf32>
    %c1_i32 = arith.constant 1 : i32
    %42 = vector.broadcast %c1_i32 : i32 to vector<8x16xi32>
    %43 = arith.cmpi eq, %7, %42 : vector<8x16xi32>
    %44 = vector.broadcast %41 : vector<8x1xf32> to vector<8x16xf32>
    %45 = vector.broadcast %40 : vector<1x16xf32> to vector<8x16xf32>
    %46 = arith.mulf %44, %45 : vector<8x16xf32>
    %47 = arith.subf %36, %46 : vector<8x16xf32>
    %48 = vector.shape_cast %40 : vector<1x16xf32> to vector<1x16xf32>
    %49 = vector.broadcast %48 : vector<1x16xf32> to vector<8x16xf32>
    %50 = arith.select %43, %49, %47 : vector<8x16xi1>, vector<8x16xf32>
    %51 = vector.extract_strided_slice %50 {offsets = [2, 2], sizes = [1, 1], strides = [1, 1]} : vector<8x16xf32> to vector<1x1xf32>
    %52 = vector.extract_strided_slice %50 {offsets = [2, 0], sizes = [1, 16], strides = [1, 1]} : vector<8x16xf32> to vector<1x16xf32>
    %53 = vector.broadcast %51 : vector<1x1xf32> to vector<1x16xf32>
    %54 = arith.divf %52, %53 : vector<1x16xf32>
    %55 = vector.extract_strided_slice %50 {offsets = [0, 2], sizes = [8, 1], strides = [1, 1]} : vector<8x16xf32> to vector<8x1xf32>
    %c2_i32 = arith.constant 2 : i32
    %56 = vector.broadcast %c2_i32 : i32 to vector<8x16xi32>
    %57 = arith.cmpi eq, %7, %56 : vector<8x16xi32>
    %58 = vector.broadcast %55 : vector<8x1xf32> to vector<8x16xf32>
    %59 = vector.broadcast %54 : vector<1x16xf32> to vector<8x16xf32>
    %60 = arith.mulf %58, %59 : vector<8x16xf32>
    %61 = arith.subf %50, %60 : vector<8x16xf32>
    %62 = vector.shape_cast %54 : vector<1x16xf32> to vector<1x16xf32>
    %63 = vector.broadcast %62 : vector<1x16xf32> to vector<8x16xf32>
    %64 = arith.select %57, %63, %61 : vector<8x16xi1>, vector<8x16xf32>
    %65 = vector.extract_strided_slice %64 {offsets = [3, 3], sizes = [1, 1], strides = [1, 1]} : vector<8x16xf32> to vector<1x1xf32>
    %66 = vector.extract_strided_slice %64 {offsets = [3, 0], sizes = [1, 16], strides = [1, 1]} : vector<8x16xf32> to vector<1x16xf32>
    %67 = vector.broadcast %65 : vector<1x1xf32> to vector<1x16xf32>
    %68 = arith.divf %66, %67 : vector<1x16xf32>
    %69 = vector.extract_strided_slice %64 {offsets = [0, 3], sizes = [8, 1], strides = [1, 1]} : vector<8x16xf32> to vector<8x1xf32>
    %c3_i32 = arith.constant 3 : i32
    %70 = vector.broadcast %c3_i32 : i32 to vector<8x16xi32>
    %71 = arith.cmpi eq, %7, %70 : vector<8x16xi32>
    %72 = vector.broadcast %69 : vector<8x1xf32> to vector<8x16xf32>
    %73 = vector.broadcast %68 : vector<1x16xf32> to vector<8x16xf32>
    %74 = arith.mulf %72, %73 : vector<8x16xf32>
    %75 = arith.subf %64, %74 : vector<8x16xf32>
    %76 = vector.shape_cast %68 : vector<1x16xf32> to vector<1x16xf32>
    %77 = vector.broadcast %76 : vector<1x16xf32> to vector<8x16xf32>
    %78 = arith.select %71, %77, %75 : vector<8x16xi1>, vector<8x16xf32>
    %79 = vector.extract_strided_slice %78 {offsets = [4, 4], sizes = [1, 1], strides = [1, 1]} : vector<8x16xf32> to vector<1x1xf32>
    %80 = vector.extract_strided_slice %78 {offsets = [4, 0], sizes = [1, 16], strides = [1, 1]} : vector<8x16xf32> to vector<1x16xf32>
    %81 = vector.broadcast %79 : vector<1x1xf32> to vector<1x16xf32>
    %82 = arith.divf %80, %81 : vector<1x16xf32>
    %83 = vector.extract_strided_slice %78 {offsets = [0, 4], sizes = [8, 1], strides = [1, 1]} : vector<8x16xf32> to vector<8x1xf32>
    %c4_i32 = arith.constant 4 : i32
    %84 = vector.broadcast %c4_i32 : i32 to vector<8x16xi32>
    %85 = arith.cmpi eq, %7, %84 : vector<8x16xi32>
    %86 = vector.broadcast %83 : vector<8x1xf32> to vector<8x16xf32>
    %87 = vector.broadcast %82 : vector<1x16xf32> to vector<8x16xf32>
    %88 = arith.mulf %86, %87 : vector<8x16xf32>
    %89 = arith.subf %78, %88 : vector<8x16xf32>
    %90 = vector.shape_cast %82 : vector<1x16xf32> to vector<1x16xf32>
    %91 = vector.broadcast %90 : vector<1x16xf32> to vector<8x16xf32>
    %92 = arith.select %85, %91, %89 : vector<8x16xi1>, vector<8x16xf32>
    %93 = vector.extract_strided_slice %92 {offsets = [5, 5], sizes = [1, 1], strides = [1, 1]} : vector<8x16xf32> to vector<1x1xf32>
    %94 = vector.extract_strided_slice %92 {offsets = [5, 0], sizes = [1, 16], strides = [1, 1]} : vector<8x16xf32> to vector<1x16xf32>
    %95 = vector.broadcast %93 : vector<1x1xf32> to vector<1x16xf32>
    %96 = arith.divf %94, %95 : vector<1x16xf32>
    %97 = vector.extract_strided_slice %92 {offsets = [0, 5], sizes = [8, 1], strides = [1, 1]} : vector<8x16xf32> to vector<8x1xf32>
    %c5_i32 = arith.constant 5 : i32
    %98 = vector.broadcast %c5_i32 : i32 to vector<8x16xi32>
    %99 = arith.cmpi eq, %7, %98 : vector<8x16xi32>
    %100 = vector.broadcast %97 : vector<8x1xf32> to vector<8x16xf32>
    %101 = vector.broadcast %96 : vector<1x16xf32> to vector<8x16xf32>
    %102 = arith.mulf %100, %101 : vector<8x16xf32>
    %103 = arith.subf %92, %102 : vector<8x16xf32>
    %104 = vector.shape_cast %96 : vector<1x16xf32> to vector<1x16xf32>
    %105 = vector.broadcast %104 : vector<1x16xf32> to vector<8x16xf32>
    %106 = arith.select %99, %105, %103 : vector<8x16xi1>, vector<8x16xf32>
    %107 = vector.extract_strided_slice %106 {offsets = [6, 6], sizes = [1, 1], strides = [1, 1]} : vector<8x16xf32> to vector<1x1xf32>
    %108 = vector.extract_strided_slice %106 {offsets = [6, 0], sizes = [1, 16], strides = [1, 1]} : vector<8x16xf32> to vector<1x16xf32>
    %109 = vector.broadcast %107 : vector<1x1xf32> to vector<1x16xf32>
    %110 = arith.divf %108, %109 : vector<1x16xf32>
    %111 = vector.extract_strided_slice %106 {offsets = [0, 6], sizes = [8, 1], strides = [1, 1]} : vector<8x16xf32> to vector<8x1xf32>
    %c6_i32 = arith.constant 6 : i32
    %112 = vector.broadcast %c6_i32 : i32 to vector<8x16xi32>
    %113 = arith.cmpi eq, %7, %112 : vector<8x16xi32>
    %114 = vector.broadcast %111 : vector<8x1xf32> to vector<8x16xf32>
    %115 = vector.broadcast %110 : vector<1x16xf32> to vector<8x16xf32>
    %116 = arith.mulf %114, %115 : vector<8x16xf32>
    %117 = arith.subf %106, %116 : vector<8x16xf32>
    %118 = vector.shape_cast %110 : vector<1x16xf32> to vector<1x16xf32>
    %119 = vector.broadcast %118 : vector<1x16xf32> to vector<8x16xf32>
    %120 = arith.select %113, %119, %117 : vector<8x16xi1>, vector<8x16xf32>
    %121 = vector.extract_strided_slice %120 {offsets = [7, 7], sizes = [1, 1], strides = [1, 1]} : vector<8x16xf32> to vector<1x1xf32>
    %122 = vector.extract_strided_slice %120 {offsets = [7, 0], sizes = [1, 16], strides = [1, 1]} : vector<8x16xf32> to vector<1x16xf32>
    %123 = vector.broadcast %121 : vector<1x1xf32> to vector<1x16xf32>
    %124 = arith.divf %122, %123 : vector<1x16xf32>
    %125 = vector.extract_strided_slice %120 {offsets = [0, 7], sizes = [8, 1], strides = [1, 1]} : vector<8x16xf32> to vector<8x1xf32>
    %c7_i32 = arith.constant 7 : i32
    %126 = vector.broadcast %c7_i32 : i32 to vector<8x16xi32>
    %127 = arith.cmpi eq, %7, %126 : vector<8x16xi32>
    %128 = vector.broadcast %125 : vector<8x1xf32> to vector<8x16xf32>
    %129 = vector.broadcast %124 : vector<1x16xf32> to vector<8x16xf32>
    %130 = arith.mulf %128, %129 : vector<8x16xf32>
    %131 = arith.subf %120, %130 : vector<8x16xf32>
    %132 = vector.shape_cast %124 : vector<1x16xf32> to vector<1x16xf32>
    %133 = vector.broadcast %132 : vector<1x16xf32> to vector<8x16xf32>
    %134 = arith.select %127, %133, %131 : vector<8x16xi1>, vector<8x16xf32>
    %135 = vector.extract_strided_slice %134 {offsets = [0, 8], sizes = [8, 8], strides = [1, 1]} : vector<8x16xf32> to vector<8x8xf32>
    %c8 = arith.constant 8 : index
    %c0_23 = arith.constant 0 : index
    %136 = vector.load %arg6[%c8, %c0_23] : memref<24x8xf32, #tpu.memory_space<vmem>>, vector<8x8xf32>
    %137 = tpu.concatenate %136, %4 in 1 : vector<8x8xf32>, vector<8x8xf32> -> vector<8x16xf32>
    %138 = vector.extract_strided_slice %137 {offsets = [0, 0], sizes = [1, 1], strides = [1, 1]} : vector<8x16xf32> to vector<1x1xf32>
    %139 = vector.extract_strided_slice %137 {offsets = [0, 0], sizes = [1, 16], strides = [1, 1]} : vector<8x16xf32> to vector<1x16xf32>
    %140 = vector.broadcast %138 : vector<1x1xf32> to vector<1x16xf32>
    %141 = arith.divf %139, %140 : vector<1x16xf32>
    %142 = vector.extract_strided_slice %137 {offsets = [0, 0], sizes = [8, 1], strides = [1, 1]} : vector<8x16xf32> to vector<8x1xf32>
    %c0_i32_24 = arith.constant 0 : i32
    %143 = vector.broadcast %c0_i32_24 : i32 to vector<8x16xi32>
    %144 = arith.cmpi eq, %7, %143 : vector<8x16xi32>
    %145 = vector.broadcast %142 : vector<8x1xf32> to vector<8x16xf32>
    %146 = vector.broadcast %141 : vector<1x16xf32> to vector<8x16xf32>
    %147 = arith.mulf %145, %146 : vector<8x16xf32>
    %148 = arith.subf %137, %147 : vector<8x16xf32>
    %149 = vector.shape_cast %141 : vector<1x16xf32> to vector<1x16xf32>
    %150 = vector.broadcast %149 : vector<1x16xf32> to vector<8x16xf32>
    %151 = arith.select %144, %150, %148 : vector<8x16xi1>, vector<8x16xf32>
    %152 = vector.extract_strided_slice %151 {offsets = [1, 1], sizes = [1, 1], strides = [1, 1]} : vector<8x16xf32> to vector<1x1xf32>
    %153 = vector.extract_strided_slice %151 {offsets = [1, 0], sizes = [1, 16], strides = [1, 1]} : vector<8x16xf32> to vector<1x16xf32>
    %154 = vector.broadcast %152 : vector<1x1xf32> to vector<1x16xf32>
    %155 = arith.divf %153, %154 : vector<1x16xf32>
    %156 = vector.extract_strided_slice %151 {offsets = [0, 1], sizes = [8, 1], strides = [1, 1]} : vector<8x16xf32> to vector<8x1xf32>
    %c1_i32_25 = arith.constant 1 : i32
    %157 = vector.broadcast %c1_i32_25 : i32 to vector<8x16xi32>
    %158 = arith.cmpi eq, %7, %157 : vector<8x16xi32>
    %159 = vector.broadcast %156 : vector<8x1xf32> to vector<8x16xf32>
    %160 = vector.broadcast %155 : vector<1x16xf32> to vector<8x16xf32>
    %161 = arith.mulf %159, %160 : vector<8x16xf32>
    %162 = arith.subf %151, %161 : vector<8x16xf32>
    %163 = vector.shape_cast %155 : vector<1x16xf32> to vector<1x16xf32>
    %164 = vector.broadcast %163 : vector<1x16xf32> to vector<8x16xf32>
    %165 = arith.select %158, %164, %162 : vector<8x16xi1>, vector<8x16xf32>
    %166 = vector.extract_strided_slice %165 {offsets = [2, 2], sizes = [1, 1], strides = [1, 1]} : vector<8x16xf32> to vector<1x1xf32>
    %167 = vector.extract_strided_slice %165 {offsets = [2, 0], sizes = [1, 16], strides = [1, 1]} : vector<8x16xf32> to vector<1x16xf32>
    %168 = vector.broadcast %166 : vector<1x1xf32> to vector<1x16xf32>
    %169 = arith.divf %167, %168 : vector<1x16xf32>
    %170 = vector.extract_strided_slice %165 {offsets = [0, 2], sizes = [8, 1], strides = [1, 1]} : vector<8x16xf32> to vector<8x1xf32>
    %c2_i32_26 = arith.constant 2 : i32
    %171 = vector.broadcast %c2_i32_26 : i32 to vector<8x16xi32>
    %172 = arith.cmpi eq, %7, %171 : vector<8x16xi32>
    %173 = vector.broadcast %170 : vector<8x1xf32> to vector<8x16xf32>
    %174 = vector.broadcast %169 : vector<1x16xf32> to vector<8x16xf32>
    %175 = arith.mulf %173, %174 : vector<8x16xf32>
    %176 = arith.subf %165, %175 : vector<8x16xf32>
    %177 = vector.shape_cast %169 : vector<1x16xf32> to vector<1x16xf32>
    %178 = vector.broadcast %177 : vector<1x16xf32> to vector<8x16xf32>
    %179 = arith.select %172, %178, %176 : vector<8x16xi1>, vector<8x16xf32>
    %180 = vector.extract_strided_slice %179 {offsets = [3, 3], sizes = [1, 1], strides = [1, 1]} : vector<8x16xf32> to vector<1x1xf32>
    %181 = vector.extract_strided_slice %179 {offsets = [3, 0], sizes = [1, 16], strides = [1, 1]} : vector<8x16xf32> to vector<1x16xf32>
    %182 = vector.broadcast %180 : vector<1x1xf32> to vector<1x16xf32>
    %183 = arith.divf %181, %182 : vector<1x16xf32>
    %184 = vector.extract_strided_slice %179 {offsets = [0, 3], sizes = [8, 1], strides = [1, 1]} : vector<8x16xf32> to vector<8x1xf32>
    %c3_i32_27 = arith.constant 3 : i32
    %185 = vector.broadcast %c3_i32_27 : i32 to vector<8x16xi32>
    %186 = arith.cmpi eq, %7, %185 : vector<8x16xi32>
    %187 = vector.broadcast %184 : vector<8x1xf32> to vector<8x16xf32>
    %188 = vector.broadcast %183 : vector<1x16xf32> to vector<8x16xf32>
    %189 = arith.mulf %187, %188 : vector<8x16xf32>
    %190 = arith.subf %179, %189 : vector<8x16xf32>
    %191 = vector.shape_cast %183 : vector<1x16xf32> to vector<1x16xf32>
    %192 = vector.broadcast %191 : vector<1x16xf32> to vector<8x16xf32>
    %193 = arith.select %186, %192, %190 : vector<8x16xi1>, vector<8x16xf32>
    %194 = vector.extract_strided_slice %193 {offsets = [4, 4], sizes = [1, 1], strides = [1, 1]} : vector<8x16xf32> to vector<1x1xf32>
    %195 = vector.extract_strided_slice %193 {offsets = [4, 0], sizes = [1, 16], strides = [1, 1]} : vector<8x16xf32> to vector<1x16xf32>
    %196 = vector.broadcast %194 : vector<1x1xf32> to vector<1x16xf32>
    %197 = arith.divf %195, %196 : vector<1x16xf32>
    %198 = vector.extract_strided_slice %193 {offsets = [0, 4], sizes = [8, 1], strides = [1, 1]} : vector<8x16xf32> to vector<8x1xf32>
    %c4_i32_28 = arith.constant 4 : i32
    %199 = vector.broadcast %c4_i32_28 : i32 to vector<8x16xi32>
    %200 = arith.cmpi eq, %7, %199 : vector<8x16xi32>
    %201 = vector.broadcast %198 : vector<8x1xf32> to vector<8x16xf32>
    %202 = vector.broadcast %197 : vector<1x16xf32> to vector<8x16xf32>
    %203 = arith.mulf %201, %202 : vector<8x16xf32>
    %204 = arith.subf %193, %203 : vector<8x16xf32>
    %205 = vector.shape_cast %197 : vector<1x16xf32> to vector<1x16xf32>
    %206 = vector.broadcast %205 : vector<1x16xf32> to vector<8x16xf32>
    %207 = arith.select %200, %206, %204 : vector<8x16xi1>, vector<8x16xf32>
    %208 = vector.extract_strided_slice %207 {offsets = [5, 5], sizes = [1, 1], strides = [1, 1]} : vector<8x16xf32> to vector<1x1xf32>
    %209 = vector.extract_strided_slice %207 {offsets = [5, 0], sizes = [1, 16], strides = [1, 1]} : vector<8x16xf32> to vector<1x16xf32>
    %210 = vector.broadcast %208 : vector<1x1xf32> to vector<1x16xf32>
    %211 = arith.divf %209, %210 : vector<1x16xf32>
    %212 = vector.extract_strided_slice %207 {offsets = [0, 5], sizes = [8, 1], strides = [1, 1]} : vector<8x16xf32> to vector<8x1xf32>
    %c5_i32_29 = arith.constant 5 : i32
    %213 = vector.broadcast %c5_i32_29 : i32 to vector<8x16xi32>
    %214 = arith.cmpi eq, %7, %213 : vector<8x16xi32>
    %215 = vector.broadcast %212 : vector<8x1xf32> to vector<8x16xf32>
    %216 = vector.broadcast %211 : vector<1x16xf32> to vector<8x16xf32>
    %217 = arith.mulf %215, %216 : vector<8x16xf32>
    %218 = arith.subf %207, %217 : vector<8x16xf32>
    %219 = vector.shape_cast %211 : vector<1x16xf32> to vector<1x16xf32>
    %220 = vector.broadcast %219 : vector<1x16xf32> to vector<8x16xf32>
    %221 = arith.select %214, %220, %218 : vector<8x16xi1>, vector<8x16xf32>
    %222 = vector.extract_strided_slice %221 {offsets = [6, 6], sizes = [1, 1], strides = [1, 1]} : vector<8x16xf32> to vector<1x1xf32>
    %223 = vector.extract_strided_slice %221 {offsets = [6, 0], sizes = [1, 16], strides = [1, 1]} : vector<8x16xf32> to vector<1x16xf32>
    %224 = vector.broadcast %222 : vector<1x1xf32> to vector<1x16xf32>
    %225 = arith.divf %223, %224 : vector<1x16xf32>
    %226 = vector.extract_strided_slice %221 {offsets = [0, 6], sizes = [8, 1], strides = [1, 1]} : vector<8x16xf32> to vector<8x1xf32>
    %c6_i32_30 = arith.constant 6 : i32
    %227 = vector.broadcast %c6_i32_30 : i32 to vector<8x16xi32>
    %228 = arith.cmpi eq, %7, %227 : vector<8x16xi32>
    %229 = vector.broadcast %226 : vector<8x1xf32> to vector<8x16xf32>
    %230 = vector.broadcast %225 : vector<1x16xf32> to vector<8x16xf32>
    %231 = arith.mulf %229, %230 : vector<8x16xf32>
    %232 = arith.subf %221, %231 : vector<8x16xf32>
    %233 = vector.shape_cast %225 : vector<1x16xf32> to vector<1x16xf32>
    %234 = vector.broadcast %233 : vector<1x16xf32> to vector<8x16xf32>
    %235 = arith.select %228, %234, %232 : vector<8x16xi1>, vector<8x16xf32>
    %236 = vector.extract_strided_slice %235 {offsets = [7, 7], sizes = [1, 1], strides = [1, 1]} : vector<8x16xf32> to vector<1x1xf32>
    %237 = vector.extract_strided_slice %235 {offsets = [7, 0], sizes = [1, 16], strides = [1, 1]} : vector<8x16xf32> to vector<1x16xf32>
    %238 = vector.broadcast %236 : vector<1x1xf32> to vector<1x16xf32>
    %239 = arith.divf %237, %238 : vector<1x16xf32>
    %240 = vector.extract_strided_slice %235 {offsets = [0, 7], sizes = [8, 1], strides = [1, 1]} : vector<8x16xf32> to vector<8x1xf32>
    %c7_i32_31 = arith.constant 7 : i32
    %241 = vector.broadcast %c7_i32_31 : i32 to vector<8x16xi32>
    %242 = arith.cmpi eq, %7, %241 : vector<8x16xi32>
    %243 = vector.broadcast %240 : vector<8x1xf32> to vector<8x16xf32>
    %244 = vector.broadcast %239 : vector<1x16xf32> to vector<8x16xf32>
    %245 = arith.mulf %243, %244 : vector<8x16xf32>
    %246 = arith.subf %235, %245 : vector<8x16xf32>
    %247 = vector.shape_cast %239 : vector<1x16xf32> to vector<1x16xf32>
    %248 = vector.broadcast %247 : vector<1x16xf32> to vector<8x16xf32>
    %249 = arith.select %242, %248, %246 : vector<8x16xi1>, vector<8x16xf32>
    %250 = vector.extract_strided_slice %249 {offsets = [0, 8], sizes = [8, 8], strides = [1, 1]} : vector<8x16xf32> to vector<8x8xf32>
    %c16 = arith.constant 16 : index
    %c0_32 = arith.constant 0 : index
    %251 = vector.load %arg6[%c16, %c0_32] : memref<24x8xf32, #tpu.memory_space<vmem>>, vector<8x8xf32>
    %252 = tpu.concatenate %251, %4 in 1 : vector<8x8xf32>, vector<8x8xf32> -> vector<8x16xf32>
    %253 = vector.extract_strided_slice %252 {offsets = [0, 0], sizes = [1, 1], strides = [1, 1]} : vector<8x16xf32> to vector<1x1xf32>
    %254 = vector.extract_strided_slice %252 {offsets = [0, 0], sizes = [1, 16], strides = [1, 1]} : vector<8x16xf32> to vector<1x16xf32>
    %255 = vector.broadcast %253 : vector<1x1xf32> to vector<1x16xf32>
    %256 = arith.divf %254, %255 : vector<1x16xf32>
    %257 = vector.extract_strided_slice %252 {offsets = [0, 0], sizes = [8, 1], strides = [1, 1]} : vector<8x16xf32> to vector<8x1xf32>
    %c0_i32_33 = arith.constant 0 : i32
    %258 = vector.broadcast %c0_i32_33 : i32 to vector<8x16xi32>
    %259 = arith.cmpi eq, %7, %258 : vector<8x16xi32>
    %260 = vector.broadcast %257 : vector<8x1xf32> to vector<8x16xf32>
    %261 = vector.broadcast %256 : vector<1x16xf32> to vector<8x16xf32>
    %262 = arith.mulf %260, %261 : vector<8x16xf32>
    %263 = arith.subf %252, %262 : vector<8x16xf32>
    %264 = vector.shape_cast %256 : vector<1x16xf32> to vector<1x16xf32>
    %265 = vector.broadcast %264 : vector<1x16xf32> to vector<8x16xf32>
    %266 = arith.select %259, %265, %263 : vector<8x16xi1>, vector<8x16xf32>
    %267 = vector.extract_strided_slice %266 {offsets = [1, 1], sizes = [1, 1], strides = [1, 1]} : vector<8x16xf32> to vector<1x1xf32>
    %268 = vector.extract_strided_slice %266 {offsets = [1, 0], sizes = [1, 16], strides = [1, 1]} : vector<8x16xf32> to vector<1x16xf32>
    %269 = vector.broadcast %267 : vector<1x1xf32> to vector<1x16xf32>
    %270 = arith.divf %268, %269 : vector<1x16xf32>
    %271 = vector.extract_strided_slice %266 {offsets = [0, 1], sizes = [8, 1], strides = [1, 1]} : vector<8x16xf32> to vector<8x1xf32>
    %c1_i32_34 = arith.constant 1 : i32
    %272 = vector.broadcast %c1_i32_34 : i32 to vector<8x16xi32>
    %273 = arith.cmpi eq, %7, %272 : vector<8x16xi32>
    %274 = vector.broadcast %271 : vector<8x1xf32> to vector<8x16xf32>
    %275 = vector.broadcast %270 : vector<1x16xf32> to vector<8x16xf32>
    %276 = arith.mulf %274, %275 : vector<8x16xf32>
    %277 = arith.subf %266, %276 : vector<8x16xf32>
    %278 = vector.shape_cast %270 : vector<1x16xf32> to vector<1x16xf32>
    %279 = vector.broadcast %278 : vector<1x16xf32> to vector<8x16xf32>
    %280 = arith.select %273, %279, %277 : vector<8x16xi1>, vector<8x16xf32>
    %281 = vector.extract_strided_slice %280 {offsets = [2, 2], sizes = [1, 1], strides = [1, 1]} : vector<8x16xf32> to vector<1x1xf32>
    %282 = vector.extract_strided_slice %280 {offsets = [2, 0], sizes = [1, 16], strides = [1, 1]} : vector<8x16xf32> to vector<1x16xf32>
    %283 = vector.broadcast %281 : vector<1x1xf32> to vector<1x16xf32>
    %284 = arith.divf %282, %283 : vector<1x16xf32>
    %285 = vector.extract_strided_slice %280 {offsets = [0, 2], sizes = [8, 1], strides = [1, 1]} : vector<8x16xf32> to vector<8x1xf32>
    %c2_i32_35 = arith.constant 2 : i32
    %286 = vector.broadcast %c2_i32_35 : i32 to vector<8x16xi32>
    %287 = arith.cmpi eq, %7, %286 : vector<8x16xi32>
    %288 = vector.broadcast %285 : vector<8x1xf32> to vector<8x16xf32>
    %289 = vector.broadcast %284 : vector<1x16xf32> to vector<8x16xf32>
    %290 = arith.mulf %288, %289 : vector<8x16xf32>
    %291 = arith.subf %280, %290 : vector<8x16xf32>
    %292 = vector.shape_cast %284 : vector<1x16xf32> to vector<1x16xf32>
    %293 = vector.broadcast %292 : vector<1x16xf32> to vector<8x16xf32>
    %294 = arith.select %287, %293, %291 : vector<8x16xi1>, vector<8x16xf32>
    %295 = vector.extract_strided_slice %294 {offsets = [3, 3], sizes = [1, 1], strides = [1, 1]} : vector<8x16xf32> to vector<1x1xf32>
    %296 = vector.extract_strided_slice %294 {offsets = [3, 0], sizes = [1, 16], strides = [1, 1]} : vector<8x16xf32> to vector<1x16xf32>
    %297 = vector.broadcast %295 : vector<1x1xf32> to vector<1x16xf32>
    %298 = arith.divf %296, %297 : vector<1x16xf32>
    %299 = vector.extract_strided_slice %294 {offsets = [0, 3], sizes = [8, 1], strides = [1, 1]} : vector<8x16xf32> to vector<8x1xf32>
    %c3_i32_36 = arith.constant 3 : i32
    %300 = vector.broadcast %c3_i32_36 : i32 to vector<8x16xi32>
    %301 = arith.cmpi eq, %7, %300 : vector<8x16xi32>
    %302 = vector.broadcast %299 : vector<8x1xf32> to vector<8x16xf32>
    %303 = vector.broadcast %298 : vector<1x16xf32> to vector<8x16xf32>
    %304 = arith.mulf %302, %303 : vector<8x16xf32>
    %305 = arith.subf %294, %304 : vector<8x16xf32>
    %306 = vector.shape_cast %298 : vector<1x16xf32> to vector<1x16xf32>
    %307 = vector.broadcast %306 : vector<1x16xf32> to vector<8x16xf32>
    %308 = arith.select %301, %307, %305 : vector<8x16xi1>, vector<8x16xf32>
    %309 = vector.extract_strided_slice %308 {offsets = [4, 4], sizes = [1, 1], strides = [1, 1]} : vector<8x16xf32> to vector<1x1xf32>
    %310 = vector.extract_strided_slice %308 {offsets = [4, 0], sizes = [1, 16], strides = [1, 1]} : vector<8x16xf32> to vector<1x16xf32>
    %311 = vector.broadcast %309 : vector<1x1xf32> to vector<1x16xf32>
    %312 = arith.divf %310, %311 : vector<1x16xf32>
    %313 = vector.extract_strided_slice %308 {offsets = [0, 4], sizes = [8, 1], strides = [1, 1]} : vector<8x16xf32> to vector<8x1xf32>
    %c4_i32_37 = arith.constant 4 : i32
    %314 = vector.broadcast %c4_i32_37 : i32 to vector<8x16xi32>
    %315 = arith.cmpi eq, %7, %314 : vector<8x16xi32>
    %316 = vector.broadcast %313 : vector<8x1xf32> to vector<8x16xf32>
    %317 = vector.broadcast %312 : vector<1x16xf32> to vector<8x16xf32>
    %318 = arith.mulf %316, %317 : vector<8x16xf32>
    %319 = arith.subf %308, %318 : vector<8x16xf32>
    %320 = vector.shape_cast %312 : vector<1x16xf32> to vector<1x16xf32>
    %321 = vector.broadcast %320 : vector<1x16xf32> to vector<8x16xf32>
    %322 = arith.select %315, %321, %319 : vector<8x16xi1>, vector<8x16xf32>
    %323 = vector.extract_strided_slice %322 {offsets = [5, 5], sizes = [1, 1], strides = [1, 1]} : vector<8x16xf32> to vector<1x1xf32>
    %324 = vector.extract_strided_slice %322 {offsets = [5, 0], sizes = [1, 16], strides = [1, 1]} : vector<8x16xf32> to vector<1x16xf32>
    %325 = vector.broadcast %323 : vector<1x1xf32> to vector<1x16xf32>
    %326 = arith.divf %324, %325 : vector<1x16xf32>
    %327 = vector.extract_strided_slice %322 {offsets = [0, 5], sizes = [8, 1], strides = [1, 1]} : vector<8x16xf32> to vector<8x1xf32>
    %c5_i32_38 = arith.constant 5 : i32
    %328 = vector.broadcast %c5_i32_38 : i32 to vector<8x16xi32>
    %329 = arith.cmpi eq, %7, %328 : vector<8x16xi32>
    %330 = vector.broadcast %327 : vector<8x1xf32> to vector<8x16xf32>
    %331 = vector.broadcast %326 : vector<1x16xf32> to vector<8x16xf32>
    %332 = arith.mulf %330, %331 : vector<8x16xf32>
    %333 = arith.subf %322, %332 : vector<8x16xf32>
    %334 = vector.shape_cast %326 : vector<1x16xf32> to vector<1x16xf32>
    %335 = vector.broadcast %334 : vector<1x16xf32> to vector<8x16xf32>
    %336 = arith.select %329, %335, %333 : vector<8x16xi1>, vector<8x16xf32>
    %337 = vector.extract_strided_slice %336 {offsets = [6, 6], sizes = [1, 1], strides = [1, 1]} : vector<8x16xf32> to vector<1x1xf32>
    %338 = vector.extract_strided_slice %336 {offsets = [6, 0], sizes = [1, 16], strides = [1, 1]} : vector<8x16xf32> to vector<1x16xf32>
    %339 = vector.broadcast %337 : vector<1x1xf32> to vector<1x16xf32>
    %340 = arith.divf %338, %339 : vector<1x16xf32>
    %341 = vector.extract_strided_slice %336 {offsets = [0, 6], sizes = [8, 1], strides = [1, 1]} : vector<8x16xf32> to vector<8x1xf32>
    %c6_i32_39 = arith.constant 6 : i32
    %342 = vector.broadcast %c6_i32_39 : i32 to vector<8x16xi32>
    %343 = arith.cmpi eq, %7, %342 : vector<8x16xi32>
    %344 = vector.broadcast %341 : vector<8x1xf32> to vector<8x16xf32>
    %345 = vector.broadcast %340 : vector<1x16xf32> to vector<8x16xf32>
    %346 = arith.mulf %344, %345 : vector<8x16xf32>
    %347 = arith.subf %336, %346 : vector<8x16xf32>
    %348 = vector.shape_cast %340 : vector<1x16xf32> to vector<1x16xf32>
    %349 = vector.broadcast %348 : vector<1x16xf32> to vector<8x16xf32>
    %350 = arith.select %343, %349, %347 : vector<8x16xi1>, vector<8x16xf32>
    %351 = vector.extract_strided_slice %350 {offsets = [7, 7], sizes = [1, 1], strides = [1, 1]} : vector<8x16xf32> to vector<1x1xf32>
    %352 = vector.extract_strided_slice %350 {offsets = [7, 0], sizes = [1, 16], strides = [1, 1]} : vector<8x16xf32> to vector<1x16xf32>
    %353 = vector.broadcast %351 : vector<1x1xf32> to vector<1x16xf32>
    %354 = arith.divf %352, %353 : vector<1x16xf32>
    %355 = vector.extract_strided_slice %350 {offsets = [0, 7], sizes = [8, 1], strides = [1, 1]} : vector<8x16xf32> to vector<8x1xf32>
    %c7_i32_40 = arith.constant 7 : i32
    %356 = vector.broadcast %c7_i32_40 : i32 to vector<8x16xi32>
    %357 = arith.cmpi eq, %7, %356 : vector<8x16xi32>
    %358 = vector.broadcast %355 : vector<8x1xf32> to vector<8x16xf32>
    %359 = vector.broadcast %354 : vector<1x16xf32> to vector<8x16xf32>
    %360 = arith.mulf %358, %359 : vector<8x16xf32>
    %361 = arith.subf %350, %360 : vector<8x16xf32>
    %362 = vector.shape_cast %354 : vector<1x16xf32> to vector<1x16xf32>
    %363 = vector.broadcast %362 : vector<1x16xf32> to vector<8x16xf32>
    %364 = arith.select %357, %363, %361 : vector<8x16xi1>, vector<8x16xf32>
    %365 = vector.extract_strided_slice %364 {offsets = [0, 8], sizes = [8, 8], strides = [1, 1]} : vector<8x16xf32> to vector<8x8xf32>
    %366 = tpu.concatenate %135, %250, %365 in 1 : vector<8x8xf32>, vector<8x8xf32>, vector<8x8xf32> -> vector<8x24xf32>
    %cst_41 = arith.constant dense<0.000000e+00> : vector<64x24xf32>
    %367 = tpu.matmul %8, %366, %cst_41 {dimension_numbers = #tpu.dot_dimension_numbers<[1], [0], [0], [1], [0, 0, 1, 1], [], []>} : vector<64x8xf32>, vector<8x24xf32>, vector<64x24xf32> -> vector<64x24xf32>
    %cst_42 = arith.constant dense<0.000000e+00> : vector<3x24xf32>
    %368 = tpu.matmul %20, %366, %cst_42 {dimension_numbers = #tpu.dot_dimension_numbers<[1], [0], [0], [1], [0, 0, 1, 1], [], []>} : vector<3x8xf32>, vector<8x24xf32>, vector<3x24xf32> -> vector<3x24xf32>
    %369 = tpu.concatenate %20, %11 in 1 : vector<3x8xf32>, vector<3x1xf32> -> vector<3x9xf32>
    %370 = vector.extract_strided_slice %369 {offsets = [0, 0], sizes = [1, 9], strides = [1, 1]} : vector<3x9xf32> to vector<1x9xf32>
    %371 = vector.broadcast %370 : vector<1x9xf32> to vector<64x9xf32>
    %372 = arith.subf %10, %371 : vector<64x9xf32>
    %373 = vector.extract_strided_slice %372 {offsets = [0, 0], sizes = [64, 8], strides = [1, 1]} : vector<64x9xf32> to vector<64x8xf32>
    %374 = vector.extract_strided_slice %367 {offsets = [0, 0], sizes = [64, 8], strides = [1, 1]} : vector<64x24xf32> to vector<64x8xf32>
    %375 = vector.extract_strided_slice %368 {offsets = [0, 0], sizes = [1, 8], strides = [1, 1]} : vector<3x24xf32> to vector<1x8xf32>
    %376 = vector.broadcast %375 : vector<1x8xf32> to vector<64x8xf32>
    %377 = arith.subf %374, %376 : vector<64x8xf32>
    %378 = arith.mulf %377, %373 : vector<64x8xf32>
    %cst_43 = arith.constant dense<0.000000e+00> : vector<64xf32>
    %379 = vector.multi_reduction <add>, %378, %cst_43 [1] : vector<64x8xf32> to vector<64xf32>
    %380 = vector.shape_cast %379 : vector<64xf32> to vector<64x1xf32>
    %381 = vector.broadcast %380 : vector<64x1xf32> to vector<64x9xf32>
    %382 = arith.mulf %381, %372 : vector<64x9xf32>
    %cst_44 = arith.constant dense<0.000000e+00> : vector<9x9xf32>
    %383 = tpu.matmul %382, %372, %cst_44 {dimension_numbers = #tpu.dot_dimension_numbers<[0], [0], [1], [1], [0, 1, 1, 1], [], []>} : vector<64x9xf32>, vector<64x9xf32>, vector<9x9xf32> -> vector<9x9xf32>
    %384 = vector.extract_strided_slice %383 {offsets = [8, 8], sizes = [1, 1], strides = [1, 1]} : vector<9x9xf32> to vector<1x1xf32>
    %385 = vector.extract_strided_slice %20 {offsets = [0, 0], sizes = [1, 8], strides = [1, 1]} : vector<3x8xf32> to vector<1x8xf32>
    %386 = vector.extract_strided_slice %383 {offsets = [8, 0], sizes = [1, 8], strides = [1, 1]} : vector<9x9xf32> to vector<1x8xf32>
    %387 = vector.broadcast %384 : vector<1x1xf32> to vector<1x8xf32>
    %388 = arith.divf %386, %387 : vector<1x8xf32>
    %389 = arith.addf %385, %388 : vector<1x8xf32>
    %390 = vector.extract_strided_slice %383 {offsets = [0, 0], sizes = [8, 8], strides = [1, 1]} : vector<9x9xf32> to vector<8x8xf32>
    %391 = vector.broadcast %384 : vector<1x1xf32> to vector<8x8xf32>
    %392 = arith.divf %390, %391 : vector<8x8xf32>
    %393 = arith.addf %392, %6 : vector<8x8xf32>
    %c0_45 = arith.constant 0 : index
    %c0_46 = arith.constant 0 : index
    %394 = vector.load %arg5[%c0_45, %c0_46] : memref<3x8xf32, #tpu.memory_space<vmem>>, vector<1x8xf32>
    tpu.vector_store %arg5[%c0_45, %c0_46], %389 {strides = array<i32>} : memref<3x8xf32, #tpu.memory_space<vmem>>, vector<1x8xf32>,
    %c0_47 = arith.constant 0 : index
    %c0_48 = arith.constant 0 : index
    %395 = vector.load %arg6[%c0_47, %c0_48] : memref<24x8xf32, #tpu.memory_space<vmem>>, vector<8x8xf32>
    tpu.vector_store %arg6[%c0_47, %c0_48], %393 {strides = array<i32>} : memref<24x8xf32, #tpu.memory_space<vmem>>, vector<8x8xf32>,
    %396 = vector.extract_strided_slice %369 {offsets = [1, 0], sizes = [1, 9], strides = [1, 1]} : vector<3x9xf32> to vector<1x9xf32>
    %397 = vector.broadcast %396 : vector<1x9xf32> to vector<64x9xf32>
    %398 = arith.subf %10, %397 : vector<64x9xf32>
    %399 = vector.extract_strided_slice %398 {offsets = [0, 0], sizes = [64, 8], strides = [1, 1]} : vector<64x9xf32> to vector<64x8xf32>
    %400 = vector.extract_strided_slice %367 {offsets = [0, 8], sizes = [64, 8], strides = [1, 1]} : vector<64x24xf32> to vector<64x8xf32>
    %401 = vector.extract_strided_slice %368 {offsets = [1, 8], sizes = [1, 8], strides = [1, 1]} : vector<3x24xf32> to vector<1x8xf32>
    %402 = vector.broadcast %401 : vector<1x8xf32> to vector<64x8xf32>
    %403 = arith.subf %400, %402 : vector<64x8xf32>
    %404 = arith.mulf %403, %399 : vector<64x8xf32>
    %cst_49 = arith.constant dense<0.000000e+00> : vector<64xf32>
    %405 = vector.multi_reduction <add>, %404, %cst_49 [1] : vector<64x8xf32> to vector<64xf32>
    %406 = vector.shape_cast %405 : vector<64xf32> to vector<64x1xf32>
    %407 = vector.broadcast %406 : vector<64x1xf32> to vector<64x9xf32>
    %408 = arith.mulf %407, %398 : vector<64x9xf32>
    %cst_50 = arith.constant dense<0.000000e+00> : vector<9x9xf32>
    %409 = tpu.matmul %408, %398, %cst_50 {dimension_numbers = #tpu.dot_dimension_numbers<[0], [0], [1], [1], [0, 1, 1, 1], [], []>} : vector<64x9xf32>, vector<64x9xf32>, vector<9x9xf32> -> vector<9x9xf32>
    %410 = vector.extract_strided_slice %409 {offsets = [8, 8], sizes = [1, 1], strides = [1, 1]} : vector<9x9xf32> to vector<1x1xf32>
    %411 = vector.extract_strided_slice %20 {offsets = [1, 0], sizes = [1, 8], strides = [1, 1]} : vector<3x8xf32> to vector<1x8xf32>
    %412 = vector.extract_strided_slice %409 {offsets = [8, 0], sizes = [1, 8], strides = [1, 1]} : vector<9x9xf32> to vector<1x8xf32>
    %413 = vector.broadcast %410 : vector<1x1xf32> to vector<1x8xf32>
    %414 = arith.divf %412, %413 : vector<1x8xf32>
    %415 = arith.addf %411, %414 : vector<1x8xf32>
    %416 = vector.extract_strided_slice %409 {offsets = [0, 0], sizes = [8, 8], strides = [1, 1]} : vector<9x9xf32> to vector<8x8xf32>
    %417 = vector.broadcast %410 : vector<1x1xf32> to vector<8x8xf32>
    %418 = arith.divf %416, %417 : vector<8x8xf32>
    %419 = arith.addf %418, %6 : vector<8x8xf32>
    %c1 = arith.constant 1 : index
    %c0_51 = arith.constant 0 : index
    %420 = vector.load %arg5[%c1, %c0_51] : memref<3x8xf32, #tpu.memory_space<vmem>>, vector<1x8xf32>
    tpu.vector_store %arg5[%c1, %c0_51], %415 {strides = array<i32>} : memref<3x8xf32, #tpu.memory_space<vmem>>, vector<1x8xf32>,
    %c8_52 = arith.constant 8 : index
    %c0_53 = arith.constant 0 : index
    %421 = vector.load %arg6[%c8_52, %c0_53] : memref<24x8xf32, #tpu.memory_space<vmem>>, vector<8x8xf32>
    tpu.vector_store %arg6[%c8_52, %c0_53], %419 {strides = array<i32>} : memref<24x8xf32, #tpu.memory_space<vmem>>, vector<8x8xf32>,
    %422 = vector.extract_strided_slice %369 {offsets = [2, 0], sizes = [1, 9], strides = [1, 1]} : vector<3x9xf32> to vector<1x9xf32>
    %423 = vector.broadcast %422 : vector<1x9xf32> to vector<64x9xf32>
    %424 = arith.subf %10, %423 : vector<64x9xf32>
    %425 = vector.extract_strided_slice %424 {offsets = [0, 0], sizes = [64, 8], strides = [1, 1]} : vector<64x9xf32> to vector<64x8xf32>
    %426 = vector.extract_strided_slice %367 {offsets = [0, 16], sizes = [64, 8], strides = [1, 1]} : vector<64x24xf32> to vector<64x8xf32>
    %427 = vector.extract_strided_slice %368 {offsets = [2, 16], sizes = [1, 8], strides = [1, 1]} : vector<3x24xf32> to vector<1x8xf32>
    %428 = vector.broadcast %427 : vector<1x8xf32> to vector<64x8xf32>
    %429 = arith.subf %426, %428 : vector<64x8xf32>
    %430 = arith.mulf %429, %425 : vector<64x8xf32>
    %cst_54 = arith.constant dense<0.000000e+00> : vector<64xf32>
    %431 = vector.multi_reduction <add>, %430, %cst_54 [1] : vector<64x8xf32> to vector<64xf32>
    %432 = vector.shape_cast %431 : vector<64xf32> to vector<64x1xf32>
    %433 = vector.broadcast %432 : vector<64x1xf32> to vector<64x9xf32>
    %434 = arith.mulf %433, %424 : vector<64x9xf32>
    %cst_55 = arith.constant dense<0.000000e+00> : vector<9x9xf32>
    %435 = tpu.matmul %434, %424, %cst_55 {dimension_numbers = #tpu.dot_dimension_numbers<[0], [0], [1], [1], [0, 1, 1, 1], [], []>} : vector<64x9xf32>, vector<64x9xf32>, vector<9x9xf32> -> vector<9x9xf32>
    %436 = vector.extract_strided_slice %435 {offsets = [8, 8], sizes = [1, 1], strides = [1, 1]} : vector<9x9xf32> to vector<1x1xf32>
    %437 = vector.extract_strided_slice %20 {offsets = [2, 0], sizes = [1, 8], strides = [1, 1]} : vector<3x8xf32> to vector<1x8xf32>
    %438 = vector.extract_strided_slice %435 {offsets = [8, 0], sizes = [1, 8], strides = [1, 1]} : vector<9x9xf32> to vector<1x8xf32>
    %439 = vector.broadcast %436 : vector<1x1xf32> to vector<1x8xf32>
    %440 = arith.divf %438, %439 : vector<1x8xf32>
    %441 = arith.addf %437, %440 : vector<1x8xf32>
    %442 = vector.extract_strided_slice %435 {offsets = [0, 0], sizes = [8, 8], strides = [1, 1]} : vector<9x9xf32> to vector<8x8xf32>
    %443 = vector.broadcast %436 : vector<1x1xf32> to vector<8x8xf32>
    %444 = arith.divf %442, %443 : vector<8x8xf32>
    %445 = arith.addf %444, %6 : vector<8x8xf32>
    %c2 = arith.constant 2 : index
    %c0_56 = arith.constant 0 : index
    %446 = vector.load %arg5[%c2, %c0_56] : memref<3x8xf32, #tpu.memory_space<vmem>>, vector<1x8xf32>
    tpu.vector_store %arg5[%c2, %c0_56], %441 {strides = array<i32>} : memref<3x8xf32, #tpu.memory_space<vmem>>, vector<1x8xf32>,
    %c16_57 = arith.constant 16 : index
    %c0_58 = arith.constant 0 : index
    %447 = vector.load %arg6[%c16_57, %c0_58] : memref<24x8xf32, #tpu.memory_space<vmem>>, vector<8x8xf32>
    tpu.vector_store %arg6[%c16_57, %c0_58], %445 {strides = array<i32>} : memref<24x8xf32, #tpu.memory_space<vmem>>, vector<8x8xf32>,
    %c0_59 = arith.constant 0 : index
    %c0_60 = arith.constant 0 : index
    %448 = vector.load %arg5[%c0_59, %c0_60] : memref<3x8xf32, #tpu.memory_space<vmem>>, vector<3x8xf32>
    %cst_61 = arith.constant 0.000000e+00 : f32
    %449 = vector.broadcast %cst_61 : f32 to vector<1x1xf32>
    %c0_62 = arith.constant 0 : index
    %c0_63 = arith.constant 0 : index
    %450 = vector.load %arg6[%c0_62, %c0_63] : memref<24x8xf32, #tpu.memory_space<vmem>>, vector<8x8xf32>
    %451 = tpu.concatenate %450, %4 in 1 : vector<8x8xf32>, vector<8x8xf32> -> vector<8x16xf32>
    %452 = vector.extract_strided_slice %451 {offsets = [0, 0], sizes = [1, 1], strides = [1, 1]} : vector<8x16xf32> to vector<1x1xf32>
    %453 = vector.extract_strided_slice %451 {offsets = [0, 0], sizes = [1, 16], strides = [1, 1]} : vector<8x16xf32> to vector<1x16xf32>
    %454 = vector.broadcast %452 : vector<1x1xf32> to vector<1x16xf32>
    %455 = arith.divf %453, %454 : vector<1x16xf32>
    %456 = vector.extract_strided_slice %451 {offsets = [0, 0], sizes = [8, 1], strides = [1, 1]} : vector<8x16xf32> to vector<8x1xf32>
    %c0_i32_64 = arith.constant 0 : i32
    %457 = vector.broadcast %c0_i32_64 : i32 to vector<8x16xi32>
    %458 = arith.cmpi eq, %7, %457 : vector<8x16xi32>
    %459 = vector.broadcast %456 : vector<8x1xf32> to vector<8x16xf32>
    %460 = vector.broadcast %455 : vector<1x16xf32> to vector<8x16xf32>
    %461 = arith.mulf %459, %460 : vector<8x16xf32>
    %462 = arith.subf %451, %461 : vector<8x16xf32>
    %463 = vector.shape_cast %455 : vector<1x16xf32> to vector<1x16xf32>
    %464 = vector.broadcast %463 : vector<1x16xf32> to vector<8x16xf32>
    %465 = arith.select %458, %464, %462 : vector<8x16xi1>, vector<8x16xf32>
    %466 = vector.extract_strided_slice %465 {offsets = [1, 1], sizes = [1, 1], strides = [1, 1]} : vector<8x16xf32> to vector<1x1xf32>
    %467 = vector.extract_strided_slice %465 {offsets = [1, 0], sizes = [1, 16], strides = [1, 1]} : vector<8x16xf32> to vector<1x16xf32>
    %468 = vector.broadcast %466 : vector<1x1xf32> to vector<1x16xf32>
    %469 = arith.divf %467, %468 : vector<1x16xf32>
    %470 = vector.extract_strided_slice %465 {offsets = [0, 1], sizes = [8, 1], strides = [1, 1]} : vector<8x16xf32> to vector<8x1xf32>
    %c1_i32_65 = arith.constant 1 : i32
    %471 = vector.broadcast %c1_i32_65 : i32 to vector<8x16xi32>
    %472 = arith.cmpi eq, %7, %471 : vector<8x16xi32>
    %473 = vector.broadcast %470 : vector<8x1xf32> to vector<8x16xf32>
    %474 = vector.broadcast %469 : vector<1x16xf32> to vector<8x16xf32>
    %475 = arith.mulf %473, %474 : vector<8x16xf32>
    %476 = arith.subf %465, %475 : vector<8x16xf32>
    %477 = vector.shape_cast %469 : vector<1x16xf32> to vector<1x16xf32>
    %478 = vector.broadcast %477 : vector<1x16xf32> to vector<8x16xf32>
    %479 = arith.select %472, %478, %476 : vector<8x16xi1>, vector<8x16xf32>
    %480 = vector.extract_strided_slice %479 {offsets = [2, 2], sizes = [1, 1], strides = [1, 1]} : vector<8x16xf32> to vector<1x1xf32>
    %481 = vector.extract_strided_slice %479 {offsets = [2, 0], sizes = [1, 16], strides = [1, 1]} : vector<8x16xf32> to vector<1x16xf32>
    %482 = vector.broadcast %480 : vector<1x1xf32> to vector<1x16xf32>
    %483 = arith.divf %481, %482 : vector<1x16xf32>
    %484 = vector.extract_strided_slice %479 {offsets = [0, 2], sizes = [8, 1], strides = [1, 1]} : vector<8x16xf32> to vector<8x1xf32>
    %c2_i32_66 = arith.constant 2 : i32
    %485 = vector.broadcast %c2_i32_66 : i32 to vector<8x16xi32>
    %486 = arith.cmpi eq, %7, %485 : vector<8x16xi32>
    %487 = vector.broadcast %484 : vector<8x1xf32> to vector<8x16xf32>
    %488 = vector.broadcast %483 : vector<1x16xf32> to vector<8x16xf32>
    %489 = arith.mulf %487, %488 : vector<8x16xf32>
    %490 = arith.subf %479, %489 : vector<8x16xf32>
    %491 = vector.shape_cast %483 : vector<1x16xf32> to vector<1x16xf32>
    %492 = vector.broadcast %491 : vector<1x16xf32> to vector<8x16xf32>
    %493 = arith.select %486, %492, %490 : vector<8x16xi1>, vector<8x16xf32>
    %494 = vector.extract_strided_slice %493 {offsets = [3, 3], sizes = [1, 1], strides = [1, 1]} : vector<8x16xf32> to vector<1x1xf32>
    %495 = vector.extract_strided_slice %493 {offsets = [3, 0], sizes = [1, 16], strides = [1, 1]} : vector<8x16xf32> to vector<1x16xf32>
    %496 = vector.broadcast %494 : vector<1x1xf32> to vector<1x16xf32>
    %497 = arith.divf %495, %496 : vector<1x16xf32>
    %498 = vector.extract_strided_slice %493 {offsets = [0, 3], sizes = [8, 1], strides = [1, 1]} : vector<8x16xf32> to vector<8x1xf32>
    %c3_i32_67 = arith.constant 3 : i32
    %499 = vector.broadcast %c3_i32_67 : i32 to vector<8x16xi32>
    %500 = arith.cmpi eq, %7, %499 : vector<8x16xi32>
    %501 = vector.broadcast %498 : vector<8x1xf32> to vector<8x16xf32>
    %502 = vector.broadcast %497 : vector<1x16xf32> to vector<8x16xf32>
    %503 = arith.mulf %501, %502 : vector<8x16xf32>
    %504 = arith.subf %493, %503 : vector<8x16xf32>
    %505 = vector.shape_cast %497 : vector<1x16xf32> to vector<1x16xf32>
    %506 = vector.broadcast %505 : vector<1x16xf32> to vector<8x16xf32>
    %507 = arith.select %500, %506, %504 : vector<8x16xi1>, vector<8x16xf32>
    %508 = vector.extract_strided_slice %507 {offsets = [4, 4], sizes = [1, 1], strides = [1, 1]} : vector<8x16xf32> to vector<1x1xf32>
    %509 = vector.extract_strided_slice %507 {offsets = [4, 0], sizes = [1, 16], strides = [1, 1]} : vector<8x16xf32> to vector<1x16xf32>
    %510 = vector.broadcast %508 : vector<1x1xf32> to vector<1x16xf32>
    %511 = arith.divf %509, %510 : vector<1x16xf32>
    %512 = vector.extract_strided_slice %507 {offsets = [0, 4], sizes = [8, 1], strides = [1, 1]} : vector<8x16xf32> to vector<8x1xf32>
    %c4_i32_68 = arith.constant 4 : i32
    %513 = vector.broadcast %c4_i32_68 : i32 to vector<8x16xi32>
    %514 = arith.cmpi eq, %7, %513 : vector<8x16xi32>
    %515 = vector.broadcast %512 : vector<8x1xf32> to vector<8x16xf32>
    %516 = vector.broadcast %511 : vector<1x16xf32> to vector<8x16xf32>
    %517 = arith.mulf %515, %516 : vector<8x16xf32>
    %518 = arith.subf %507, %517 : vector<8x16xf32>
    %519 = vector.shape_cast %511 : vector<1x16xf32> to vector<1x16xf32>
    %520 = vector.broadcast %519 : vector<1x16xf32> to vector<8x16xf32>
    %521 = arith.select %514, %520, %518 : vector<8x16xi1>, vector<8x16xf32>
    %522 = vector.extract_strided_slice %521 {offsets = [5, 5], sizes = [1, 1], strides = [1, 1]} : vector<8x16xf32> to vector<1x1xf32>
    %523 = vector.extract_strided_slice %521 {offsets = [5, 0], sizes = [1, 16], strides = [1, 1]} : vector<8x16xf32> to vector<1x16xf32>
    %524 = vector.broadcast %522 : vector<1x1xf32> to vector<1x16xf32>
    %525 = arith.divf %523, %524 : vector<1x16xf32>
    %526 = vector.extract_strided_slice %521 {offsets = [0, 5], sizes = [8, 1], strides = [1, 1]} : vector<8x16xf32> to vector<8x1xf32>
    %c5_i32_69 = arith.constant 5 : i32
    %527 = vector.broadcast %c5_i32_69 : i32 to vector<8x16xi32>
    %528 = arith.cmpi eq, %7, %527 : vector<8x16xi32>
    %529 = vector.broadcast %526 : vector<8x1xf32> to vector<8x16xf32>
    %530 = vector.broadcast %525 : vector<1x16xf32> to vector<8x16xf32>
    %531 = arith.mulf %529, %530 : vector<8x16xf32>
    %532 = arith.subf %521, %531 : vector<8x16xf32>
    %533 = vector.shape_cast %525 : vector<1x16xf32> to vector<1x16xf32>
    %534 = vector.broadcast %533 : vector<1x16xf32> to vector<8x16xf32>
    %535 = arith.select %528, %534, %532 : vector<8x16xi1>, vector<8x16xf32>
    %536 = vector.extract_strided_slice %535 {offsets = [6, 6], sizes = [1, 1], strides = [1, 1]} : vector<8x16xf32> to vector<1x1xf32>
    %537 = vector.extract_strided_slice %535 {offsets = [6, 0], sizes = [1, 16], strides = [1, 1]} : vector<8x16xf32> to vector<1x16xf32>
    %538 = vector.broadcast %536 : vector<1x1xf32> to vector<1x16xf32>
    %539 = arith.divf %537, %538 : vector<1x16xf32>
    %540 = vector.extract_strided_slice %535 {offsets = [0, 6], sizes = [8, 1], strides = [1, 1]} : vector<8x16xf32> to vector<8x1xf32>
    %c6_i32_70 = arith.constant 6 : i32
    %541 = vector.broadcast %c6_i32_70 : i32 to vector<8x16xi32>
    %542 = arith.cmpi eq, %7, %541 : vector<8x16xi32>
    %543 = vector.broadcast %540 : vector<8x1xf32> to vector<8x16xf32>
    %544 = vector.broadcast %539 : vector<1x16xf32> to vector<8x16xf32>
    %545 = arith.mulf %543, %544 : vector<8x16xf32>
    %546 = arith.subf %535, %545 : vector<8x16xf32>
    %547 = vector.shape_cast %539 : vector<1x16xf32> to vector<1x16xf32>
    %548 = vector.broadcast %547 : vector<1x16xf32> to vector<8x16xf32>
    %549 = arith.select %542, %548, %546 : vector<8x16xi1>, vector<8x16xf32>
    %550 = vector.extract_strided_slice %549 {offsets = [7, 7], sizes = [1, 1], strides = [1, 1]} : vector<8x16xf32> to vector<1x1xf32>
    %551 = vector.extract_strided_slice %549 {offsets = [7, 0], sizes = [1, 16], strides = [1, 1]} : vector<8x16xf32> to vector<1x16xf32>
    %552 = vector.broadcast %550 : vector<1x1xf32> to vector<1x16xf32>
    %553 = arith.divf %551, %552 : vector<1x16xf32>
    %554 = vector.extract_strided_slice %549 {offsets = [0, 7], sizes = [8, 1], strides = [1, 1]} : vector<8x16xf32> to vector<8x1xf32>
    %c7_i32_71 = arith.constant 7 : i32
    %555 = vector.broadcast %c7_i32_71 : i32 to vector<8x16xi32>
    %556 = arith.cmpi eq, %7, %555 : vector<8x16xi32>
    %557 = vector.broadcast %554 : vector<8x1xf32> to vector<8x16xf32>
    %558 = vector.broadcast %553 : vector<1x16xf32> to vector<8x16xf32>
    %559 = arith.mulf %557, %558 : vector<8x16xf32>
    %560 = arith.subf %549, %559 : vector<8x16xf32>
    %561 = vector.shape_cast %553 : vector<1x16xf32> to vector<1x16xf32>
    %562 = vector.broadcast %561 : vector<1x16xf32> to vector<8x16xf32>
    %563 = arith.select %556, %562, %560 : vector<8x16xi1>, vector<8x16xf32>
    %564 = vector.extract_strided_slice %563 {offsets = [0, 8], sizes = [8, 8], strides = [1, 1]} : vector<8x16xf32> to vector<8x8xf32>
    %565 = tpu.concatenate %452, %466, %480, %494, %508, %522, %536, %550 in 1 : vector<1x1xf32>, vector<1x1xf32>, vector<1x1xf32>, vector<1x1xf32>, vector<1x1xf32>, vector<1x1xf32>, vector<1x1xf32>, vector<1x1xf32> -> vector<1x8xf32>
    %566 = math.log %565 : vector<1x8xf32>
    %cst_72 = arith.constant dense<0.000000e+00> : vector<1xf32>
    %567 = vector.multi_reduction <add>, %566, %cst_72 [1] : vector<1x8xf32> to vector<1xf32>
    %568 = vector.shape_cast %567 : vector<1xf32> to vector<1x1xf32>
    %569 = vector.extract_strided_slice %448 {offsets = [0, 0], sizes = [1, 8], strides = [1, 1]} : vector<3x8xf32> to vector<1x8xf32>
    %570 = vector.broadcast %569 : vector<1x8xf32> to vector<64x8xf32>
    %571 = arith.subf %8, %570 : vector<64x8xf32>
    %cst_73 = arith.constant dense<0.000000e+00> : vector<64x8xf32>
    %572 = tpu.matmul %571, %564, %cst_73 {dimension_numbers = #tpu.dot_dimension_numbers<[1], [0], [0], [1], [0, 0, 1, 1], [], []>} : vector<64x8xf32>, vector<8x8xf32>, vector<64x8xf32> -> vector<64x8xf32>
    %573 = arith.mulf %572, %571 : vector<64x8xf32>
    %cst_74 = arith.constant dense<0.000000e+00> : vector<64xf32>
    %574 = vector.multi_reduction <add>, %573, %cst_74 [1] : vector<64x8xf32> to vector<64xf32>
    %575 = vector.shape_cast %574 : vector<64xf32> to vector<64x1xf32>
    %cst_75 = arith.constant dense<0.000000e+00> : vector<1xf32>
    %576 = vector.multi_reduction <add>, %575, %cst_75 [0] : vector<64x1xf32> to vector<1xf32>
    %577 = vector.shape_cast %576 : vector<1xf32> to vector<1x1xf32>
    %c0_76 = arith.constant 0 : index
    %578 = memref.load %arg3[%c0_76] : memref<3xf32, #tpu.memory_space<smem>>
    %cst_77 = arith.constant 5.000000e-01 : f32
    %579 = arith.mulf %578, %cst_77 : f32
    %cst_78 = arith.constant 14.7030163 : f32
    %580 = vector.broadcast %cst_78 : f32 to vector<1x1xf32>
    %581 = arith.addf %568, %580 : vector<1x1xf32>
    %cst_79 = arith.constant 6.400000e+01 : f32
    %582 = vector.broadcast %cst_79 : f32 to vector<1x1xf32>
    %583 = arith.mulf %582, %581 : vector<1x1xf32>
    %584 = arith.addf %577, %583 : vector<1x1xf32>
    %585 = vector.broadcast %579 : f32 to vector<1x1xf32>
    %586 = arith.mulf %585, %584 : vector<1x1xf32>
    %587 = arith.addf %449, %586 : vector<1x1xf32>
    %c8_80 = arith.constant 8 : index
    %c0_81 = arith.constant 0 : index
    %588 = vector.load %arg6[%c8_80, %c0_81] : memref<24x8xf32, #tpu.memory_space<vmem>>, vector<8x8xf32>
    %589 = tpu.concatenate %588, %4 in 1 : vector<8x8xf32>, vector<8x8xf32> -> vector<8x16xf32>
    %590 = vector.extract_strided_slice %589 {offsets = [0, 0], sizes = [1, 1], strides = [1, 1]} : vector<8x16xf32> to vector<1x1xf32>
    %591 = vector.extract_strided_slice %589 {offsets = [0, 0], sizes = [1, 16], strides = [1, 1]} : vector<8x16xf32> to vector<1x16xf32>
    %592 = vector.broadcast %590 : vector<1x1xf32> to vector<1x16xf32>
    %593 = arith.divf %591, %592 : vector<1x16xf32>
    %594 = vector.extract_strided_slice %589 {offsets = [0, 0], sizes = [8, 1], strides = [1, 1]} : vector<8x16xf32> to vector<8x1xf32>
    %c0_i32_82 = arith.constant 0 : i32
    %595 = vector.broadcast %c0_i32_82 : i32 to vector<8x16xi32>
    %596 = arith.cmpi eq, %7, %595 : vector<8x16xi32>
    %597 = vector.broadcast %594 : vector<8x1xf32> to vector<8x16xf32>
    %598 = vector.broadcast %593 : vector<1x16xf32> to vector<8x16xf32>
    %599 = arith.mulf %597, %598 : vector<8x16xf32>
    %600 = arith.subf %589, %599 : vector<8x16xf32>
    %601 = vector.shape_cast %593 : vector<1x16xf32> to vector<1x16xf32>
    %602 = vector.broadcast %601 : vector<1x16xf32> to vector<8x16xf32>
    %603 = arith.select %596, %602, %600 : vector<8x16xi1>, vector<8x16xf32>
    %604 = vector.extract_strided_slice %603 {offsets = [1, 1], sizes = [1, 1], strides = [1, 1]} : vector<8x16xf32> to vector<1x1xf32>
    %605 = vector.extract_strided_slice %603 {offsets = [1, 0], sizes = [1, 16], strides = [1, 1]} : vector<8x16xf32> to vector<1x16xf32>
    %606 = vector.broadcast %604 : vector<1x1xf32> to vector<1x16xf32>
    %607 = arith.divf %605, %606 : vector<1x16xf32>
    %608 = vector.extract_strided_slice %603 {offsets = [0, 1], sizes = [8, 1], strides = [1, 1]} : vector<8x16xf32> to vector<8x1xf32>
    %c1_i32_83 = arith.constant 1 : i32
    %609 = vector.broadcast %c1_i32_83 : i32 to vector<8x16xi32>
    %610 = arith.cmpi eq, %7, %609 : vector<8x16xi32>
    %611 = vector.broadcast %608 : vector<8x1xf32> to vector<8x16xf32>
    %612 = vector.broadcast %607 : vector<1x16xf32> to vector<8x16xf32>
    %613 = arith.mulf %611, %612 : vector<8x16xf32>
    %614 = arith.subf %603, %613 : vector<8x16xf32>
    %615 = vector.shape_cast %607 : vector<1x16xf32> to vector<1x16xf32>
    %616 = vector.broadcast %615 : vector<1x16xf32> to vector<8x16xf32>
    %617 = arith.select %610, %616, %614 : vector<8x16xi1>, vector<8x16xf32>
    %618 = vector.extract_strided_slice %617 {offsets = [2, 2], sizes = [1, 1], strides = [1, 1]} : vector<8x16xf32> to vector<1x1xf32>
    %619 = vector.extract_strided_slice %617 {offsets = [2, 0], sizes = [1, 16], strides = [1, 1]} : vector<8x16xf32> to vector<1x16xf32>
    %620 = vector.broadcast %618 : vector<1x1xf32> to vector<1x16xf32>
    %621 = arith.divf %619, %620 : vector<1x16xf32>
    %622 = vector.extract_strided_slice %617 {offsets = [0, 2], sizes = [8, 1], strides = [1, 1]} : vector<8x16xf32> to vector<8x1xf32>
    %c2_i32_84 = arith.constant 2 : i32
    %623 = vector.broadcast %c2_i32_84 : i32 to vector<8x16xi32>
    %624 = arith.cmpi eq, %7, %623 : vector<8x16xi32>
    %625 = vector.broadcast %622 : vector<8x1xf32> to vector<8x16xf32>
    %626 = vector.broadcast %621 : vector<1x16xf32> to vector<8x16xf32>
    %627 = arith.mulf %625, %626 : vector<8x16xf32>
    %628 = arith.subf %617, %627 : vector<8x16xf32>
    %629 = vector.shape_cast %621 : vector<1x16xf32> to vector<1x16xf32>
    %630 = vector.broadcast %629 : vector<1x16xf32> to vector<8x16xf32>
    %631 = arith.select %624, %630, %628 : vector<8x16xi1>, vector<8x16xf32>
    %632 = vector.extract_strided_slice %631 {offsets = [3, 3], sizes = [1, 1], strides = [1, 1]} : vector<8x16xf32> to vector<1x1xf32>
    %633 = vector.extract_strided_slice %631 {offsets = [3, 0], sizes = [1, 16], strides = [1, 1]} : vector<8x16xf32> to vector<1x16xf32>
    %634 = vector.broadcast %632 : vector<1x1xf32> to vector<1x16xf32>
    %635 = arith.divf %633, %634 : vector<1x16xf32>
    %636 = vector.extract_strided_slice %631 {offsets = [0, 3], sizes = [8, 1], strides = [1, 1]} : vector<8x16xf32> to vector<8x1xf32>
    %c3_i32_85 = arith.constant 3 : i32
    %637 = vector.broadcast %c3_i32_85 : i32 to vector<8x16xi32>
    %638 = arith.cmpi eq, %7, %637 : vector<8x16xi32>
    %639 = vector.broadcast %636 : vector<8x1xf32> to vector<8x16xf32>
    %640 = vector.broadcast %635 : vector<1x16xf32> to vector<8x16xf32>
    %641 = arith.mulf %639, %640 : vector<8x16xf32>
    %642 = arith.subf %631, %641 : vector<8x16xf32>
    %643 = vector.shape_cast %635 : vector<1x16xf32> to vector<1x16xf32>
    %644 = vector.broadcast %643 : vector<1x16xf32> to vector<8x16xf32>
    %645 = arith.select %638, %644, %642 : vector<8x16xi1>, vector<8x16xf32>
    %646 = vector.extract_strided_slice %645 {offsets = [4, 4], sizes = [1, 1], strides = [1, 1]} : vector<8x16xf32> to vector<1x1xf32>
    %647 = vector.extract_strided_slice %645 {offsets = [4, 0], sizes = [1, 16], strides = [1, 1]} : vector<8x16xf32> to vector<1x16xf32>
    %648 = vector.broadcast %646 : vector<1x1xf32> to vector<1x16xf32>
    %649 = arith.divf %647, %648 : vector<1x16xf32>
    %650 = vector.extract_strided_slice %645 {offsets = [0, 4], sizes = [8, 1], strides = [1, 1]} : vector<8x16xf32> to vector<8x1xf32>
    %c4_i32_86 = arith.constant 4 : i32
    %651 = vector.broadcast %c4_i32_86 : i32 to vector<8x16xi32>
    %652 = arith.cmpi eq, %7, %651 : vector<8x16xi32>
    %653 = vector.broadcast %650 : vector<8x1xf32> to vector<8x16xf32>
    %654 = vector.broadcast %649 : vector<1x16xf32> to vector<8x16xf32>
    %655 = arith.mulf %653, %654 : vector<8x16xf32>
    %656 = arith.subf %645, %655 : vector<8x16xf32>
    %657 = vector.shape_cast %649 : vector<1x16xf32> to vector<1x16xf32>
    %658 = vector.broadcast %657 : vector<1x16xf32> to vector<8x16xf32>
    %659 = arith.select %652, %658, %656 : vector<8x16xi1>, vector<8x16xf32>
    %660 = vector.extract_strided_slice %659 {offsets = [5, 5], sizes = [1, 1], strides = [1, 1]} : vector<8x16xf32> to vector<1x1xf32>
    %661 = vector.extract_strided_slice %659 {offsets = [5, 0], sizes = [1, 16], strides = [1, 1]} : vector<8x16xf32> to vector<1x16xf32>
    %662 = vector.broadcast %660 : vector<1x1xf32> to vector<1x16xf32>
    %663 = arith.divf %661, %662 : vector<1x16xf32>
    %664 = vector.extract_strided_slice %659 {offsets = [0, 5], sizes = [8, 1], strides = [1, 1]} : vector<8x16xf32> to vector<8x1xf32>
    %c5_i32_87 = arith.constant 5 : i32
    %665 = vector.broadcast %c5_i32_87 : i32 to vector<8x16xi32>
    %666 = arith.cmpi eq, %7, %665 : vector<8x16xi32>
    %667 = vector.broadcast %664 : vector<8x1xf32> to vector<8x16xf32>
    %668 = vector.broadcast %663 : vector<1x16xf32> to vector<8x16xf32>
    %669 = arith.mulf %667, %668 : vector<8x16xf32>
    %670 = arith.subf %659, %669 : vector<8x16xf32>
    %671 = vector.shape_cast %663 : vector<1x16xf32> to vector<1x16xf32>
    %672 = vector.broadcast %671 : vector<1x16xf32> to vector<8x16xf32>
    %673 = arith.select %666, %672, %670 : vector<8x16xi1>, vector<8x16xf32>
    %674 = vector.extract_strided_slice %673 {offsets = [6, 6], sizes = [1, 1], strides = [1, 1]} : vector<8x16xf32> to vector<1x1xf32>
    %675 = vector.extract_strided_slice %673 {offsets = [6, 0], sizes = [1, 16], strides = [1, 1]} : vector<8x16xf32> to vector<1x16xf32>
    %676 = vector.broadcast %674 : vector<1x1xf32> to vector<1x16xf32>
    %677 = arith.divf %675, %676 : vector<1x16xf32>
    %678 = vector.extract_strided_slice %673 {offsets = [0, 6], sizes = [8, 1], strides = [1, 1]} : vector<8x16xf32> to vector<8x1xf32>
    %c6_i32_88 = arith.constant 6 : i32
    %679 = vector.broadcast %c6_i32_88 : i32 to vector<8x16xi32>
    %680 = arith.cmpi eq, %7, %679 : vector<8x16xi32>
    %681 = vector.broadcast %678 : vector<8x1xf32> to vector<8x16xf32>
    %682 = vector.broadcast %677 : vector<1x16xf32> to vector<8x16xf32>
    %683 = arith.mulf %681, %682 : vector<8x16xf32>
    %684 = arith.subf %673, %683 : vector<8x16xf32>
    %685 = vector.shape_cast %677 : vector<1x16xf32> to vector<1x16xf32>
    %686 = vector.broadcast %685 : vector<1x16xf32> to vector<8x16xf32>
    %687 = arith.select %680, %686, %684 : vector<8x16xi1>, vector<8x16xf32>
    %688 = vector.extract_strided_slice %687 {offsets = [7, 7], sizes = [1, 1], strides = [1, 1]} : vector<8x16xf32> to vector<1x1xf32>
    %689 = vector.extract_strided_slice %687 {offsets = [7, 0], sizes = [1, 16], strides = [1, 1]} : vector<8x16xf32> to vector<1x16xf32>
    %690 = vector.broadcast %688 : vector<1x1xf32> to vector<1x16xf32>
    %691 = arith.divf %689, %690 : vector<1x16xf32>
    %692 = vector.extract_strided_slice %687 {offsets = [0, 7], sizes = [8, 1], strides = [1, 1]} : vector<8x16xf32> to vector<8x1xf32>
    %c7_i32_89 = arith.constant 7 : i32
    %693 = vector.broadcast %c7_i32_89 : i32 to vector<8x16xi32>
    %694 = arith.cmpi eq, %7, %693 : vector<8x16xi32>
    %695 = vector.broadcast %692 : vector<8x1xf32> to vector<8x16xf32>
    %696 = vector.broadcast %691 : vector<1x16xf32> to vector<8x16xf32>
    %697 = arith.mulf %695, %696 : vector<8x16xf32>
    %698 = arith.subf %687, %697 : vector<8x16xf32>
    %699 = vector.shape_cast %691 : vector<1x16xf32> to vector<1x16xf32>
    %700 = vector.broadcast %699 : vector<1x16xf32> to vector<8x16xf32>
    %701 = arith.select %694, %700, %698 : vector<8x16xi1>, vector<8x16xf32>
    %702 = vector.extract_strided_slice %701 {offsets = [0, 8], sizes = [8, 8], strides = [1, 1]} : vector<8x16xf32> to vector<8x8xf32>
    %703 = tpu.concatenate %590, %604, %618, %632, %646, %660, %674, %688 in 1 : vector<1x1xf32>, vector<1x1xf32>, vector<1x1xf32>, vector<1x1xf32>, vector<1x1xf32>, vector<1x1xf32>, vector<1x1xf32>, vector<1x1xf32> -> vector<1x8xf32>
    %704 = math.log %703 : vector<1x8xf32>
    %cst_90 = arith.constant dense<0.000000e+00> : vector<1xf32>
    %705 = vector.multi_reduction <add>, %704, %cst_90 [1] : vector<1x8xf32> to vector<1xf32>
    %706 = vector.shape_cast %705 : vector<1xf32> to vector<1x1xf32>
    %707 = vector.extract_strided_slice %448 {offsets = [1, 0], sizes = [1, 8], strides = [1, 1]} : vector<3x8xf32> to vector<1x8xf32>
    %708 = vector.broadcast %707 : vector<1x8xf32> to vector<64x8xf32>
    %709 = arith.subf %8, %708 : vector<64x8xf32>
    %cst_91 = arith.constant dense<0.000000e+00> : vector<64x8xf32>
    %710 = tpu.matmul %709, %702, %cst_91 {dimension_numbers = #tpu.dot_dimension_numbers<[1], [0], [0], [1], [0, 0, 1, 1], [], []>} : vector<64x8xf32>, vector<8x8xf32>, vector<64x8xf32> -> vector<64x8xf32>
    %711 = arith.mulf %710, %709 : vector<64x8xf32>
    %cst_92 = arith.constant dense<0.000000e+00> : vector<64xf32>
    %712 = vector.multi_reduction <add>, %711, %cst_92 [1] : vector<64x8xf32> to vector<64xf32>
    %713 = vector.shape_cast %712 : vector<64xf32> to vector<64x1xf32>
    %cst_93 = arith.constant dense<0.000000e+00> : vector<1xf32>
    %714 = vector.multi_reduction <add>, %713, %cst_93 [0] : vector<64x1xf32> to vector<1xf32>
    %715 = vector.shape_cast %714 : vector<1xf32> to vector<1x1xf32>
    %c1_94 = arith.constant 1 : index
    %716 = memref.load %arg3[%c1_94] : memref<3xf32, #tpu.memory_space<smem>>
    %cst_95 = arith.constant 5.000000e-01 : f32
    %717 = arith.mulf %716, %cst_95 : f32
    %cst_96 = arith.constant 14.7030163 : f32
    %718 = vector.broadcast %cst_96 : f32 to vector<1x1xf32>
    %719 = arith.addf %706, %718 : vector<1x1xf32>
    %cst_97 = arith.constant 6.400000e+01 : f32
    %720 = vector.broadcast %cst_97 : f32 to vector<1x1xf32>
    %721 = arith.mulf %720, %719 : vector<1x1xf32>
    %722 = arith.addf %715, %721 : vector<1x1xf32>
    %723 = vector.broadcast %717 : f32 to vector<1x1xf32>
    %724 = arith.mulf %723, %722 : vector<1x1xf32>
    %725 = arith.addf %587, %724 : vector<1x1xf32>
    %c16_98 = arith.constant 16 : index
    %c0_99 = arith.constant 0 : index
    %726 = vector.load %arg6[%c16_98, %c0_99] : memref<24x8xf32, #tpu.memory_space<vmem>>, vector<8x8xf32>
    %727 = tpu.concatenate %726, %4 in 1 : vector<8x8xf32>, vector<8x8xf32> -> vector<8x16xf32>
    %728 = vector.extract_strided_slice %727 {offsets = [0, 0], sizes = [1, 1], strides = [1, 1]} : vector<8x16xf32> to vector<1x1xf32>
    %729 = vector.extract_strided_slice %727 {offsets = [0, 0], sizes = [1, 16], strides = [1, 1]} : vector<8x16xf32> to vector<1x16xf32>
    %730 = vector.broadcast %728 : vector<1x1xf32> to vector<1x16xf32>
    %731 = arith.divf %729, %730 : vector<1x16xf32>
    %732 = vector.extract_strided_slice %727 {offsets = [0, 0], sizes = [8, 1], strides = [1, 1]} : vector<8x16xf32> to vector<8x1xf32>
    %c0_i32_100 = arith.constant 0 : i32
    %733 = vector.broadcast %c0_i32_100 : i32 to vector<8x16xi32>
    %734 = arith.cmpi eq, %7, %733 : vector<8x16xi32>
    %735 = vector.broadcast %732 : vector<8x1xf32> to vector<8x16xf32>
    %736 = vector.broadcast %731 : vector<1x16xf32> to vector<8x16xf32>
    %737 = arith.mulf %735, %736 : vector<8x16xf32>
    %738 = arith.subf %727, %737 : vector<8x16xf32>
    %739 = vector.shape_cast %731 : vector<1x16xf32> to vector<1x16xf32>
    %740 = vector.broadcast %739 : vector<1x16xf32> to vector<8x16xf32>
    %741 = arith.select %734, %740, %738 : vector<8x16xi1>, vector<8x16xf32>
    %742 = vector.extract_strided_slice %741 {offsets = [1, 1], sizes = [1, 1], strides = [1, 1]} : vector<8x16xf32> to vector<1x1xf32>
    %743 = vector.extract_strided_slice %741 {offsets = [1, 0], sizes = [1, 16], strides = [1, 1]} : vector<8x16xf32> to vector<1x16xf32>
    %744 = vector.broadcast %742 : vector<1x1xf32> to vector<1x16xf32>
    %745 = arith.divf %743, %744 : vector<1x16xf32>
    %746 = vector.extract_strided_slice %741 {offsets = [0, 1], sizes = [8, 1], strides = [1, 1]} : vector<8x16xf32> to vector<8x1xf32>
    %c1_i32_101 = arith.constant 1 : i32
    %747 = vector.broadcast %c1_i32_101 : i32 to vector<8x16xi32>
    %748 = arith.cmpi eq, %7, %747 : vector<8x16xi32>
    %749 = vector.broadcast %746 : vector<8x1xf32> to vector<8x16xf32>
    %750 = vector.broadcast %745 : vector<1x16xf32> to vector<8x16xf32>
    %751 = arith.mulf %749, %750 : vector<8x16xf32>
    %752 = arith.subf %741, %751 : vector<8x16xf32>
    %753 = vector.shape_cast %745 : vector<1x16xf32> to vector<1x16xf32>
    %754 = vector.broadcast %753 : vector<1x16xf32> to vector<8x16xf32>
    %755 = arith.select %748, %754, %752 : vector<8x16xi1>, vector<8x16xf32>
    %756 = vector.extract_strided_slice %755 {offsets = [2, 2], sizes = [1, 1], strides = [1, 1]} : vector<8x16xf32> to vector<1x1xf32>
    %757 = vector.extract_strided_slice %755 {offsets = [2, 0], sizes = [1, 16], strides = [1, 1]} : vector<8x16xf32> to vector<1x16xf32>
    %758 = vector.broadcast %756 : vector<1x1xf32> to vector<1x16xf32>
    %759 = arith.divf %757, %758 : vector<1x16xf32>
    %760 = vector.extract_strided_slice %755 {offsets = [0, 2], sizes = [8, 1], strides = [1, 1]} : vector<8x16xf32> to vector<8x1xf32>
    %c2_i32_102 = arith.constant 2 : i32
    %761 = vector.broadcast %c2_i32_102 : i32 to vector<8x16xi32>
    %762 = arith.cmpi eq, %7, %761 : vector<8x16xi32>
    %763 = vector.broadcast %760 : vector<8x1xf32> to vector<8x16xf32>
    %764 = vector.broadcast %759 : vector<1x16xf32> to vector<8x16xf32>
    %765 = arith.mulf %763, %764 : vector<8x16xf32>
    %766 = arith.subf %755, %765 : vector<8x16xf32>
    %767 = vector.shape_cast %759 : vector<1x16xf32> to vector<1x16xf32>
    %768 = vector.broadcast %767 : vector<1x16xf32> to vector<8x16xf32>
    %769 = arith.select %762, %768, %766 : vector<8x16xi1>, vector<8x16xf32>
    %770 = vector.extract_strided_slice %769 {offsets = [3, 3], sizes = [1, 1], strides = [1, 1]} : vector<8x16xf32> to vector<1x1xf32>
    %771 = vector.extract_strided_slice %769 {offsets = [3, 0], sizes = [1, 16], strides = [1, 1]} : vector<8x16xf32> to vector<1x16xf32>
    %772 = vector.broadcast %770 : vector<1x1xf32> to vector<1x16xf32>
    %773 = arith.divf %771, %772 : vector<1x16xf32>
    %774 = vector.extract_strided_slice %769 {offsets = [0, 3], sizes = [8, 1], strides = [1, 1]} : vector<8x16xf32> to vector<8x1xf32>
    %c3_i32_103 = arith.constant 3 : i32
    %775 = vector.broadcast %c3_i32_103 : i32 to vector<8x16xi32>
    %776 = arith.cmpi eq, %7, %775 : vector<8x16xi32>
    %777 = vector.broadcast %774 : vector<8x1xf32> to vector<8x16xf32>
    %778 = vector.broadcast %773 : vector<1x16xf32> to vector<8x16xf32>
    %779 = arith.mulf %777, %778 : vector<8x16xf32>
    %780 = arith.subf %769, %779 : vector<8x16xf32>
    %781 = vector.shape_cast %773 : vector<1x16xf32> to vector<1x16xf32>
    %782 = vector.broadcast %781 : vector<1x16xf32> to vector<8x16xf32>
    %783 = arith.select %776, %782, %780 : vector<8x16xi1>, vector<8x16xf32>
    %784 = vector.extract_strided_slice %783 {offsets = [4, 4], sizes = [1, 1], strides = [1, 1]} : vector<8x16xf32> to vector<1x1xf32>
    %785 = vector.extract_strided_slice %783 {offsets = [4, 0], sizes = [1, 16], strides = [1, 1]} : vector<8x16xf32> to vector<1x16xf32>
    %786 = vector.broadcast %784 : vector<1x1xf32> to vector<1x16xf32>
    %787 = arith.divf %785, %786 : vector<1x16xf32>
    %788 = vector.extract_strided_slice %783 {offsets = [0, 4], sizes = [8, 1], strides = [1, 1]} : vector<8x16xf32> to vector<8x1xf32>
    %c4_i32_104 = arith.constant 4 : i32
    %789 = vector.broadcast %c4_i32_104 : i32 to vector<8x16xi32>
    %790 = arith.cmpi eq, %7, %789 : vector<8x16xi32>
    %791 = vector.broadcast %788 : vector<8x1xf32> to vector<8x16xf32>
    %792 = vector.broadcast %787 : vector<1x16xf32> to vector<8x16xf32>
    %793 = arith.mulf %791, %792 : vector<8x16xf32>
    %794 = arith.subf %783, %793 : vector<8x16xf32>
    %795 = vector.shape_cast %787 : vector<1x16xf32> to vector<1x16xf32>
    %796 = vector.broadcast %795 : vector<1x16xf32> to vector<8x16xf32>
    %797 = arith.select %790, %796, %794 : vector<8x16xi1>, vector<8x16xf32>
    %798 = vector.extract_strided_slice %797 {offsets = [5, 5], sizes = [1, 1], strides = [1, 1]} : vector<8x16xf32> to vector<1x1xf32>
    %799 = vector.extract_strided_slice %797 {offsets = [5, 0], sizes = [1, 16], strides = [1, 1]} : vector<8x16xf32> to vector<1x16xf32>
    %800 = vector.broadcast %798 : vector<1x1xf32> to vector<1x16xf32>
    %801 = arith.divf %799, %800 : vector<1x16xf32>
    %802 = vector.extract_strided_slice %797 {offsets = [0, 5], sizes = [8, 1], strides = [1, 1]} : vector<8x16xf32> to vector<8x1xf32>
    %c5_i32_105 = arith.constant 5 : i32
    %803 = vector.broadcast %c5_i32_105 : i32 to vector<8x16xi32>
    %804 = arith.cmpi eq, %7, %803 : vector<8x16xi32>
    %805 = vector.broadcast %802 : vector<8x1xf32> to vector<8x16xf32>
    %806 = vector.broadcast %801 : vector<1x16xf32> to vector<8x16xf32>
    %807 = arith.mulf %805, %806 : vector<8x16xf32>
    %808 = arith.subf %797, %807 : vector<8x16xf32>
    %809 = vector.shape_cast %801 : vector<1x16xf32> to vector<1x16xf32>
    %810 = vector.broadcast %809 : vector<1x16xf32> to vector<8x16xf32>
    %811 = arith.select %804, %810, %808 : vector<8x16xi1>, vector<8x16xf32>
    %812 = vector.extract_strided_slice %811 {offsets = [6, 6], sizes = [1, 1], strides = [1, 1]} : vector<8x16xf32> to vector<1x1xf32>
    %813 = vector.extract_strided_slice %811 {offsets = [6, 0], sizes = [1, 16], strides = [1, 1]} : vector<8x16xf32> to vector<1x16xf32>
    %814 = vector.broadcast %812 : vector<1x1xf32> to vector<1x16xf32>
    %815 = arith.divf %813, %814 : vector<1x16xf32>
    %816 = vector.extract_strided_slice %811 {offsets = [0, 6], sizes = [8, 1], strides = [1, 1]} : vector<8x16xf32> to vector<8x1xf32>
    %c6_i32_106 = arith.constant 6 : i32
    %817 = vector.broadcast %c6_i32_106 : i32 to vector<8x16xi32>
    %818 = arith.cmpi eq, %7, %817 : vector<8x16xi32>
    %819 = vector.broadcast %816 : vector<8x1xf32> to vector<8x16xf32>
    %820 = vector.broadcast %815 : vector<1x16xf32> to vector<8x16xf32>
    %821 = arith.mulf %819, %820 : vector<8x16xf32>
    %822 = arith.subf %811, %821 : vector<8x16xf32>
    %823 = vector.shape_cast %815 : vector<1x16xf32> to vector<1x16xf32>
    %824 = vector.broadcast %823 : vector<1x16xf32> to vector<8x16xf32>
    %825 = arith.select %818, %824, %822 : vector<8x16xi1>, vector<8x16xf32>
    %826 = vector.extract_strided_slice %825 {offsets = [7, 7], sizes = [1, 1], strides = [1, 1]} : vector<8x16xf32> to vector<1x1xf32>
    %827 = vector.extract_strided_slice %825 {offsets = [7, 0], sizes = [1, 16], strides = [1, 1]} : vector<8x16xf32> to vector<1x16xf32>
    %828 = vector.broadcast %826 : vector<1x1xf32> to vector<1x16xf32>
    %829 = arith.divf %827, %828 : vector<1x16xf32>
    %830 = vector.extract_strided_slice %825 {offsets = [0, 7], sizes = [8, 1], strides = [1, 1]} : vector<8x16xf32> to vector<8x1xf32>
    %c7_i32_107 = arith.constant 7 : i32
    %831 = vector.broadcast %c7_i32_107 : i32 to vector<8x16xi32>
    %832 = arith.cmpi eq, %7, %831 : vector<8x16xi32>
    %833 = vector.broadcast %830 : vector<8x1xf32> to vector<8x16xf32>
    %834 = vector.broadcast %829 : vector<1x16xf32> to vector<8x16xf32>
    %835 = arith.mulf %833, %834 : vector<8x16xf32>
    %836 = arith.subf %825, %835 : vector<8x16xf32>
    %837 = vector.shape_cast %829 : vector<1x16xf32> to vector<1x16xf32>
    %838 = vector.broadcast %837 : vector<1x16xf32> to vector<8x16xf32>
    %839 = arith.select %832, %838, %836 : vector<8x16xi1>, vector<8x16xf32>
    %840 = vector.extract_strided_slice %839 {offsets = [0, 8], sizes = [8, 8], strides = [1, 1]} : vector<8x16xf32> to vector<8x8xf32>
    %841 = tpu.concatenate %728, %742, %756, %770, %784, %798, %812, %826 in 1 : vector<1x1xf32>, vector<1x1xf32>, vector<1x1xf32>, vector<1x1xf32>, vector<1x1xf32>, vector<1x1xf32>, vector<1x1xf32>, vector<1x1xf32> -> vector<1x8xf32>
    %842 = math.log %841 : vector<1x8xf32>
    %cst_108 = arith.constant dense<0.000000e+00> : vector<1xf32>
    %843 = vector.multi_reduction <add>, %842, %cst_108 [1] : vector<1x8xf32> to vector<1xf32>
    %844 = vector.shape_cast %843 : vector<1xf32> to vector<1x1xf32>
    %845 = vector.extract_strided_slice %448 {offsets = [2, 0], sizes = [1, 8], strides = [1, 1]} : vector<3x8xf32> to vector<1x8xf32>
    %846 = vector.broadcast %845 : vector<1x8xf32> to vector<64x8xf32>
    %847 = arith.subf %8, %846 : vector<64x8xf32>
    %cst_109 = arith.constant dense<0.000000e+00> : vector<64x8xf32>
    %848 = tpu.matmul %847, %840, %cst_109 {dimension_numbers = #tpu.dot_dimension_numbers<[1], [0], [0], [1], [0, 0, 1, 1], [], []>} : vector<64x8xf32>, vector<8x8xf32>, vector<64x8xf32> -> vector<64x8xf32>
    %849 = arith.mulf %848, %847 : vector<64x8xf32>
    %cst_110 = arith.constant dense<0.000000e+00> : vector<64xf32>
    %850 = vector.multi_reduction <add>, %849, %cst_110 [1] : vector<64x8xf32> to vector<64xf32>
    %851 = vector.shape_cast %850 : vector<64xf32> to vector<64x1xf32>
    %cst_111 = arith.constant dense<0.000000e+00> : vector<1xf32>
    %852 = vector.multi_reduction <add>, %851, %cst_111 [0] : vector<64x1xf32> to vector<1xf32>
    %853 = vector.shape_cast %852 : vector<1xf32> to vector<1x1xf32>
    %c2_112 = arith.constant 2 : index
    %854 = memref.load %arg3[%c2_112] : memref<3xf32, #tpu.memory_space<smem>>
    %cst_113 = arith.constant 5.000000e-01 : f32
    %855 = arith.mulf %854, %cst_113 : f32
    %cst_114 = arith.constant 14.7030163 : f32
    %856 = vector.broadcast %cst_114 : f32 to vector<1x1xf32>
    %857 = arith.addf %844, %856 : vector<1x1xf32>
    %cst_115 = arith.constant 6.400000e+01 : f32
    %858 = vector.broadcast %cst_115 : f32 to vector<1x1xf32>
    %859 = arith.mulf %858, %857 : vector<1x1xf32>
    %860 = arith.addf %853, %859 : vector<1x1xf32>
    %861 = vector.broadcast %855 : f32 to vector<1x1xf32>
    %862 = arith.mulf %861, %860 : vector<1x1xf32>
    %863 = arith.addf %725, %862 : vector<1x1xf32>
    %c0_116 = arith.constant 0 : index
    %c0_117 = arith.constant 0 : index
    %864 = vector.load %arg4[%c0_116, %c0_117] : memref<1x1xf32, #tpu.memory_space<vmem>>, vector<1x1xf32>
    tpu.vector_store %arg4[%c0_116, %c0_117], %863 {strides = array<i32>} : memref<1x1xf32, #tpu.memory_space<vmem>>, vector<1x1xf32>,
    return
  }
}

</mosaic_0001>

<bundles_post_ra>
// kernel: gmm_forward.1
= control target key start
LH: loop header
LB: loop body
LE: loop exit
PB: predicated region body
PF: predicated region fallthrough
CT: control target
= control target key end

     0   :  { %12 = vsyncpa [#allocation5], 0  ;;  %s6140_s0 = inlined_call_operand.vmem [shape: f32[64,8], index: 0, kind: input, shape index: {}]   ;;  %s6141_s1 = inlined_call_operand.vmem [shape: f32[3,8], index: 1, kind: input, shape index: {}]   ;;  %s6142_s2 = inlined_call_operand.vmem [shape: f32[24,8], index: 2, kind: input, shape index: {}]   ;;  %s6143_s3 = inlined_call_operand.vmem [shape: f32[3], index: 3, kind: input, shape index: {}]   ;;  %s6144_s4 = inlined_call_operand.hbm [shape: f32[1,1], index: 4, kind: output, shape index: {0}]   ;;  %s6145_s5 = inlined_call_operand.hbm [shape: f32[3,8], index: 5, kind: output, shape index: {1}]   ;;  %s6146_s6 = inlined_call_operand.hbm [shape: f32[24,8], index: 6, kind: output, shape index: {2}]  }
   0x1   :  { %13 = vsyncpa [#allocation4], 0 }
   0x2   :  { %14 = vsyncpa [#allocation8], 0  ;;  %s27_s23 = sshll.u32 %s6143_s3, 4  ;;  %s28_s23 = int_to_ptr.vmem [resolvable:$true] %s27_s23 }
   0x3   :  { %s4497_s24 = scalar_lea.vmem %s28_s23, 16  ;;  %p4502_p1 = scmp.lt.s32.totalorder %s28_s23, %s28_s23 }
   0x4   :  { %p4498_p0 = scmp.ne.s32.totalorder %s28_s23, %s4497_s24  ;;  %p4503_p2 = scmp.lt.s32.totalorder %s4497_s24, %s4497_s24 }
   0x6   :  { %p4504_p3 = por %p4503_p2, %p4502_p1 }
   0x8   :  { %p4505_p4 = pnand %p4504_p3, %p4498_p0 }
   0xa   :  { %4508 = shalt.err (!%p4505_p4)
}
   0xb   :  { %s4589_s25 = smov [#allocation3]  }
   0xc   :  { %30 = dma.vmem_to_smem %s28_s23, 16, %s4589_s25, [#allocation5]  }
   0xd   :  { %4579 = dma.done.wait [#allocation5], 16  }
   0xe   :  { %4580 = vsyncadd [#allocation5], 4294967280 }
   0xf   :  { %34 = sfence }
  0x10   :  { %v35_v0 = vlaneseq  ;;  %v60_v1 = vld [vmem:[%s6141_s1] sm:$0x7]  ;;  %vm61_vm0 = vcmask 59392   ;;  %v4673_v3 = vld [vmem:[%s6140_s0 + $0x8] sm:$0xff]  ;;  %v4679_v4 = vld [vmem:[%s6140_s0 + $0x10] sm:$0xff]  ;;  %vm51_vm1 = vcmask 64512  }
  0x11   :  { %v4668_v2 = vld [vmem:[%s6140_s0] sm:$0xff]  ;;  %6200 = vst [vmem:[#allocation14_spill] sm:$0xff] %v4673_v3  ;;  %62 = vst.msk [vmem:[#allocation7] sm:$0x7] %vm61_vm0, %v60_v1  ;;  %v4684_v5 = vld [vmem:[%s6140_s0 + $0x18] sm:$0xff]  ;;  %v4714_v13 = vsel %vm51_vm1, %v4673_v3, 1.0 }
  0x12   :  { %6199 = vst [vmem:[#allocation13_spill] sm:$0xff] %v4668_v2  ;;  %6201 = vst [vmem:[#allocation15_spill] sm:$0xff] %v4679_v4  ;;  %v4689_v6 = vld [vmem:[%s6140_s0 + $0x20] sm:$0xff]  ;;  %v4691_v7 = vshrl.u32 %v35_v0, 7  ;;  %v38_v8 = vand.u32 127, %v35_v0  ;;  %v4696_v9 = vld [vmem:[%s6140_s0 + $0x28] sm:$0xff] }
  0x13   :  { %6202 = vst [vmem:[#allocation16_spill] sm:$0xff] %v4684_v5  ;;  %6203 = vst [vmem:[#allocation17_spill] sm:$0xff] %v4689_v6  ;;  %v4701_v10 = vld [vmem:[%s6140_s0 + $0x30] sm:$0xff]  ;;  %v4706_v11 = vld [vmem:[%s6140_s0 + $0x38] sm:$0xff]  ;;  %v4710_v12 = vsel %vm51_vm1, %v4668_v2, 1.0  ;;  %v4718_v14 = vsel %vm51_vm1, %v4679_v4, 1.0 }
  0x14   :  { %6204 = vst [vmem:[#allocation18_spill] sm:$0xff] %v4696_v9  ;;  %6205 = vst [vmem:[#allocation19_spill] sm:$0xff] %v4701_v10  ;;  %v4722_v15 = vsel %vm51_vm1, %v4684_v5, 1.0  ;;  %v4726_v16 = vsel %vm51_vm1, %v4689_v6, 1.0  ;;  %v63_v17 = vld [vmem:[%s6142_s2] sm:$0xff]  ;;  %v64_v18 = vld [vmem:[%s6142_s2 + $0x8] sm:$0xff]  ;;  %vm39_vm2 = vcmp.eq.s32.totalorder %v4691_v7, %v38_v8 }
  0x15   :  { %6206 = vst [vmem:[#allocation20_spill] sm:$0xff] %v4706_v11  ;;  %6207 = vst [vmem:[#allocation21_spill] sm:$0xff] %v4710_v12  ;;  %v4737_v19 = vsel %vm51_vm1, %v4696_v9, 1.0  ;;  %v4741_v20 = vsel %vm51_vm1, %v4701_v10, 1.0  ;;  %v4745_v21 = vsel %vm51_vm1, %v4706_v11, 1.0  ;;  %v65_v22 = vld [vmem:[%s6142_s2 + $0x10] sm:$0xff] }
  0x16   :  { %6208 = vst [vmem:[#allocation22_spill] sm:$0xff] %v4714_v13  ;;  %66 = vst.msk [vmem:[#allocation9] sm:$0xff] %vm51_vm1, %v63_v17  ;;  %v69_v23 = vld [vmem:[%s6141_s1] sm:$0x7]  ;;  %v6147_v24 = vmov 0.0   ;;  %s4763_s26 = smov 0  }
  0x17   :  { %67 = vst.msk [vmem:[#allocation9 + $0x8] sm:$0xff] %vm51_vm1, %v64_v18  ;;  %v4756_v25 = vsel %vm39_vm2, 1.0, %v6147_v24  ;;  %68 = vst.msk [vmem:[#allocation9 + $0x10] sm:$0xff] %vm51_vm1, %v65_v22 }
  0x18   :  { %70 = vst.msk [vmem:[#allocation2] sm:$0x7] %vm61_vm0, %v69_v23  ;;  %v4761_v26 = vmul.f32 1e-06, %v4756_v25 }
  0x19 LB: > { %3926 = vmatprep.mubr.msk.f32.mxu0 %vm51_vm1, %v4668_v2  ;;  %s4591_s1 = smov 8   ;;  %v4592_v27 = vmov 0   ;;  %v4593_v35 = vmov 1   ;;  %v4776_v39 = vsub.s32 0, %v4691_v7  ;;  %vm94_vm3 = vcmp.eq.s32.totalorder %v4691_v7, 0  ;;  %s4602_s2 = smov 120   ;;  %s4587_s26 = sphi %s4763_s26, %s1389_s26  }
  0x1a   : > { %83 = vrot.lane.b32.xlu0 %v4756_v25, %s4591_s1  ;;  %4272 = vset.pattern.permute.xlu1 %v4592_v27  ;;  %v4594_v58 = vmov 2   ;;  %v4789_v62 = vsub.s32 1, %v4691_v7  ;;  %vm109_vm4 = vcmp.eq.s32.totalorder %v4691_v7, 1  ;;  %vm124_vm5 = vcmp.eq.s32.totalorder %v4691_v7, 2  ;;  %s4603_s27 = smov 16   ;;  %v6217_v3 = vld [vmem:[#allocation14_spill] sm:$0xff] }
  0x1b   : > { %4271 = vset.pattern.permute.xlu0 %v4592_v27  ;;  %vm139_vm6 = vcmp.eq.s32.totalorder %v4691_v7, 3  ;;  %vm154_vm7 = vcmp.eq.s32.totalorder %v4691_v7, 4  ;;  %vm169_vm8 = vcmp.eq.s32.totalorder %v4691_v7, 5  ;;  %vm184_vm9 = vcmp.eq.s32.totalorder %v4691_v7, 6  ;;  %v6218_v4 = vld [vmem:[#allocation15_spill] sm:$0xff]  ;;  %v6219_v5 = vld [vmem:[#allocation16_spill] sm:$0xff] }
  0x1c   : > { %v6209_v12 = vld [vmem:[#allocation21_spill] sm:$0xff]  ;;  %vm4601_vm10 = vmmov 0   ;;  %vm199_vm11 = vcmp.eq.s32.totalorder %v4691_v7, 7  ;;  %vm444_vm12 = vcmask 130048   ;;  %v6221_v9 = vld [vmem:[#allocation18_spill] sm:$0xff]  ;;  %v6222_v10 = vld [vmem:[#allocation19_spill] sm:$0xff] }
  0x1d   : > { %v6210_v13 = vld [vmem:[#allocation22_spill] sm:$0xff]  ;;  %v6220_v6 = vld [vmem:[#allocation17_spill] sm:$0xff]  ;;  %v6223_v11 = vld [vmem:[#allocation20_spill] sm:$0xff]  ;;  %s4604_s3 = smov 112   ;;  %vm745_vm13 = vcmask 523264   ;;  %vm1106_vm14 = vcmask 58369  }
  0x1e   : > { %v321_v28 = vld [vmem:[#allocation9 + $0x10] sm:$0xff]  ;;  %v81_v29 = vld [vmem:[#allocation9] sm:$0xff]  ;;  %v207_v33 = vld [vmem:[#allocation9 + $0x8] sm:$0xff]  ;;  %vm843_vm15 = vcmask 57344   ;;  %vm1369_vm2 = vcmask 59394   ;;  %s1389_s26 = sadd.s32 1, %s4587_s26  }
  0x1f   : > { %p75_p7 = scmp.lt.s32.totalorder %s1389_s26, 100 }
  0x8c   : > { %v84_v30 = vpop.permute.xlu0 %83 }
  0x8d   : > { %v322_v31 = vsel %vm51_vm1, %v321_v28, %v84_v30  ;;  %v86_v32 = vsel %vm51_vm1, %v81_v29, %v84_v30  ;;  %v208_v34 = vsel %vm51_vm1, %v207_v33, %v84_v30 }
  0x8e   : > { %325 = vperm.xlu1 %4272, %v322_v31   ;;  %89 = vperm.xlu0 %4271, %v86_v32  }
  0x92   : > { %211 = vperm.xlu1 %4272, %v208_v34   ;;  %4274 = vset.pattern.permute.xlu0 %v4593_v35 }
  0x96   : > { %4273 = vset.pattern.permute.xlu1 %v4593_v35 }
 0x10d   : > { %v326_v36 = vpop.permute.xlu1 %325  ;;  %v90_v37 = vpop.permute.xlu0 %89 }
 0x10e   : > { %4289 = vrcp.f32 %v326_v36 }
 0x10f   : > { %4291 = vrcp.f32 %v90_v37 }
 0x111   : > { %v212_v38 = vpop.permute.xlu1 %211 }
 0x112   : > { %4293 = vrcp.f32 %v212_v38 }
 0x118   : > { %v4290_v40 = vpop.eup %4289 }
 0x119   : > { %v4292_v41 = vpop.eup %4291  ;;  %v329_v42 = vmul.f32 %v4290_v40, %v322_v31 }
 0x11a   : > { %v93_v43 = vmul.f32 %v4292_v41, %v86_v32 }
 0x11b   : > { %v333_v44 = vrot.slane %v329_v42, %v4776_v39  ;;  %v4802_v42 = vsub.s32 2, %v4691_v7 }
 0x11c   : > { %v4294_v45 = vpop.eup %4293  ;;  %v98_v46 = vrot.slane %v93_v43, %v4776_v39 }
 0x11d   : > { %v334_v47 = vmul.f32 %v333_v44, %v326_v36  ;;  %v215_v48 = vmul.f32 %v4294_v45, %v208_v34  ;;  %6211 = vst [vmem:[#allocation23_spill] sm:$0xff] %v4802_v42 }
 0x11e   : > { %v99_v49 = vmul.f32 %v98_v46, %v90_v37  ;;  %v4595_v37 = vmov 3  }
 0x11f   : > { %v335_v50 = vsub.f32 %v322_v31, %v334_v47  ;;  %v219_v51 = vrot.slane %v215_v48, %v4776_v39 }
 0x120   : > { %v100_v52 = vsub.f32 %v86_v32, %v99_v49 }
 0x121   : > { %v220_v53 = vmul.f32 %v219_v51, %v212_v38  ;;  %v336_v54 = vsel %vm94_vm3, %v333_v44, %v335_v50 }
 0x122   : > { %339 = vperm.xlu0 %4274, %v336_v54   ;;  %v101_v55 = vsel %vm94_vm3, %v98_v46, %v100_v52 }
 0x123   : > { %v221_v56 = vsub.f32 %v208_v34, %v220_v53  ;;  %104 = vperm.xlu1 %4273, %v101_v55  }
 0x125   : > { %v222_v57 = vsel %vm94_vm3, %v219_v51, %v221_v56 }
 0x126   : > { %4276 = vset.pattern.permute.xlu0 %v4594_v58 }
 0x127   : > { %225 = vperm.xlu1 %4273, %v222_v57  }
 0x12b   : > { %4275 = vset.pattern.permute.xlu1 %v4594_v58 }
 0x1a1   : > { %v340_v59 = vpop.permute.xlu0 %339 }
 0x1a2   : > { %v105_v60 = vpop.permute.xlu1 %104  ;;  %4295 = vrcp.f32 %v340_v59 }
 0x1a3   : > { %4297 = vrcp.f32 %v105_v60 }
 0x1a6   : > { %v226_v61 = vpop.permute.xlu1 %225 }
 0x1a7   : > { %4299 = vrcp.f32 %v226_v61 }
 0x1ac   : > { %v4296_v63 = vpop.eup %4295 }
 0x1ad   : > { %v4298_v0 = vpop.eup %4297  ;;  %v343_v1 = vmul.f32 %v4296_v63, %v336_v54 }
 0x1ae   : > { %v108_v8 = vmul.f32 %v4298_v0, %v101_v55 }
 0x1af   : > { %v347_v17 = vrot.slane %v343_v1, %v4789_v62 }
 0x1b0   : > { %v113_v18 = vrot.slane %v108_v8, %v4789_v62  ;;  %v4815_v8 = vsub.s32 3, %v4691_v7 }
 0x1b1   : > { %v4300_v22 = vpop.eup %4299  ;;  %v348_v23 = vmul.f32 %v347_v17, %v340_v59 }
 0x1b2   : > { %v114_v27 = vmul.f32 %v113_v18, %v105_v60  ;;  %v229_v28 = vmul.f32 %v4300_v22, %v222_v57  ;;  %6212 = vst [vmem:[#allocation24_spill] sm:$0xff] %v4815_v8 }
 0x1b3   : > { %v349_v29 = vsub.f32 %v336_v54, %v348_v23 }
 0x1b4   : > { %v115_v30 = vsub.f32 %v101_v55, %v114_v27  ;;  %v233_v31 = vrot.slane %v229_v28, %v4789_v62 }
 0x1b5   : > { %v350_v32 = vsel %vm109_vm4, %v347_v17, %v349_v29 }
 0x1b6   : > { %v234_v33 = vmul.f32 %v233_v31, %v226_v61  ;;  %v116_v34 = vsel %vm109_vm4, %v113_v18, %v115_v30  ;;  %353 = vperm.xlu0 %4276, %v350_v32   ;;  %v4596_v61 = vmov 4  }
 0x1b7   : > { %119 = vperm.xlu1 %4275, %v116_v34  }
 0x1b8   : > { %v235_v35 = vsub.f32 %v222_v57, %v234_v33 }
 0x1ba   : > { %v236_v36 = vsel %vm109_vm4, %v233_v31, %v235_v35  ;;  %4278 = vset.pattern.permute.xlu0 %v4595_v37 }
 0x1bb   : > { %239 = vperm.xlu1 %4275, %v236_v36  }
 0x1bf   : > { %4277 = vset.pattern.permute.xlu1 %v4595_v37 }
 0x235   : > { %v354_v38 = vpop.permute.xlu0 %353 }
 0x236   : > { %v120_v40 = vpop.permute.xlu1 %119  ;;  %4301 = vrcp.f32 %v354_v38 }
 0x237   : > { %4303 = vrcp.f32 %v120_v40 }
 0x23a   : > { %v240_v41 = vpop.permute.xlu1 %239 }
 0x23b   : > { %4305 = vrcp.f32 %v240_v41 }
 0x240   : > { %v4302_v43 = vpop.eup %4301 }
 0x241   : > { %v4304_v44 = vpop.eup %4303  ;;  %v357_v45 = vmul.f32 %v4302_v43, %v350_v32  ;;  %v4597_v43 = vmov 5  }
 0x242   : > { %v123_v46 = vmul.f32 %v4304_v44, %v116_v34 }
 0x243   : > { %v361_v47 = vrot.slane %v357_v45, %v4802_v42 }
 0x244   : > { %v128_v48 = vrot.slane %v123_v46, %v4802_v42 }
 0x245   : > { %v4306_v49 = vpop.eup %4305  ;;  %v362_v50 = vmul.f32 %v361_v47, %v354_v38 }
 0x246   : > { %v129_v51 = vmul.f32 %v128_v48, %v120_v40  ;;  %v243_v52 = vmul.f32 %v4306_v49, %v236_v36 }
 0x247   : > { %v363_v53 = vsub.f32 %v350_v32, %v362_v50 }
 0x248   : > { %v130_v54 = vsub.f32 %v116_v34, %v129_v51  ;;  %v247_v55 = vrot.slane %v243_v52, %v4802_v42 }
 0x249   : > { %v364_v56 = vsel %vm124_vm5, %v361_v47, %v363_v53  ;;  %v4828_v47 = vsub.s32 4, %v4691_v7 }
 0x24a   : > { %v248_v57 = vmul.f32 %v247_v55, %v240_v41  ;;  %v131_v58 = vsel %vm124_vm5, %v128_v48, %v130_v54  ;;  %367 = vperm.xlu0 %4278, %v364_v56  }
 0x24b   : > { %134 = vperm.xlu1 %4277, %v131_v58   ;;  %6213 = vst [vmem:[#allocation25_spill] sm:$0xff] %v4828_v47 }
 0x24c   : > { %v249_v59 = vsub.f32 %v236_v36, %v248_v57 }
 0x24e   : > { %v250_v60 = vsel %vm124_vm5, %v247_v55, %v249_v59  ;;  %4280 = vset.pattern.permute.xlu0 %v4596_v61 }
 0x24f   : > { %253 = vperm.xlu1 %4277, %v250_v60  }
 0x253   : > { %4279 = vset.pattern.permute.xlu1 %v4596_v61 }
 0x2c9   : > { %v368_v63 = vpop.permute.xlu0 %367 }
 0x2ca   : > { %v135_v0 = vpop.permute.xlu1 %134  ;;  %4307 = vrcp.f32 %v368_v63 }
 0x2cb   : > { %4309 = vrcp.f32 %v135_v0 }
 0x2ce   : > { %v254_v1 = vpop.permute.xlu1 %253 }
 0x2cf   : > { %4311 = vrcp.f32 %v254_v1 }
 0x2d4   : > { %v4308_v17 = vpop.eup %4307 }
 0x2d5   : > { %v4310_v18 = vpop.eup %4309  ;;  %v371_v22 = vmul.f32 %v4308_v17, %v364_v56 }
 0x2d6   : > { %v138_v23 = vmul.f32 %v4310_v18, %v131_v58  ;;  %v4598_v18 = vmov 6  }
 0x2d7   : > { %v375_v27 = vrot.slane %v371_v22, %v4815_v8 }
 0x2d8   : > { %v143_v28 = vrot.slane %v138_v23, %v4815_v8 }
 0x2d9   : > { %v4312_v29 = vpop.eup %4311  ;;  %v376_v30 = vmul.f32 %v375_v27, %v368_v63 }
 0x2da   : > { %v144_v31 = vmul.f32 %v143_v28, %v135_v0  ;;  %v257_v32 = vmul.f32 %v4312_v29, %v250_v60 }
 0x2db   : > { %v377_v33 = vsub.f32 %v364_v56, %v376_v30 }
 0x2dc   : > { %v145_v34 = vsub.f32 %v131_v58, %v144_v31  ;;  %v261_v35 = vrot.slane %v257_v32, %v4815_v8 }
 0x2dd   : > { %v378_v36 = vsel %vm139_vm6, %v375_v27, %v377_v33 }
 0x2de   : > { %v262_v37 = vmul.f32 %v261_v35, %v254_v1  ;;  %v146_v38 = vsel %vm139_vm6, %v143_v28, %v145_v34  ;;  %381 = vperm.xlu0 %4280, %v378_v36   ;;  %v4841_v28 = vsub.s32 5, %v4691_v7 }
 0x2df   : > { %149 = vperm.xlu1 %4279, %v146_v38  }
 0x2e0   : > { %v263_v40 = vsub.f32 %v250_v60, %v262_v37  ;;  %6214 = vst [vmem:[#allocation26_spill] sm:$0xff] %v4841_v28 }
 0x2e2   : > { %v264_v41 = vsel %vm139_vm6, %v261_v35, %v263_v40  ;;  %4282 = vset.pattern.permute.xlu0 %v4597_v43 }
 0x2e3   : > { %267 = vperm.xlu1 %4279, %v264_v41  }
 0x2e7   : > { %4281 = vset.pattern.permute.xlu1 %v4597_v43 }
 0x35d   : > { %v382_v44 = vpop.permute.xlu0 %381 }
 0x35e   : > { %v150_v45 = vpop.permute.xlu1 %149  ;;  %4313 = vrcp.f32 %v382_v44 }
 0x35f   : > { %4315 = vrcp.f32 %v150_v45 }
 0x362   : > { %v268_v46 = vpop.permute.xlu1 %267 }
 0x363   : > { %4317 = vrcp.f32 %v268_v46 }
 0x368   : > { %v4314_v48 = vpop.eup %4313 }
 0x369   : > { %v4316_v49 = vpop.eup %4315  ;;  %v385_v50 = vmul.f32 %v4314_v48, %v378_v36 }
 0x36a   : > { %v153_v51 = vmul.f32 %v4316_v49, %v146_v38 }
 0x36b   : > { %v389_v52 = vrot.slane %v385_v50, %v4828_v47  ;;  %v4599_v50 = vmov 7  }
 0x36c   : > { %v158_v53 = vrot.slane %v153_v51, %v4828_v47 }
 0x36d   : > { %v4318_v54 = vpop.eup %4317  ;;  %v390_v55 = vmul.f32 %v389_v52, %v382_v44 }
 0x36e   : > { %v159_v56 = vmul.f32 %v158_v53, %v150_v45  ;;  %v271_v57 = vmul.f32 %v4318_v54, %v264_v41  ;;  %v4854_v54 = vsub.s32 6, %v4691_v7 }
 0x36f   : > { %v391_v58 = vsub.f32 %v378_v36, %v390_v55 }
 0x370   : > { %v160_v59 = vsub.f32 %v146_v38, %v159_v56  ;;  %v275_v60 = vrot.slane %v271_v57, %v4828_v47  ;;  %6215 = vst [vmem:[#allocation27_spill] sm:$0xff] %v4854_v54 }
 0x371   : > { %v392_v61 = vsel %vm154_vm7, %v389_v52, %v391_v58 }
 0x372   : > { %v276_v63 = vmul.f32 %v275_v60, %v268_v46  ;;  %v161_v0 = vsel %vm154_vm7, %v158_v53, %v160_v59  ;;  %395 = vperm.xlu0 %4282, %v392_v61  }
 0x373   : > { %164 = vperm.xlu1 %4281, %v161_v0  }
 0x374   : > { %v277_v1 = vsub.f32 %v264_v41, %v276_v63 }
 0x376   : > { %v278_v17 = vsel %vm154_vm7, %v275_v60, %v277_v1  ;;  %4284 = vset.pattern.permute.xlu0 %v4598_v18 }
 0x377   : > { %281 = vperm.xlu1 %4281, %v278_v17  }
 0x37b   : > { %4283 = vset.pattern.permute.xlu1 %v4598_v18 }
 0x3f1   : > { %v396_v22 = vpop.permute.xlu0 %395 }
 0x3f2   : > { %v165_v23 = vpop.permute.xlu1 %164  ;;  %4319 = vrcp.f32 %v396_v22 }
 0x3f3   : > { %4321 = vrcp.f32 %v165_v23 }
 0x3f6   : > { %v282_v27 = vpop.permute.xlu1 %281 }
 0x3f7   : > { %4323 = vrcp.f32 %v282_v27 }
 0x3fc   : > { %v4320_v29 = vpop.eup %4319 }
 0x3fd   : > { %v4322_v30 = vpop.eup %4321  ;;  %v399_v31 = vmul.f32 %v4320_v29, %v392_v61 }
 0x3fe   : > { %v168_v32 = vmul.f32 %v4322_v30, %v161_v0 }
 0x3ff   : > { %v403_v33 = vrot.slane %v399_v31, %v4841_v28 }
 0x400   : > { %v173_v34 = vrot.slane %v168_v32, %v4841_v28 }
 0x401   : > { %v4324_v35 = vpop.eup %4323  ;;  %v404_v36 = vmul.f32 %v403_v33, %v396_v22 }
 0x402   : > { %v174_v37 = vmul.f32 %v173_v34, %v165_v23  ;;  %v285_v38 = vmul.f32 %v4324_v35, %v278_v17  ;;  %v4867_v35 = vsub.s32 7, %v4691_v7 }
 0x403   : > { %v405_v40 = vsub.f32 %v392_v61, %v404_v36  ;;  %v4600_v36 = vmov 0.0  }
 0x404   : > { %v175_v41 = vsub.f32 %v161_v0, %v174_v37  ;;  %v289_v43 = vrot.slane %v285_v38, %v4841_v28  ;;  %6216 = vst [vmem:[#allocation28_spill] sm:$0xff] %v4867_v35  ;;  %3938 = vmatprep.subr.mxu1 %v4600_v36  ;;  %3940 = vmatprep.mubr.msk.f32.mxu1 %vm4601_vm10, %v4600_v36 }
 0x405   : > { %v406_v44 = vsel %vm169_vm8, %v403_v33, %v405_v40 }
 0x406   : > { %v290_v45 = vmul.f32 %v289_v43, %v282_v27  ;;  %v176_v46 = vsel %vm169_vm8, %v173_v34, %v175_v41  ;;  %409 = vperm.xlu0 %4284, %v406_v44  }
 0x407   : > { %179 = vperm.xlu1 %4283, %v176_v46  }
 0x408   : > { %v291_v48 = vsub.f32 %v278_v17, %v290_v45 }
 0x40a   : > { %v292_v49 = vsel %vm169_vm8, %v289_v43, %v291_v48  ;;  %4286 = vset.pattern.permute.xlu0 %v4599_v50 }
 0x40b   : > { %295 = vperm.xlu1 %4283, %v292_v49  }
 0x40f   : > { %4285 = vset.pattern.permute.xlu1 %v4599_v50  ;;  %v4872_v50 = vld [vmem:[#allocation7] sm:$0x7] }
 0x485   : > { %v410_v51 = vpop.permute.xlu0 %409 }
 0x486   : > { %v180_v52 = vpop.permute.xlu1 %179  ;;  %4325 = vrcp.f32 %v410_v51 }
 0x487   : > { %4327 = vrcp.f32 %v180_v52 }
 0x48a   : > { %v296_v53 = vpop.permute.xlu1 %295 }
 0x48b   : > { %4329 = vrcp.f32 %v296_v53 }
 0x490   : > { %v4326_v55 = vpop.eup %4325 }
 0x491   : > { %v4328_v56 = vpop.eup %4327  ;;  %v413_v57 = vmul.f32 %v4326_v55, %v406_v44 }
 0x492   : > { %v183_v58 = vmul.f32 %v4328_v56, %v176_v46 }
 0x493   : > { %v417_v59 = vrot.slane %v413_v57, %v4854_v54 }
 0x494   : > { %v188_v60 = vrot.slane %v183_v58, %v4854_v54 }
 0x495   : > { %v4330_v61 = vpop.eup %4329  ;;  %v418_v63 = vmul.f32 %v417_v59, %v410_v51 }
 0x496   : > { %v189_v0 = vmul.f32 %v188_v60, %v180_v52  ;;  %v299_v1 = vmul.f32 %v4330_v61, %v292_v49  ;;  %v4876_v52 = vsel %vm51_vm1, %v4872_v50, 0.0 }
 0x497   : > { %v419_v17 = vsub.f32 %v406_v44, %v418_v63 }
 0x498   : > { %v190_v18 = vsub.f32 %v176_v46, %v189_v0  ;;  %v303_v22 = vrot.slane %v299_v1, %v4854_v54 }
 0x499   : > { %v420_v23 = vsel %vm184_vm9, %v417_v59, %v419_v17  ;;  %v849_v59 = vrot.slane %v4876_v52, %v4789_v62 }
 0x49a   : > { %v304_v27 = vmul.f32 %v303_v22, %v296_v53  ;;  %v191_v29 = vsel %vm184_vm9, %v188_v60, %v190_v18  ;;  %423 = vperm.xlu0 %4286, %v420_v23   ;;  %v1112_v60 = vrot.slane %v4876_v52, %v4802_v42 }
 0x49b   : > { %194 = vperm.xlu1 %4285, %v191_v29   ;;  %v4895_v1 = vsub.f32 %v6209_v12, %v849_v59  ;;  %v4904_v18 = vsub.f32 %v6210_v13, %v849_v59  ;;  %v4949_v36 = vsub.f32 %v4741_v20, %v849_v59 }
 0x49c   : > { %v305_v30 = vsub.f32 %v292_v49, %v304_v27  ;;  %v4892_v0 = vsub.f32 %v6209_v12, %v1112_v60  ;;  %v4901_v17 = vsub.f32 %v6210_v13, %v1112_v60  ;;  %v4919_v27 = vsub.f32 %v4722_v15, %v1112_v60 }
 0x49e   : > { %v306_v31 = vsel %vm184_vm9, %v303_v22, %v305_v30  ;;  %v4910_v22 = vsub.f32 %v4718_v14, %v1112_v60  ;;  %v4928_v30 = vsub.f32 %v4726_v16, %v1112_v60 }
 0x49f   : > { %309 = vperm.xlu1 %4285, %v306_v31  }
 0x519   : > { %v424_v32 = vpop.permute.xlu0 %423 }
 0x51a   : > { %v195_v33 = vpop.permute.xlu1 %194  ;;  %4331 = vrcp.f32 %v424_v32 }
 0x51b   : > { %4333 = vrcp.f32 %v195_v33 }
 0x51e   : > { %v310_v34 = vpop.permute.xlu1 %309 }
 0x51f   : > { %4335 = vrcp.f32 %v310_v34 }
 0x524   : > { %v4332_v37 = vpop.eup %4331 }
 0x525   : > { %v4334_v38 = vpop.eup %4333  ;;  %v427_v40 = vmul.f32 %v4332_v37, %v420_v23  ;;  %v4955_v37 = vsub.f32 %v4745_v21, %v1112_v60 }
 0x526   : > { %v198_v41 = vmul.f32 %v4334_v38, %v191_v29  ;;  %v4958_v38 = vsub.f32 %v4745_v21, %v849_v59 }
 0x527   : > { %v431_v43 = vrot.slane %v427_v40, %v4867_v35 }
 0x528   : > { %v203_v44 = vrot.slane %v198_v41, %v4867_v35 }
 0x529   : > { %v4336_v45 = vpop.eup %4335  ;;  %v432_v46 = vmul.f32 %v431_v43, %v424_v32  ;;  %v4937_v32 = vsub.f32 %v4737_v19, %v1112_v60 }
 0x52a   : > { %v204_v48 = vmul.f32 %v203_v44, %v195_v33  ;;  %v313_v49 = vmul.f32 %v4336_v45, %v306_v31  ;;  %v4940_v33 = vsub.f32 %v4737_v19, %v849_v59 }
 0x52b   : > { %v433_v51 = vsub.f32 %v420_v23, %v432_v46  ;;  %v4913_v23 = vsub.f32 %v4718_v14, %v849_v59 }
 0x52c   : > { %v205_v53 = vsub.f32 %v191_v29, %v204_v48  ;;  %v317_v55 = vrot.slane %v313_v49, %v4867_v35  ;;  %v4922_v29 = vsub.f32 %v4722_v15, %v849_v59 }
 0x52d   : > { %v434_v56 = vsel %vm199_vm11, %v431_v43, %v433_v51 }
 0x52e   : > { %v318_v57 = vmul.f32 %v317_v55, %v310_v34  ;;  %v206_v58 = vsel %vm199_vm11, %v203_v44, %v205_v53  ;;  %440 = vrot.lane.b32.xlu0 %v434_v56, %s4591_s1  ;;  %v4946_v34 = vsub.f32 %v4741_v20, %v1112_v60 }
 0x52f   : > { %436 = vrot.lane.b32.xlu1 %v206_v58, %s4602_s2 }
 0x530   : > { %v319_v61 = vsub.f32 %v306_v31, %v318_v57  ;;  %v4931_v31 = vsub.f32 %v4726_v16, %v849_v59 }
 0x532   : > { %v320_v63 = vsel %vm199_vm11, %v317_v55, %v319_v61  ;;  %1141 = vrot.lane.b32.xlu0 %v4892_v0, %s4603_s27 }
 0x533   : > { %878 = vrot.lane.b32.xlu1 %v4895_v1, %s4591_s1 }
 0x536   : > { %1143 = vrot.lane.b32.xlu0 %v4901_v17, %s4603_s27 }
 0x537   : > { %880 = vrot.lane.b32.xlu1 %v4904_v18, %s4591_s1 }
 0x53a   : > { %1145 = vrot.lane.b32.xlu0 %v4910_v22, %s4603_s27 }
 0x53b   : > { %882 = vrot.lane.b32.xlu1 %v4913_v23, %s4591_s1 }
 0x53e   : > { %1147 = vrot.lane.b32.xlu0 %v4919_v27, %s4603_s27 }
 0x53f   : > { %884 = vrot.lane.b32.xlu1 %v4922_v29, %s4591_s1 }
 0x542   : > { %1149 = vrot.lane.b32.xlu0 %v4928_v30, %s4603_s27 }
 0x543   : > { %886 = vrot.lane.b32.xlu1 %v4931_v31, %s4591_s1 }
 0x546   : > { %1151 = vrot.lane.b32.xlu0 %v4937_v32, %s4603_s27 }
 0x547   : > { %888 = vrot.lane.b32.xlu1 %v4940_v33, %s4591_s1 }
 0x54a   : > { %1153 = vrot.lane.b32.xlu0 %v4946_v34, %s4603_s27 }
 0x54b   : > { %890 = vrot.lane.b32.xlu1 %v4949_v36, %s4591_s1 }
 0x54e   : > { %1155 = vrot.lane.b32.xlu0 %v4955_v37, %s4603_s27 }
 0x54f   : > { %892 = vrot.lane.b32.xlu1 %v4958_v38, %s4591_s1 }
 0x5a0   : > { %v441_v40 = vpop.permute.xlu0 %440 }
 0x5a1   : > { %v437_v41 = vpop.permute.xlu1 %436 }
 0x5a2   : > { %v443_v43 = vsel %vm51_vm1, %v437_v41, %v320_v63 }
 0x5a3   : > { %v445_v44 = vsel %vm444_vm12, %v443_v43, %v441_v40 }
 0x5a4   : > { %3924 = vmatprep.subr.mxu0 %v445_v44  ;;  %3939 = vmatpush3.msra.mxu1 %v445_v44  ;;  %v1142_v45 = vpop.permute.xlu0 %1141 }
 0x5a5   : > { %3925 = vmatpush3.msra.mxu0 %v445_v44  ;;  %3941 = vmatmul.mubr.msk.f32.vlgmr.msra.gmra.mrb[0].mxu1 %vm51_vm1, %v4872_v50  ;;  %v879_v56 = vpop.permute.xlu1 %878 }
 0x5a6   : > { %3927 = vmatmul.mubr.msk.f32.vlgmr.msra.gmra.mrb[0].mxu0 %vm51_vm1, %v6217_v3 }
 0x5a7   : > { %3929 = vmatprep.mubr.msk.f32.mxu0 %vm51_vm1, %v6218_v4  ;;  %v5050_v4 = vrot.slane %v4876_v52, %v4776_v39 }
 0x5a9   : > { %v5054_v3 = vsub.f32 %v6210_v13, %v5050_v4 }
 0x5aa   : > { %3930 = vmatmul.mubr.msk.f32.gmra.mrb[2].mxu0 %vm51_vm1, %v6219_v5 }
 0x5ab   : > { %3932 = vmatprep.mubr.msk.f32.mxu0 %vm51_vm1, %v6220_v6 }
 0x5ae   : > { %3933 = vmatmul.mubr.msk.f32.gmra.mrb[4].mxu0 %vm51_vm1, %v6221_v9 }
 0x5af   : > { %3935 = vmatprep.mubr.msk.f32.mxu0 %vm51_vm1, %v6222_v10 }
 0x5b2   : > { %3936 = vmatmul.mubr.msk.f32.gmra.mrb[6].mxu0 %vm51_vm1, %v6223_v11 }
 0x678   : > { %v644_v46 = vpop.f32.mrb[0].mxu1 }
 0x679   : > { %v4982_v48 = vrot.slane %v644_v46, %v4776_v39  ;;  %v4985_v49 = vrot.slane %v644_v46, %v4789_v62  ;;  %v4988_v51 = vrot.slane %v644_v46, %v4802_v42  ;;  %v3928_v53 = vpop.f32.mrb[0].mxu0  ;;  %v3942_v55 = vpop.f32.mrb[1].mxu1 }
 0x67a   : > { %v536_v57 = vpop.f32.mrb[1].mxu0 }
 0x67b   : > { %v863_v58 = vsub.f32 %v3928_v53, %v4985_v49  ;;  %v1126_v59 = vsub.f32 %v3928_v53, %v4988_v51  ;;  %v862_v60 = vsub.f32 %v536_v57, %v4985_v49  ;;  %v1125_v61 = vsub.f32 %v536_v57, %v4988_v51 }
 0x67c   : > { %v666_v63 = vsub.f32 %v3928_v53, %v4982_v48  ;;  %v665_v40 = vsub.f32 %v536_v57, %v4982_v48  ;;  %v881_v57 = vpop.permute.xlu1 %880 }
 0x67d   : > { %v4996_v41 = vpop.f32.mrb[2].mxu0  ;;  %v1165_v43 = vmul.f32 %v1142_v45, %v1125_v61  ;;  %v902_v44 = vmul.f32 %v879_v56, %v862_v60  ;;  %v1144_v56 = vpop.permute.xlu0 %1143  ;;  %v903_v10 = vmul.f32 %v881_v57, %v863_v58 }
 0x67e   : > { %v865_v46 = vsub.f32 %v4996_v41, %v4985_v49  ;;  %v1128_v55 = vsub.f32 %v4996_v41, %v4988_v51  ;;  %v5002_v24 = vpop.f32.mrb[3].mxu0  ;;  %v1166_v61 = vmul.f32 %v1144_v56, %v1126_v59  ;;  %v668_v9 = vsub.f32 %v4996_v41, %v4982_v48 }
 0x67f   : > { %v864_v11 = vsub.f32 %v5002_v24, %v4985_v49  ;;  %v1127_v53 = vsub.f32 %v5002_v24, %v4988_v51  ;;  %1181 = vrot.lane.b32.xlu0 %v1165_v43, %s4604_s3  ;;  %918 = vrot.lane.b32.xlu1 %v902_v44, %s4602_s2  ;;  %v667_v45 = vsub.f32 %v5002_v24, %v4982_v48 }
 0x680   : > { %v674_v35 = vmul.f32 %v666_v63, %v5054_v3  ;;  %v883_v59 = vpop.permute.xlu1 %882 }
 0x681   : > { %v5012_v60 = vpop.f32.mrb[4].mxu0  ;;  %v1146_v28 = vpop.permute.xlu0 %1145 }
 0x682   : > { %v867_v6 = vsub.f32 %v5012_v60, %v4985_v49  ;;  %v1130_v43 = vsub.f32 %v5012_v60, %v4988_v51  ;;  %v5020_v5 = vpop.f32.mrb[5].mxu0  ;;  %v670_v24 = vsub.f32 %v5012_v60, %v4982_v48 }
 0x683   : > { %v866_v44 = vsub.f32 %v5020_v5, %v4985_v49  ;;  %1183 = vrot.lane.b32.xlu0 %v1166_v61, %s4604_s3  ;;  %920 = vrot.lane.b32.xlu1 %v903_v10, %s4602_s2 }
 0x684   : > { %v885_v52 = vpop.permute.xlu1 %884 }
 0x685   : > { %v5032_v41 = vpop.f32.mrb[6].mxu0  ;;  %v1148_v13 = vpop.permute.xlu0 %1147  ;;  %v905_v42 = vmul.f32 %v885_v52, %v865_v46  ;;  %v6224_v52 = vsub.f32 %v5020_v5, %v4988_v51 }
 0x686   : > { %v5034_v56 = vpop.f32.mrb[7].mxu0  ;;  %v1132_v57 = vsub.f32 %v5032_v41, %v4988_v51  ;;  %v869_v60 = vsub.f32 %v5032_v41, %v4985_v49  ;;  %v672_v58 = vsub.f32 %v5032_v41, %v4982_v48  ;;  %v5059_v41 = vsub.f32 %v6209_v12, %v5050_v4 }
 0x687   : > { %v868_v61 = vsub.f32 %v5034_v56, %v4985_v49  ;;  %v684_v49 = vsel %vm51_vm1, %v674_v35, 0.0  ;;  %v1168_v8 = vmul.f32 %v1148_v13, %v1128_v55  ;;  %v1167_v12 = vmul.f32 %v1146_v28, %v1127_v53 }
 0x688   : > { %v673_v10 = vmul.f32 %v665_v40, %v5059_v41  ;;  %v887_v47 = vpop.permute.xlu1 %886  ;;  %v904_v35 = vmul.f32 %v883_v59, %v864_v11  ;;  %v5074_v11 = vsub.f32 %v4718_v14, %v5050_v4  ;;  %v5080_v28 = vsub.f32 %v4722_v15, %v5050_v4 }
 0x689   : > { %v5085_v55 = vsub.f32 %v4737_v19, %v5050_v4 }
 0x68a   : > { %v681_v54 = vsel %vm51_vm1, %v673_v10, 0.0  ;;  %v676_v46 = vmul.f32 %v668_v9, %v5080_v28 }
 0x68c   : > { %v889_v63 = vpop.permute.xlu1 %888 }
 0x68d   : > { %v907_v10 = vmul.f32 %v889_v63, %v867_v6 }
 0x690   : > { %v891_v40 = vpop.permute.xlu1 %890 }
 0x6a2   : > { %685 = vadd.xlane.f32.xlu0 %v684_v49  ;;  %v893_v49 = vpop.permute.xlu1 %892 }
 0x6a3   : > { %v909_v13 = vmul.f32 %v893_v49, %v869_v60  ;;  %v5091_v60 = vsub.f32 %v4745_v21, %v5050_v4 }
 0x6a7   : > { %682 = vadd.xlane.f32.xlu1 %v681_v54  ;;  %v906_v54 = vmul.f32 %v887_v47, %v866_v44  ;;  %v690_v44 = vsel %vm51_vm1, %v676_v46, 0.0 }
 0x6b8   : > { %1187 = vrot.lane.b32.xlu0 %v1168_v8, %s4604_s3  ;;  %924 = vrot.lane.b32.xlu1 %v905_v42, %s4602_s2  ;;  %v908_v8 = vmul.f32 %v891_v40, %v868_v61  ;;  %v1150_v42 = vpop.permute.xlu0 %1149 }
 0x6b9   : > { %v1169_v63 = vmul.f32 %v1150_v42, %v6224_v52 }
 0x6bc   : > { %1185 = vrot.lane.b32.xlu0 %v1167_v12, %s4604_s3  ;;  %922 = vrot.lane.b32.xlu1 %v904_v35, %s4602_s2  ;;  %v675_v12 = vmul.f32 %v667_v45, %v5074_v11  ;;  %v1152_v47 = vpop.permute.xlu0 %1151  ;;  %v678_v45 = vmul.f32 %v670_v24, %v5085_v55  ;;  %v680_v35 = vmul.f32 %v672_v58, %v5091_v60 }
 0x6bd   : > { %v1170_v59 = vmul.f32 %v1152_v47, %v1130_v43  ;;  %v5106_v58 = vsub.f32 %v4726_v16, %v5050_v4 }
 0x6be   : > { %v687_v6 = vsel %vm51_vm1, %v675_v12, 0.0  ;;  %v696_v9 = vsel %vm51_vm1, %v678_v45, 0.0  ;;  %v702_v40 = vsel %vm51_vm1, %v680_v35, 0.0  ;;  %v6226_v12 = vsub.f32 %v5034_v56, %v4988_v51 }
 0x6bf   : > { %v6227_v51 = vsub.f32 %v5034_v56, %v4982_v48 }
 0x6c0   : > { %928 = vrot.lane.b32.xlu1 %v907_v10, %s4602_s2  ;;  %v1154_v53 = vpop.permute.xlu0 %1153 }
 0x6c4   : > { %926 = vrot.lane.b32.xlu1 %v906_v54, %s4602_s2  ;;  %v1156_v61 = vpop.permute.xlu0 %1155 }
 0x6c5   : > { %v1172_v24 = vmul.f32 %v1156_v61, %v1132_v57  ;;  %v6225_v57 = vsub.f32 %v5020_v5, %v4982_v48  ;;  %v5121_v61 = vsub.f32 %v4741_v20, %v5050_v4 }
 0x6c8   : > { %932 = vrot.lane.b32.xlu1 %v909_v13, %s4602_s2  ;;  %v677_v13 = vmul.f32 %v6225_v57, %v5106_v58 }
 0x6cc   : > { %930 = vrot.lane.b32.xlu1 %v908_v8, %s4602_s2  ;;  %v693_v8 = vsel %vm51_vm1, %v677_v13, 0.0 }
 0x6db   : > { %688 = vadd.xlane.f32.xlu0 %v687_v6  ;;  %v1171_v6 = vmul.f32 %v1154_v53, %v6226_v12  ;;  %v679_v53 = vmul.f32 %v6227_v51, %v5121_v61 }
 0x6f0   : > { %691 = vadd.xlane.f32.xlu1 %v690_v44 }
 0x6f1   : > { %1191 = vrot.lane.b32.xlu0 %v1170_v59, %s4604_s3  ;;  %v1182_v43 = vpop.permute.xlu0 %1181  ;;  %v919_v5 = vpop.permute.xlu1 %918 }
 0x6f2   : > { %v1205_v10 = vsel %vm51_vm1, %v1182_v43, 0.0  ;;  %v942_v35 = vsel %vm51_vm1, %v919_v5, 0.0 }
 0x6f4   : > { %697 = vadd.xlane.f32.xlu1 %v696_v9 }
 0x6f5   : > { %1189 = vrot.lane.b32.xlu0 %v1169_v63, %s4604_s3  ;;  %v1184_v54 = vpop.permute.xlu0 %1183  ;;  %v921_v45 = vpop.permute.xlu1 %920  ;;  %v699_v63 = vsel %vm51_vm1, %v679_v53, 0.0 }
 0x6f6   : > { %v1208_v49 = vsel %vm51_vm1, %v1184_v54, 0.0 }
 0x6f8   : > { %703 = vadd.xlane.f32.xlu1 %v702_v40 }
 0x6f9   : > { %1195 = vrot.lane.b32.xlu0 %v1172_v24, %s4604_s3  ;;  %v945_v24 = vsel %vm51_vm1, %v921_v45, 0.0 }
 0x6fc   : > { %1206 = vadd.xlane.f32.xlu1 %v1205_v10 }
 0x700   : > { %1209 = vadd.xlane.f32.xlu1 %v1208_v49 }
 0x718   : > { %694 = vadd.xlane.f32.xlu0 %v693_v8 }
 0x72e   : > { %1193 = vrot.lane.b32.xlu0 %v1171_v6, %s4604_s3 }
 0x72f   : > { %v686_v42 = vpop.xlane.xlu0 %685 }
 0x730   : > { %v706_v51 = vmul.f32 %v686_v42, %v5054_v3  ;;  %v4134_v42 = vpack.c.bf16 %v4904_v18, %v4895_v1 }
 0x732   : > { %4135 = vmatprep.subr.bf16.mxu1 %v4134_v42 }
 0x733   : > { %v1188_v47 = vpop.permute.xlu0 %1187  ;;  %4137 = vmatpush3.bf16.msra.mxu1 %v4134_v42 }
 0x734   : > { %v1214_v46 = vsel %vm51_vm1, %v1188_v47, 0.0  ;;  %v683_v9 = vpop.xlane.xlu1 %682 }
 0x735   : > { %1215 = vadd.xlane.f32.xlu1 %v1214_v46  ;;  %v705_v45 = vmul.f32 %v683_v9, %v5059_v41 }
 0x737   : > { %v1186_v44 = vpop.permute.xlu0 %1185 }
 0x738   : > { %v1211_v59 = vsel %vm51_vm1, %v1186_v44, 0.0  ;;  %v925_v52 = vpop.permute.xlu1 %924 }
 0x739   : > { %1212 = vadd.xlane.f32.xlu1 %v1211_v59  ;;  %v951_v4 = vsel %vm51_vm1, %v925_v52, 0.0 }
 0x73c   : > { %v923_v43 = vpop.permute.xlu1 %922 }
 0x73d   : > { %v948_v10 = vsel %vm51_vm1, %v923_v43, 0.0 }
 0x740   : > { %v929_v40 = vpop.permute.xlu1 %928 }
 0x741   : > { %v957_v48 = vsel %vm51_vm1, %v929_v40, 0.0 }
 0x744   : > { %v927_v54 = vpop.permute.xlu1 %926 }
 0x745   : > { %v954_v49 = vsel %vm51_vm1, %v927_v54, 0.0  ;;  %v4138_v54 = vpack.c.bf16 %v4922_v29, %v4913_v23 }
 0x747   : > { %4139 = vmatprep.subr.bf16.mxu1 %v4138_v54 }
 0x748   : > { %v933_v56 = vpop.permute.xlu1 %932  ;;  %4141 = vmatpush3.bf16.msra.mxu1 %v4138_v54 }
 0x749   : > { %v963_v13 = vsel %vm51_vm1, %v933_v56, 0.0  ;;  %v4142_v56 = vpack.c.bf16 %v4940_v33, %v4931_v31 }
 0x74b   : > { %4143 = vmatprep.subr.bf16.mxu1 %v4142_v56 }
 0x74c   : > { %v931_v8 = vpop.permute.xlu1 %930  ;;  %4145 = vmatpush3.bf16.msra.mxu1 %v4142_v56  ;;  %v4158_v56 = vpack.c.bf16 %v4937_v32, %v4928_v30 }
 0x74d   : > { %700 = vadd.xlane.f32.xlu0 %v699_v63  ;;  %v960_v6 = vsel %vm51_vm1, %v931_v8, 0.0 }
 0x751   : > { %943 = vadd.xlane.f32.xlu0 %v942_v35 }
 0x755   : > { %946 = vadd.xlane.f32.xlu0 %v945_v24 }
 0x759   : > { %952 = vadd.xlane.f32.xlu0 %v951_v4 }
 0x75d   : > { %949 = vadd.xlane.f32.xlu0 %v948_v10  ;;  %v4118_v10 = vpack.c.bf16 %v5054_v3, %v5059_v41 }
 0x75f   : > { %4119 = vmatprep.subr.bf16.mxu0 %v4118_v10 }
 0x760   : > { %4121 = vmatpush3.bf16.msra.mxu0 %v4118_v10 }
 0x761   : > { %958 = vadd.xlane.f32.xlu0 %v957_v48  ;;  %v4122_v48 = vpack.c.bf16 %v5080_v28, %v5074_v11 }
 0x763   : > { %4123 = vmatprep.subr.bf16.mxu0 %v4122_v48 }
 0x764   : > { %4125 = vmatpush3.bf16.msra.mxu0 %v4122_v48 }
 0x765   : > { %955 = vadd.xlane.f32.xlu0 %v954_v49 }
 0x768   : > { %v689_v57 = vpop.xlane.xlu0 %688 }
 0x769   : > { %964 = vadd.xlane.f32.xlu0 %v963_v13  ;;  %v707_v53 = vmul.f32 %v689_v57, %v5074_v11 }
 0x76c   : > { %v1192_v12 = vpop.permute.xlu0 %1191 }
 0x76d   : > { %961 = vadd.xlane.f32.xlu0 %v960_v6  ;;  %v1220_v47 = vsel %vm51_vm1, %v1192_v12, 0.0 }
 0x76e   : > { %1221 = vadd.xlane.f32.xlu1 %v1220_v47 }
 0x770   : > { %v1190_v46 = vpop.permute.xlu0 %1189 }
 0x771   : > { %v1217_v44 = vsel %vm51_vm1, %v1190_v46, 0.0 }
 0x772   : > { %1218 = vadd.xlane.f32.xlu1 %v1217_v44  ;;  %v4126_v44 = vpack.c.bf16 %v5085_v55, %v5106_v58 }
 0x774   : > { %v1196_v59 = vpop.permute.xlu0 %1195  ;;  %4127 = vmatprep.subr.bf16.mxu0 %v4126_v44 }
 0x775   : > { %v1226_v5 = vsel %vm51_vm1, %v1196_v59, 0.0  ;;  %v4146_v59 = vpack.c.bf16 %v4958_v38, %v4949_v36  ;;  %4129 = vmatpush3.bf16.msra.mxu0 %v4126_v44 }
 0x776   : > { %1227 = vadd.xlane.f32.xlu1 %v1226_v5 }
 0x777   : > { %4147 = vmatprep.subr.bf16.mxu1 %v4146_v59 }
 0x778   : > { %4149 = vmatpush3.bf16.msra.mxu1 %v4146_v59 }
 0x77d   : > { %v692_v52 = vpop.xlane.xlu1 %691 }
 0x77e   : > { %v708_v63 = vmul.f32 %v692_v52, %v5080_v28 }
 0x781   : > { %v698_v24 = vpop.xlane.xlu1 %697 }
 0x782   : > { %v710_v9 = vmul.f32 %v698_v24, %v5085_v55 }
 0x785   : > { %v704_v3 = vpop.xlane.xlu1 %703 }
 0x786   : > { %v712_v13 = vmul.f32 %v704_v3, %v5091_v60  ;;  %v4162_v3 = vpack.c.bf16 %v4955_v37, %v4946_v34 }
 0x789   : > { %v1207_v41 = vpop.xlane.xlu1 %1206 }
 0x78a   : > { %v1229_v47 = vmul.f32 %v1207_v41, %v4892_v0 }
 0x78d   : > { %v1210_v11 = vpop.xlane.xlu1 %1209 }
 0x79a   : > { %713 = vxpose.xlu0.b32.start [1/8] (short) (narrow) %v705_v45, 16  ;;  %v1230_v45 = vmul.f32 %v1210_v11, %v4901_v17 }
 0x79e   : > { %714 = vxpose.xlu0.b32.cont [2/8] (short) (narrow) %v706_v51, 16 }
 0x7a2   : > { %715 = vxpose.xlu0.b32.cont [3/8] (short) (narrow) %v707_v53, 16  ;;  %v4150_v53 = vpack.c.bf16 %v4901_v17, %v4892_v0 }
 0x7a5   : > { %v695_v35 = vpop.xlane.xlu0 %694 }
 0x7a6   : > { %716 = vxpose.xlu0.b32.cont [4/8] (short) (narrow) %v708_v63, 16  ;;  %v709_v43 = vmul.f32 %v695_v35, %v5106_v58 }
 0x7a9   : > { %v1194_v40 = vpop.permute.xlu0 %1193 }
 0x7aa   : > { %717 = vxpose.xlu0.b32.cont [5/8] (short) (narrow) %v709_v43, 16  ;;  %v1223_v4 = vsel %vm51_vm1, %v1194_v40, 0.0 }
 0x7ab   : > { %1224 = vadd.xlane.f32.xlu1 %v1223_v4 }
 0x7ae   : > { %718 = vxpose.xlu0.b32.cont [6/8] (short) (narrow) %v710_v9, 16 }
 0x7c2   : > { %v1216_v12 = vpop.xlane.xlu1 %1215 }
 0x7c3   : > { %v1232_v63 = vmul.f32 %v1216_v12, %v4919_v27 }
 0x7da   : > { %v701_v49 = vpop.xlane.xlu0 %700 }
 0x7db   : > { %v711_v57 = vmul.f32 %v701_v49, %v5121_v61 }
 0x7dd   : > { %719 = vxpose.xlu0.b32.cont [7/8] (short) (narrow) %v711_v57, 16 }
 0x7de   : > { %v944_v28 = vpop.xlane.xlu0 %943 }
 0x7df   : > { %v966_v8 = vmul.f32 %v944_v28, %v4895_v1  ;;  %v1213_v1 = vpop.xlane.xlu1 %1212 }
 0x7e0   : > { %v1231_v55 = vmul.f32 %v1213_v1, %v4910_v22 }
 0x7e1   : > { %974 = vxpose.xlu1.b32.start [1/8] (short) (narrow) %v966_v8, 16  ;;  %720 = vxpose.xlu0.b32.end [8/8] (short) (narrow) %v712_v13, 16 }
 0x7e2   : > { %v947_v6 = vpop.xlane.xlu0 %946 }
 0x7e3   : > { %v967_v46 = vmul.f32 %v947_v6, %v4904_v18  ;;  %v4130_v18 = vpack.c.bf16 %v5091_v60, %v5121_v61 }
 0x7e5   : > { %975 = vxpose.xlu1.b32.cont [2/8] (short) (narrow) %v967_v46, 16  ;;  %1237 = vxpose.xlu0.b32.start [1/8] (short) (narrow) %v1229_v47, 16 }
 0x7e6   : > { %v953_v5 = vpop.xlane.xlu0 %952  ;;  %4131 = vmatprep.subr.bf16.mxu0 %v4130_v18 }
 0x7e7   : > { %4133 = vmatpush3.bf16.msra.mxu0 %v4130_v18  ;;  %v969_v35 = vmul.f32 %v953_v5, %v4922_v29 }
 0x7e8   : > { %4151 = vmatprep.subr.bf16.mxu0 %v4150_v53 }
 0x7e9   : > { %1238 = vxpose.xlu0.b32.cont [2/8] (short) (narrow) %v1230_v45, 16 }
 0x7ea   : > { %v950_v51 = vpop.xlane.xlu0 %949 }
 0x7eb   : > { %v968_v58 = vmul.f32 %v950_v51, %v4913_v23 }
 0x7ed   : > { %976 = vxpose.xlu1.b32.cont [3/8] (short) (narrow) %v968_v58, 16  ;;  %1239 = vxpose.xlu0.b32.cont [3/8] (short) (narrow) %v1231_v55, 16  ;;  %v1373_v58 = vld [vmem:[#allocation2] sm:$0x7] }
 0x7ee   : > { %v959_v52 = vpop.xlane.xlu0 %958 }
 0x7ef   : > { %v971_v17 = vmul.f32 %v959_v52, %v4940_v33 }
 0x7f1   : > { %977 = vxpose.xlu1.b32.cont [4/8] (short) (narrow) %v969_v35, 16  ;;  %1240 = vxpose.xlu0.b32.cont [4/8] (short) (narrow) %v1232_v63, 16 }
 0x7f2   : > { %v956_v60 = vpop.xlane.xlu0 %955 }
 0x7f3   : > { %v970_v61 = vmul.f32 %v956_v60, %v4931_v31  ;;  %v4605_v31 = vmov 8  }
 0x7f5   : > { %978 = vxpose.xlu1.b32.cont [5/8] (short) (narrow) %v970_v61, 16 }
 0x7f6   : > { %v965_v0 = vpop.xlane.xlu0 %964 }
 0x7f7   : > { %v973_v40 = vmul.f32 %v965_v0, %v4958_v38  ;;  %v4154_v38 = vpack.c.bf16 %v4919_v27, %v4910_v22 }
 0x7f9   : > { %979 = vxpose.xlu1.b32.cont [6/8] (short) (narrow) %v971_v17, 16 }
 0x7fa   : > { %v962_v23 = vpop.xlane.xlu0 %961 }
 0x7fb   : > { %v972_v43 = vmul.f32 %v962_v23, %v4949_v36  ;;  %v1222_v24 = vpop.xlane.xlu1 %1221 }
 0x7fc   : > { %v1234_v9 = vmul.f32 %v1222_v24, %v4937_v32 }
 0x7fd   : > { %980 = vxpose.xlu1.b32.cont [7/8] (short) (narrow) %v972_v43, 16 }
 0x7ff   : > { %v1219_v4 = vpop.xlane.xlu1 %1218 }
 0x800   : > { %v1233_v29 = vmul.f32 %v1219_v4, %v4928_v30 }
 0x801   : > { %981 = vxpose.xlu1.b32.end [8/8] (short) (narrow) %v973_v40, 16 }
 0x802   : > { %1241 = vxpose.xlu0.b32.cont [5/8] (short) (narrow) %v1233_v29, 16 }
 0x803   : > { %v1228_v42 = vpop.xlane.xlu1 %1227 }
 0x804   : > { %v1236_v36 = vmul.f32 %v1228_v42, %v4955_v37 }
 0x806   : > { %1242 = vxpose.xlu0.b32.cont [6/8] (short) (narrow) %v1234_v9, 16 }
 0x81f   : > { %4287 = vset.pattern.permute.xlu1 %v4605_v31 }
 0x838   : > { %v1225_v33 = vpop.xlane.xlu1 %1224 }
 0x839   : > { %v1235_v10 = vmul.f32 %v1225_v33, %v4946_v34 }
 0x83b   : > { %1243 = vxpose.xlu0.b32.cont [7/8] (short) (narrow) %v1235_v10, 16 }
 0x83f   : > { %1244 = vxpose.xlu0.b32.end [8/8] (short) (narrow) %v1236_v36, 16 }
 0x845   : > { %v729_v54 = vpop.trf.xlu0 }
 0x846   : > { %3959 = vmatprep.mubr.msk.f32.mxu0 %vm745_vm13, %v729_v54 }
 0x849   : > { %v730_v48 = vpop.trf.xlu0 }
 0x84a   : > { %3960 = vmatmul.mubr.msk.f32.vlgmr.msra.gmra.mrb[8].mxu0 %vm745_vm13, %v730_v48 }
 0x84b   : > { %4153 = vmatpush3.bf16.msra.mxu0 %v4150_v53 }
 0x84c   : > { %4155 = vmatprep.subr.bf16.mxu0 %v4154_v38 }
 0x84f   : > { %4157 = vmatpush3.bf16.msra.mxu0 %v4154_v38 }
 0x850   : > { %4159 = vmatprep.subr.bf16.mxu0 %v4158_v56 }
 0x853   : > { %4161 = vmatpush3.bf16.msra.mxu0 %v4158_v56 }
 0x854   : > { %4163 = vmatprep.subr.bf16.mxu0 %v4162_v3 }
 0x857   : > { %4165 = vmatpush3.bf16.msra.mxu0 %v4162_v3 }
 0x865   : > { %v990_v41 = vpop.trf.xlu1 }
 0x866   : > { %3978 = vmatprep.mubr.msk.f32.mxu1 %vm745_vm13, %v990_v41 }
 0x868   : > { %4288 = vset.pattern.permute.xlu0 %v4605_v31 }
 0x869   : > { %v991_v22 = vpop.trf.xlu1 }
 0x86a   : > { %3979 = vmatmul.mubr.msk.f32.vlgmr.msra.gmra.mrb[2].mxu1 %vm745_vm13, %v991_v22 }
 0x8a3   : > { %v1253_v27 = vpop.trf.xlu0 }
 0x8a4   : > { %3997 = vmatprep.mubr.msk.f32.mxu0 %vm745_vm13, %v1253_v27 }
 0x8a7   : > { %v1254_v49 = vpop.trf.xlu0 }
 0x8a8   : > { %3998 = vmatmul.mubr.msk.f32.vlgmr.msra.gmra.mrb[10].mxu0 %vm745_vm13, %v1254_v49 }
 0x91d   : > { %v3961_v30 = vpop.f32.mrb[8].mxu0 }
 0x91e   : > { %v818_v32 = vpop.f32.mrb[9].mxu0 }
 0x93d   : > { %v3980_v57 = vpop.f32.mrb[2].mxu1 }
 0x93e   : > { %1089 = vperm.xlu1 %4287, %v3980_v57   ;;  %v1078_v34 = vpop.f32.mrb[3].mxu1 }
 0x942   : > { %829 = vperm.xlu1 %4287, %v3961_v30  }
 0x97b   : > { %v3999_v37 = vpop.f32.mrb[10].mxu0 }
 0x97c   : > { %1352 = vperm.xlu0 %4288, %v3999_v37   ;;  %v5194_v11 = vpop.f32.mrb[11].mxu0 }
 0x980   : > { %835 = vrot.lane.b32.xlu0 %v3961_v30, %s4602_s2 }
 0x984   : > { %1098 = vrot.lane.b32.xlu0 %v3980_v57, %s4602_s2 }
 0x9bd   : > { %v1090_v28 = vpop.permute.xlu1 %1089 }
 0x9be   : > { %4337 = vrcp.f32 %v1090_v28 }
 0x9c1   : > { %v830_v13 = vpop.permute.xlu1 %829 }
 0x9c2   : > { %4339 = vrcp.f32 %v830_v13 }
 0x9c8   : > { %v4338_v8 = vpop.eup %4337 }
 0x9c9   : > { %v1093_v12 = vmul.f32 %v4338_v8, %v3980_v57 }
 0x9cb   : > { %v1095_v6 = vrot.slane %v1093_v12, 7 }
 0x9cc   : > { %v4340_v47 = vpop.eup %4339 }
 0x9cd   : > { %v1097_v46 = vadd.f32 %v1095_v6, %v4872_v50  ;;  %v833_v44 = vmul.f32 %v4340_v47, %v3961_v30 }
 0x9cf   : > { %1107 = vst.msk [vmem:[#allocation7] sm:$0x2] %vm1106_vm14, %v1097_v46  ;;  %v834_v59 = vadd.f32 %v833_v44, %v4872_v50 }
 0x9d1   : > { %844 = vst.msk [vmem:[#allocation7] sm:$0x1] %vm843_vm15, %v834_v59 }
 0x9fb   : > { %v1353_v5 = vpop.permute.xlu0 %1352 }
 0x9fc   : > { %4341 = vrcp.f32 %v1353_v5 }
 0x9ff   : > { %v836_v45 = vpop.permute.xlu0 %835 }
 0xa00   : > { %4214 = vpush %v836_v45 }
 0xa03   : > { %v1099_v1 = vpop.permute.xlu0 %1098 }
 0xa04   : > { %4216 = vpush %v1099_v1 }
 0xa06   : > { %v4342_v18 = vpop.eup %4341 }
 0xa07   : > { %v1356_v51 = vmul.f32 %v4342_v18, %v3999_v37 }
 0xa09   : > { %v1358_v53 = vrot.slane %v1356_v51, 6 }
 0xa0b   : > { %v1360_v55 = vadd.f32 %v1358_v53, %v4872_v50 }
 0xa0d   : > { %1370 = vst.msk [vmem:[#allocation7] sm:$0x4] %vm1369_vm2, %v1360_v55 }
 0xa14   : > { %v1372_v52 = vld [vmem:[#allocation7] sm:$0x7] }
 0xa15   : > { %v1374_v63 = vsub.f32 %v1372_v52, %v1373_v58  ;;  %1388 = vst.msk [vmem:[#allocation2] sm:$0x7] %vm61_vm0, %v1372_v52 }
 0xa17   : > { %v1375_v35 = vmul.f32 %v1374_v63, %v1374_v63 }
 0xa19   : > { %v1376_v60 = vsel %vm61_vm0, %v1375_v35, 0.0 }
 0xa1a   : > { %1377 = vadd.xlane.f32.xlu1 %v1376_v60 }
 0xa2b   : > { %1361 = vrot.lane.b32.xlu1 %v3999_v37, %s4602_s2 }
 0xa31   : > { %s4215_s28 = spop %4214 }
 0xa32   : > { %v838_v61 = vstv %s4215_s28 }
 0xa33   : > { %4343 = vrcp.f32 %v838_v61 }
 0xa35   : > { %s4217_s29 = spop %4216 }
 0xa36   : > { %v1101_v0 = vstv %s4217_s29 }
 0xa37   : > { %4345 = vrcp.f32 %v1101_v0 }
 0xa3d   : > { %v4344_v50 = vpop.eup %4343 }
 0xa3e   : > { %v841_v17 = vmul.f32 %v4344_v50, %v818_v32 }
 0xa40   : > { %v842_v23 = vadd.f32 %v841_v17, %v4761_v26 }
 0xa41   : > { %v4346_v43 = vpop.eup %4345 }
 0xa42   : > { %845 = vst.msk [vmem:[#allocation9] sm:$0xff] %vm51_vm1, %v842_v23  ;;  %v1104_v24 = vmul.f32 %v4346_v43, %v1078_v34 }
 0xa44   : > { %v1105_v40 = vadd.f32 %v1104_v24, %v4761_v26 }
 0xa46   : > { %1108 = vst.msk [vmem:[#allocation9 + $0x8] sm:$0xff] %vm51_vm1, %v1105_v40 }
 0xaa7   : > { %v1378_v4 = vpop.xlane.xlu1 %1377 }
 0xaa8   : > { %v1379_v29 = vrot.slane %v1378_v4, 4 }
 0xaaa   : > { %v1380_v9 = vadd.f32 %v1379_v29, %v1378_v4 }
 0xaab   : > { %v1362_v31 = vpop.permute.xlu1 %1361 }
 0xaac   : > { %v1381_v42 = vrot.slane %v1380_v9, 2  ;;  %4218 = vpush %v1362_v31 }
 0xaae   : > { %v1382_v33 = vadd.f32 %v1381_v42, %v1380_v9 }
 0xab0   : > { %v1383_v10 = vrot.slane %v1382_v33, 1 }
 0xab2   : > { %v1384_v36 = vadd.f32 %v1383_v10, %v1382_v33 }
 0xab4   : > { %4220 = vpush %v1384_v36 }
 0xadd   : > { %s4219_s30 = spop %4218 }
 0xade   : > { %v1364_v54 = vstv %s4219_s30 }
 0xadf   : > { %4347 = vrcp.f32 %v1364_v54 }
 0xae5   : > { %s4221_s7 = spop %4220 }
 0xae6   : > { %p1386_p5 = scmp.le.f32.partialorder %s4221_s7, 1.0000001e-06 }
 0xae8   : > { %s1387_s8 = scalar_select %p1386_p5, 1, 0 }
 0xae9   : > { %v4348_v38 = vpop.eup %4347 }
 0xaea   : > { %v1367_v48 = vmul.f32 %v4348_v38, %v5194_v11  ;;  %p74_p6 = scmp.eq.s32.totalorder %s1387_s8, 0 }
 0xaec   : > { %v1368_v56 = vadd.f32 %v1367_v48, %v4761_v26  ;;  %p76_p8 = pnand %p75_p7, %p74_p6 }
 0xaed   :  { %v6228_v3 = vmov (%p76_p8), 0.0   ;;  %4002 = vmatprep.mubr.msk.f32.mxu0 (%p76_p8), %vm51_vm1, %v4668_v2  ;;  %s4606_s9 = smov (%p76_p8), 8   ;;  %v6192_v41 = vmov (%p76_p8), 0   ;;  %v1391_v27 = vld [vmem:[#allocation9] sm:$0xff] (%p76_p8)  ;;  %v1517_v57 = vld [vmem:[#allocation9 + $0x8] sm:$0xff] (%p76_p8)  ;;  %v6189_v34 = vmov (%p76_p8), 1  }
 0xaee   : > { %1371 = vst.msk [vmem:[#allocation9 + $0x10] sm:$0xff] %vm51_vm1, %v1368_v56  ;;  %79 = sbr.rel (!%p76_p8) target bundleno = 25 (0x19), region = 63  ;;  %4014 = vmatprep.subr.mxu1 (%p76_p8), %v6228_v3  ;;  %1393 = vrot.lane.b32.xlu0 (%p76_p8), %v4756_v25, %s4606_s9  ;;  %v6190_v35 = vmov (%p76_p8), 2   ;;  %vm4615_vm0 = vmmov (%p76_p8), 0   ;;  %s4616_s10 = smov (%p76_p8), 120  }
 0xaef   :  { %4350 = vset.pattern.permute.xlu1 (%p76_p8), %v6192_v41  ;;  %4349 = vset.pattern.permute.xlu0 (%p76_p8), %v6192_v41  ;;  %s4617_s11 = smov (%p76_p8), 16   ;;  %s4618_s12 = smov (%p76_p8), 112  }
 0xaf0   :  { %4016 = vmatprep.mubr.msk.f32.mxu1 (%p76_p8), %vm4615_vm0, %v6228_v3  ;;  %s4620_s16 = smov (%p76_p8), [#allocation7]  }
 0xaf1   :  { %s3722_s17 = sshll.u32 (%p76_p8), %s4620_s16, 4  ;;  %s3723_s17 = int_to_ptr.vmem [resolvable:$true] %s3722_s17 }
 0xaf2   :  { %s4509_s18 = scalar_lea.vmem (%p76_p8), %s3723_s17, 64  ;;  %p4514_p10 = scmp.lt.s32.totalorder (%p76_p8), %s3723_s17, %s3723_s17 }
 0xaf3   :  { %p4510_p9 = scmp.ne.s32.totalorder (%p76_p8), %s3723_s17, %s4509_s18  ;;  %p4515_p11 = scmp.lt.s32.totalorder (%p76_p8), %s4509_s18, %s4509_s18 }
 0xaf5   :  { %v1631_v22 = vld [vmem:[#allocation9 + $0x10] sm:$0xff]  ;;  %p4516_p12 = por %p4515_p11, %p4514_p10 }
 0xaf7   :  { %p4517_p13 = pnand %p4516_p12, %p4510_p9 }
 0xb60   :  { %v5224_v49 = vpop.permute.xlu0 %1393 }
 0xb61   :  { %v1632_v30 = vsel %vm51_vm1, %v1631_v22, %v5224_v49  ;;  %v1396_v32 = vsel %vm51_vm1, %v1391_v27, %v5224_v49  ;;  %v1518_v25 = vsel %vm51_vm1, %v1517_v57, %v5224_v49  ;;  %v6187_v22 = vmov 3  }
 0xb62   :  { %1635 = vperm.xlu1 %4350, %v1632_v30   ;;  %1399 = vperm.xlu0 %4349, %v1396_v32  }
 0xb66   :  { %1521 = vperm.xlu1 %4350, %v1518_v25   ;;  %4352 = vset.pattern.permute.xlu0 %v6189_v34 }
 0xb6a   :  { %4351 = vset.pattern.permute.xlu1 %v6189_v34 }
 0xbe1   :  { %v1636_v37 = vpop.permute.xlu1 %1635  ;;  %v1400_v11 = vpop.permute.xlu0 %1399 }
 0xbe2   :  { %4382 = vrcp.f32 %v1636_v37 }
 0xbe3   :  { %4384 = vrcp.f32 %v1400_v11 }
 0xbe5   :  { %v1522_v28 = vpop.permute.xlu1 %1521 }
 0xbe6   :  { %4386 = vrcp.f32 %v1522_v28 }
 0xbec   :  { %v4383_v13 = vpop.eup %4382 }
 0xbed   :  { %v4385_v8 = vpop.eup %4384  ;;  %v1639_v12 = vmul.f32 %v4383_v13, %v1632_v30 }
 0xbee   :  { %v1403_v6 = vmul.f32 %v4385_v8, %v1396_v32 }
 0xbef   :  { %v1643_v47 = vrot.slane %v1639_v12, %v4776_v39 }
 0xbf0   :  { %v4387_v46 = vpop.eup %4386  ;;  %v1408_v44 = vrot.slane %v1403_v6, %v4776_v39 }
 0xbf1   :  { %v1644_v59 = vmul.f32 %v1643_v47, %v1636_v37  ;;  %v1525_v5 = vmul.f32 %v4387_v46, %v1518_v25 }
 0xbf2   :  { %v1409_v45 = vmul.f32 %v1408_v44, %v1400_v11 }
 0xbf3   :  { %v1529_v1 = vrot.slane %v1525_v5, %v4776_v39  ;;  %v1645_v18 = vsub.f32 %v1632_v30, %v1644_v59 }
 0xbf4   :  { %v1410_v51 = vsub.f32 %v1396_v32, %v1409_v45 }
 0xbf5   :  { %v1530_v53 = vmul.f32 %v1529_v1, %v1522_v28  ;;  %v1646_v55 = vsel %vm94_vm3, %v1643_v47, %v1645_v18  ;;  %v6229_v28 = vld [vmem:[#allocation23_spill] sm:$0xff] }
 0xbf6   :  { %1649 = vperm.xlu0 %4352, %v1646_v55   ;;  %v1411_v58 = vsel %vm94_vm3, %v1408_v44, %v1410_v51 }
 0xbf7   :  { %1414 = vperm.xlu1 %4351, %v1411_v58   ;;  %v1531_v52 = vsub.f32 %v1518_v25, %v1530_v53 }
 0xbf9   :  { %v1532_v63 = vsel %vm94_vm3, %v1529_v1, %v1531_v52 }
 0xbfa   :  { %4354 = vset.pattern.permute.xlu0 %v6190_v35 }
 0xbfb   :  { %1535 = vperm.xlu1 %4351, %v1532_v63  }
 0xbff   :  { %4353 = vset.pattern.permute.xlu1 %v6190_v35 }
 0xc75   :  { %v1650_v60 = vpop.permute.xlu0 %1649 }
 0xc76   :  { %v1415_v61 = vpop.permute.xlu1 %1414  ;;  %4388 = vrcp.f32 %v1650_v60 }
 0xc77   :  { %4390 = vrcp.f32 %v1415_v61 }
 0xc7a   :  { %v1536_v0 = vpop.permute.xlu1 %1535 }
 0xc7b   :  { %4392 = vrcp.f32 %v1536_v0 }
 0xc80   :  { %v4389_v50 = vpop.eup %4388 }
 0xc81   :  { %v4391_v17 = vpop.eup %4390  ;;  %v1653_v23 = vmul.f32 %v4389_v50, %v1646_v55 }
 0xc82   :  { %v1418_v43 = vmul.f32 %v4391_v17, %v1411_v58  ;;  %v6230_v17 = vld [vmem:[#allocation24_spill] sm:$0xff] }
 0xc83   :  { %v1657_v24 = vrot.slane %v1653_v23, %v4789_v62 }
 0xc84   :  { %v1423_v40 = vrot.slane %v1418_v43, %v4789_v62 }
 0xc85   :  { %v4393_v4 = vpop.eup %4392  ;;  %v1658_v29 = vmul.f32 %v1657_v24, %v1650_v60 }
 0xc86   :  { %v1424_v9 = vmul.f32 %v1423_v40, %v1415_v61  ;;  %v1539_v31 = vmul.f32 %v4393_v4, %v1532_v63 }
 0xc87   :  { %v1659_v42 = vsub.f32 %v1646_v55, %v1658_v29  ;;  %v6185_v55 = vmov 4  }
 0xc88   :  { %v1543_v33 = vrot.slane %v1539_v31, %v4789_v62  ;;  %v1425_v10 = vsub.f32 %v1411_v58, %v1424_v9 }
 0xc89   :  { %v1660_v36 = vsel %vm109_vm4, %v1657_v24, %v1659_v42 }
 0xc8a   :  { %v1544_v54 = vmul.f32 %v1543_v33, %v1536_v0  ;;  %v1426_v38 = vsel %vm109_vm4, %v1423_v40, %v1425_v10  ;;  %1663 = vperm.xlu0 %4354, %v1660_v36  }
 0xc8b   :  { %1429 = vperm.xlu1 %4353, %v1426_v38  }
 0xc8c   :  { %v1545_v48 = vsub.f32 %v1532_v63, %v1544_v54 }
 0xc8e   :  { %v1546_v56 = vsel %vm109_vm4, %v1543_v33, %v1545_v48  ;;  %4356 = vset.pattern.permute.xlu0 %v6187_v22  ;;  %v6183_v48 = vmov 5  }
 0xc8f   :  { %1549 = vperm.xlu1 %4353, %v1546_v56  }
 0xc93   :  { %4355 = vset.pattern.permute.xlu1 %v6187_v22 }
 0xd09   :  { %v1664_v27 = vpop.permute.xlu0 %1663 }
 0xd0a   :  { %v1430_v30 = vpop.permute.xlu1 %1429  ;;  %4394 = vrcp.f32 %v1664_v27 }
 0xd0b   :  { %4396 = vrcp.f32 %v1430_v30 }
 0xd0e   :  { %v1550_v32 = vpop.permute.xlu1 %1549 }
 0xd0f   :  { %4398 = vrcp.f32 %v1550_v32 }
 0xd14   :  { %v4395_v57 = vpop.eup %4394 }
 0xd15   :  { %v4397_v25 = vpop.eup %4396  ;;  %v1667_v37 = vmul.f32 %v4395_v57, %v1660_v36 }
 0xd16   :  { %v1433_v11 = vmul.f32 %v4397_v25, %v1426_v38 }
 0xd17   :  { %v1671_v13 = vrot.slane %v1667_v37, %v6229_v28 }
 0xd18   :  { %v1438_v8 = vrot.slane %v1433_v11, %v6229_v28  ;;  %v6231_v11 = vld [vmem:[#allocation25_spill] sm:$0xff] }
 0xd19   :  { %v4399_v12 = vpop.eup %4398  ;;  %v1672_v6 = vmul.f32 %v1671_v13, %v1664_v27 }
 0xd1a   :  { %v1439_v47 = vmul.f32 %v1438_v8, %v1430_v30  ;;  %v1553_v46 = vmul.f32 %v4399_v12, %v1546_v56 }
 0xd1b   :  { %v1673_v44 = vsub.f32 %v1660_v36, %v1672_v6 }
 0xd1c   :  { %v1557_v59 = vrot.slane %v1553_v46, %v6229_v28  ;;  %v1440_v5 = vsub.f32 %v1426_v38, %v1439_v47 }
 0xd1d   :  { %v1674_v45 = vsel %vm124_vm5, %v1671_v13, %v1673_v44 }
 0xd1e   :  { %v1558_v1 = vmul.f32 %v1557_v59, %v1550_v32  ;;  %v1441_v18 = vsel %vm124_vm5, %v1438_v8, %v1440_v5  ;;  %1677 = vperm.xlu0 %4356, %v1674_v45  }
 0xd1f   :  { %1444 = vperm.xlu1 %4355, %v1441_v18  }
 0xd20   :  { %v1559_v51 = vsub.f32 %v1546_v56, %v1558_v1 }
 0xd22   :  { %v1560_v53 = vsel %vm124_vm5, %v1557_v59, %v1559_v51  ;;  %4358 = vset.pattern.permute.xlu0 %v6185_v55 }
 0xd23   :  { %1563 = vperm.xlu1 %4355, %v1560_v53  }
 0xd27   :  { %4357 = vset.pattern.permute.xlu1 %v6185_v55 }
 0xd9d   :  { %v1678_v58 = vpop.permute.xlu0 %1677 }
 0xd9e   :  { %v1445_v52 = vpop.permute.xlu1 %1444  ;;  %4400 = vrcp.f32 %v1678_v58 }
 0xd9f   :  { %4402 = vrcp.f32 %v1445_v52 }
 0xda2   :  { %v1564_v63 = vpop.permute.xlu1 %1563 }
 0xda3   :  { %4404 = vrcp.f32 %v1564_v63 }
 0xda8   :  { %v4401_v60 = vpop.eup %4400 }
 0xda9   :  { %v4403_v61 = vpop.eup %4402  ;;  %v1681_v0 = vmul.f32 %v4401_v60, %v1674_v45 }
 0xdaa   :  { %v1448_v50 = vmul.f32 %v4403_v61, %v1441_v18 }
 0xdab   :  { %v1685_v23 = vrot.slane %v1681_v0, %v6230_v17 }
 0xdac   :  { %v1453_v43 = vrot.slane %v1448_v50, %v6230_v17 }
 0xdad   :  { %v4405_v24 = vpop.eup %4404  ;;  %v1686_v40 = vmul.f32 %v1685_v23, %v1678_v58  ;;  %v6181_v58 = vmov 6  }
 0xdae   :  { %v1454_v4 = vmul.f32 %v1453_v43, %v1445_v52  ;;  %v1567_v29 = vmul.f32 %v4405_v24, %v1560_v53 }
 0xdaf   :  { %v1687_v9 = vsub.f32 %v1674_v45, %v1686_v40 }
 0xdb0   :  { %v1571_v31 = vrot.slane %v1567_v29, %v6230_v17  ;;  %v1455_v42 = vsub.f32 %v1441_v18, %v1454_v4 }
 0xdb1   :  { %v1688_v33 = vsel %vm139_vm6, %v1685_v23, %v1687_v9 }
 0xdb2   :  { %v1572_v10 = vmul.f32 %v1571_v31, %v1564_v63  ;;  %v1456_v36 = vsel %vm139_vm6, %v1453_v43, %v1455_v42  ;;  %1691 = vperm.xlu0 %4358, %v1688_v33   ;;  %v6232_v43 = vld [vmem:[#allocation26_spill] sm:$0xff] }
 0xdb3   :  { %1459 = vperm.xlu1 %4357, %v1456_v36  }
 0xdb4   :  { %v1573_v54 = vsub.f32 %v1560_v53, %v1572_v10 }
 0xdb6   :  { %v1574_v38 = vsel %vm139_vm6, %v1571_v31, %v1573_v54  ;;  %4360 = vset.pattern.permute.xlu0 %v6183_v48 }
 0xdb7   :  { %1577 = vperm.xlu1 %4357, %v1574_v38  }
 0xdbb   :  { %4359 = vset.pattern.permute.xlu1 %v6183_v48 }
 0xe31   :  { %v1692_v56 = vpop.permute.xlu0 %1691 }
 0xe32   :  { %v1460_v27 = vpop.permute.xlu1 %1459  ;;  %4406 = vrcp.f32 %v1692_v56 }
 0xe33   :  { %4408 = vrcp.f32 %v1460_v27 }
 0xe36   :  { %v1578_v30 = vpop.permute.xlu1 %1577 }
 0xe37   :  { %4410 = vrcp.f32 %v1578_v30 }
 0xe3c   :  { %v4407_v32 = vpop.eup %4406 }
 0xe3d   :  { %v4409_v57 = vpop.eup %4408  ;;  %v1695_v25 = vmul.f32 %v4407_v32, %v1688_v33 }
 0xe3e   :  { %v1463_v37 = vmul.f32 %v4409_v57, %v1456_v36 }
 0xe3f   :  { %v1699_v13 = vrot.slane %v1695_v25, %v6231_v11 }
 0xe40   :  { %v1468_v8 = vrot.slane %v1463_v37, %v6231_v11 }
 0xe41   :  { %v4411_v12 = vpop.eup %4410  ;;  %v1700_v6 = vmul.f32 %v1699_v13, %v1692_v56 }
 0xe42   :  { %v1469_v47 = vmul.f32 %v1468_v8, %v1460_v27  ;;  %v1581_v46 = vmul.f32 %v4411_v12, %v1574_v38 }
 0xe43   :  { %v1701_v44 = vsub.f32 %v1688_v33, %v1700_v6  ;;  %v6233_v6 = vld [vmem:[#allocation27_spill] sm:$0xff] }
 0xe44   :  { %v1585_v59 = vrot.slane %v1581_v46, %v6231_v11  ;;  %v1470_v5 = vsub.f32 %v1456_v36, %v1469_v47 }
 0xe45   :  { %v1702_v45 = vsel %vm154_vm7, %v1699_v13, %v1701_v44 }
 0xe46   :  { %v1586_v1 = vmul.f32 %v1585_v59, %v1578_v30  ;;  %v1471_v18 = vsel %vm154_vm7, %v1468_v8, %v1470_v5  ;;  %1705 = vperm.xlu0 %4360, %v1702_v45   ;;  %v6179_v30 = vmov 7  }
 0xe47   :  { %1474 = vperm.xlu1 %4359, %v1471_v18  }
 0xe48   :  { %v1587_v51 = vsub.f32 %v1574_v38, %v1586_v1 }
 0xe4a   :  { %v1588_v53 = vsel %vm154_vm7, %v1585_v59, %v1587_v51  ;;  %4362 = vset.pattern.permute.xlu0 %v6181_v58 }
 0xe4b   :  { %1591 = vperm.xlu1 %4359, %v1588_v53  }
 0xe4f   :  { %4361 = vset.pattern.permute.xlu1 %v6181_v58 }
 0xec5   :  { %v1706_v52 = vpop.permute.xlu0 %1705 }
 0xec6   :  { %v1475_v63 = vpop.permute.xlu1 %1474  ;;  %4412 = vrcp.f32 %v1706_v52 }
 0xec7   :  { %4414 = vrcp.f32 %v1475_v63 }
 0xeca   :  { %v1592_v60 = vpop.permute.xlu1 %1591 }
 0xecb   :  { %4416 = vrcp.f32 %v1592_v60 }
 0xed0   :  { %v4413_v61 = vpop.eup %4412 }
 0xed1   :  { %v4415_v0 = vpop.eup %4414  ;;  %v1709_v50 = vmul.f32 %v4413_v61, %v1702_v45 }
 0xed2   :  { %v1478_v23 = vmul.f32 %v4415_v0, %v1471_v18 }
 0xed3   :  { %v1713_v24 = vrot.slane %v1709_v50, %v6232_v43 }
 0xed4   :  { %v1483_v40 = vrot.slane %v1478_v23, %v6232_v43 }
 0xed5   :  { %v4417_v4 = vpop.eup %4416  ;;  %v1714_v29 = vmul.f32 %v1713_v24, %v1706_v52 }
 0xed6   :  { %v1484_v9 = vmul.f32 %v1483_v40, %v1475_v63  ;;  %v1595_v31 = vmul.f32 %v4417_v4, %v1588_v53 }
 0xed7   :  { %v1715_v42 = vsub.f32 %v1702_v45, %v1714_v29  ;;  %v6234_v29 = vld [vmem:[#allocation28_spill] sm:$0xff] }
 0xed8   :  { %v1599_v33 = vrot.slane %v1595_v31, %v6232_v43  ;;  %v1485_v10 = vsub.f32 %v1471_v18, %v1484_v9 }
 0xed9   :  { %v1716_v36 = vsel %vm169_vm8, %v1713_v24, %v1715_v42 }
 0xeda   :  { %v1600_v54 = vmul.f32 %v1599_v33, %v1592_v60  ;;  %v1486_v38 = vsel %vm169_vm8, %v1483_v40, %v1485_v10  ;;  %1719 = vperm.xlu0 %4362, %v1716_v36   ;;  %v1390_v10 = vld [vmem:[#allocation7] sm:$0x7] }
 0xedb   :  { %1489 = vperm.xlu1 %4361, %v1486_v38  }
 0xedc   :  { %v1601_v56 = vsub.f32 %v1588_v53, %v1600_v54  ;;  %v5316_v54 = vsel %vm51_vm1, %v1390_v10, 0.0 }
 0xede   :  { %v1602_v27 = vsel %vm169_vm8, %v1599_v33, %v1601_v56  ;;  %4364 = vset.pattern.permute.xlu0 %v6179_v30 }
 0xedf   :  { %1605 = vperm.xlu1 %4361, %v1602_v27  }
 0xee3   :  { %4363 = vset.pattern.permute.xlu1 %v6179_v30 }
 0xf59   :  { %v1720_v32 = vpop.permute.xlu0 %1719 }
 0xf5a   :  { %v1490_v57 = vpop.permute.xlu1 %1489  ;;  %4418 = vrcp.f32 %v1720_v32 }
 0xf5b   :  { %4420 = vrcp.f32 %v1490_v57 }
 0xf5e   :  { %v1606_v25 = vpop.permute.xlu1 %1605 }
 0xf5f   :  { %4422 = vrcp.f32 %v1606_v25 }
 0xf64   :  { %v4419_v37 = vpop.eup %4418 }
 0xf65   :  { %v4421_v13 = vpop.eup %4420  ;;  %v1723_v8 = vmul.f32 %v4419_v37, %v1716_v36  ;;  %v6236_v37 = vld [vmem:[#allocation21_spill] sm:$0xff] }
 0xf66   :  { %v1493_v12 = vmul.f32 %v4421_v13, %v1486_v38 }
 0xf67   :  { %v1727_v47 = vrot.slane %v1723_v8, %v6233_v6 }
 0xf68   :  { %v1498_v46 = vrot.slane %v1493_v12, %v6233_v6 }
 0xf69   :  { %v4423_v44 = vpop.eup %4422  ;;  %v1728_v59 = vmul.f32 %v1727_v47, %v1720_v32  ;;  %v2422_v32 = vrot.slane %v5316_v54, %v6229_v28 }
 0xf6a   :  { %v1499_v5 = vmul.f32 %v1498_v46, %v1490_v57  ;;  %v1609_v45 = vmul.f32 %v4423_v44, %v1602_v27  ;;  %v6235_v57 = vld [vmem:[#allocation22_spill] sm:$0xff] }
 0xf6b   :  { %v1729_v1 = vsub.f32 %v1716_v36, %v1728_v59  ;;  %v5342_v12 = vsub.f32 %v6236_v37, %v2422_v32  ;;  %v5360_v59 = vsub.f32 %v4718_v14, %v2422_v32 }
 0xf6c   :  { %v1613_v18 = vrot.slane %v1609_v45, %v6233_v6  ;;  %v1500_v51 = vsub.f32 %v1486_v38, %v1499_v5  ;;  %v5369_v45 = vsub.f32 %v4722_v15, %v2422_v32 }
 0xf6d   :  { %v1730_v53 = vsel %vm184_vm9, %v1727_v47, %v1729_v1 }
 0xf6e   :  { %v1614_v52 = vmul.f32 %v1613_v18, %v1606_v25  ;;  %v1501_v63 = vsel %vm184_vm9, %v1498_v46, %v1500_v51  ;;  %1733 = vperm.xlu0 %4364, %v1730_v53   ;;  %v5351_v46 = vsub.f32 %v6235_v57, %v2422_v32 }
 0xf6f   :  { %1504 = vperm.xlu1 %4363, %v1501_v63  }
 0xf70   :  { %v1615_v60 = vsub.f32 %v1602_v27, %v1614_v52  ;;  %v2159_v27 = vrot.slane %v5316_v54, %v4789_v62  ;;  %v5393_v52 = vsub.f32 %v4745_v21, %v2422_v32 }
 0xf72   :  { %v5309_v61 = vsel %vm184_vm9, %v1613_v18, %v1615_v60  ;;  %v5329_v25 = vsub.f32 %v6235_v57, %v2159_v27  ;;  %v5332_v13 = vsub.f32 %v6236_v37, %v2159_v27  ;;  %v5339_v8 = vsub.f32 %v4718_v14, %v2159_v27 }
 0xf73   :  { %1619 = vperm.xlu1 %4363, %v5309_v61   ;;  %v5348_v47 = vsub.f32 %v4722_v15, %v2159_v27  ;;  %v5357_v44 = vsub.f32 %v4726_v16, %v2159_v27  ;;  %v5366_v5 = vsub.f32 %v4737_v19, %v2159_v27  ;;  %v5375_v1 = vsub.f32 %v4741_v20, %v2159_v27 }
 0xf74   :  { %v5378_v18 = vsub.f32 %v4726_v16, %v2422_v32  ;;  %v5384_v51 = vsub.f32 %v4745_v21, %v2159_v27  ;;  %v6242_v27 = vld [vmem:[#allocation19_spill] sm:$0xff] }
 0xfed   :  { %v1734_v0 = vpop.permute.xlu0 %1733 }
 0xfee   :  { %v1505_v50 = vpop.permute.xlu1 %1504  ;;  %4424 = vrcp.f32 %v1734_v0 }
 0xfef   :  { %4426 = vrcp.f32 %v1505_v50 }
 0xff2   :  { %v1620_v60 = vpop.permute.xlu1 %1619 }
 0xff3   :  { %4428 = vrcp.f32 %v1620_v60 }
 0xff8   :  { %v4425_v23 = vpop.eup %4424 }
 0xff9   :  { %v4427_v24 = vpop.eup %4426  ;;  %v1737_v40 = vmul.f32 %v4425_v23, %v1730_v53 }
 0xffa   :  { %v1508_v4 = vmul.f32 %v4427_v24, %v1501_v63 }
 0xffb   :  { %v1741_v9 = vrot.slane %v1737_v40, %v6234_v29 }
 0xffc   :  { %v1513_v31 = vrot.slane %v1508_v4, %v6234_v29 }
 0xffd   :  { %v1742_v42 = vmul.f32 %v1741_v9, %v1734_v0  ;;  %v4429_v0 = vpop.eup %4428 }
 0xffe   :  { %v1514_v33 = vmul.f32 %v1513_v31, %v1505_v50  ;;  %v1623_v50 = vmul.f32 %v4429_v0, %v5309_v61 }
 0xfff   :  { %v1743_v36 = vsub.f32 %v1730_v53, %v1742_v42  ;;  %v5387_v53 = vsub.f32 %v4737_v19, %v2422_v32 }
0x1000   :  { %v1515_v38 = vsub.f32 %v1501_v63, %v1514_v33  ;;  %v5396_v63 = vsub.f32 %v4741_v20, %v2422_v32  ;;  %v1627_v23 = vrot.slane %v1623_v50, %v6234_v29  ;;  %v6243_v32 = vld [vmem:[#allocation20_spill] sm:$0xff] }
0x1001   :  { %v1744_v56 = vsel %vm199_vm11, %v1741_v9, %v1743_v36  ;;  %v6237_v36 = vld [vmem:[#allocation14_spill] sm:$0xff] }
0x1002   :  { %v1516_v3 = vsel %vm199_vm11, %v1513_v31, %v1515_v38  ;;  %1750 = vrot.lane.b32.xlu0 %v1744_v56, %s4606_s9  ;;  %v1628_v24 = vmul.f32 %v1627_v23, %v1620_v60  ;;  %v6238_v38 = vld [vmem:[#allocation15_spill] sm:$0xff]  ;;  %v6240_v56 = vld [vmem:[#allocation17_spill] sm:$0xff] }
0x1003   :  { %1746 = vrot.lane.b32.xlu1 %v1516_v3, %s4616_s10  ;;  %v6241_v3 = vld [vmem:[#allocation18_spill] sm:$0xff] }
0x1004   :  { %v1629_v40 = vsub.f32 %v5309_v61, %v1628_v24  ;;  %v6239_v61 = vld [vmem:[#allocation16_spill] sm:$0xff] }
0x1006   :  { %2190 = vrot.lane.b32.xlu0 %v5329_v25, %s4606_s9  ;;  %v1630_v9 = vsel %vm199_vm11, %v1627_v23, %v1629_v40 }
0x1007   :  { %2188 = vrot.lane.b32.xlu1 %v5332_v13, %s4606_s9 }
0x100a   :  { %2192 = vrot.lane.b32.xlu0 %v5339_v8, %s4606_s9 }
0x100b   :  { %2451 = vrot.lane.b32.xlu1 %v5342_v12, %s4617_s11 }
0x100e   :  { %2194 = vrot.lane.b32.xlu0 %v5348_v47, %s4606_s9 }
0x100f   :  { %2453 = vrot.lane.b32.xlu1 %v5351_v46, %s4617_s11 }
0x1012   :  { %2196 = vrot.lane.b32.xlu0 %v5357_v44, %s4606_s9 }
0x1013   :  { %2455 = vrot.lane.b32.xlu1 %v5360_v59, %s4617_s11 }
0x1016   :  { %2198 = vrot.lane.b32.xlu0 %v5366_v5, %s4606_s9 }
0x1017   :  { %2457 = vrot.lane.b32.xlu1 %v5369_v45, %s4617_s11 }
0x101a   :  { %2200 = vrot.lane.b32.xlu0 %v5375_v1, %s4606_s9 }
0x101b   :  { %2459 = vrot.lane.b32.xlu1 %v5378_v18, %s4617_s11 }
0x101e   :  { %2202 = vrot.lane.b32.xlu0 %v5384_v51, %s4606_s9 }
0x101f   :  { %2461 = vrot.lane.b32.xlu1 %v5387_v53, %s4617_s11 }
0x1022   :  { %2465 = vrot.lane.b32.xlu0 %v5393_v52, %s4617_s11 }
0x1023   :  { %2463 = vrot.lane.b32.xlu1 %v5396_v63, %s4617_s11 }
0x1074   :  { %v1751_v4 = vpop.permute.xlu0 %1750 }
0x1075   :  { %v1747_v31 = vpop.permute.xlu1 %1746 }
0x1076   :  { %v1753_v42 = vsel %vm51_vm1, %v1747_v31, %v1630_v9 }
0x1077   :  { %v1755_v33 = vsel %vm444_vm12, %v1753_v42, %v1751_v4 }
0x1078   :  { %4000 = vmatprep.subr.mxu0 %v1755_v33  ;;  %4015 = vmatpush3.msra.mxu1 %v1755_v33  ;;  %v2191_v30 = vpop.permute.xlu0 %2190 }
0x1079   :  { %4001 = vmatpush3.msra.mxu0 %v1755_v33  ;;  %4017 = vmatmul.mubr.msk.f32.vlgmr.msra.gmra.mrb[0].mxu1 %vm51_vm1, %v1390_v10  ;;  %v2189_v10 = vpop.permute.xlu1 %2188 }
0x107a   :  { %4003 = vmatmul.mubr.msk.f32.vlgmr.msra.gmra.mrb[0].mxu0 %vm51_vm1, %v6237_v36 }
0x107b   :  { %4005 = vmatprep.mubr.msk.f32.mxu0 %vm51_vm1, %v6238_v38 }
0x107c   :  { %v2193_v29 = vpop.permute.xlu0 %2192 }
0x107d   :  { %v2452_v34 = vpop.permute.xlu1 %2451 }
0x107e   :  { %4006 = vmatmul.mubr.msk.f32.gmra.mrb[2].mxu0 %vm51_vm1, %v6239_v61 }
0x107f   :  { %4008 = vmatprep.mubr.msk.f32.mxu0 %vm51_vm1, %v6240_v56 }
0x1080   :  { %v2195_v6 = vpop.permute.xlu0 %2194 }
0x1082   :  { %4009 = vmatmul.mubr.msk.f32.gmra.mrb[4].mxu0 %vm51_vm1, %v6241_v3 }
0x1083   :  { %4011 = vmatprep.mubr.msk.f32.mxu0 %vm51_vm1, %v6242_v27 }
0x1086   :  { %4012 = vmatmul.mubr.msk.f32.gmra.mrb[6].mxu0 %vm51_vm1, %v6243_v32 }
0x114c   :  { %v1954_v60 = vpop.f32.mrb[0].mxu1 }
0x114d   :  { %v5423_v0 = vrot.slane %v1954_v60, %v4776_v39  ;;  %v5426_v50 = vrot.slane %v1954_v60, %v4789_v62  ;;  %v5429_v23 = vrot.slane %v1954_v60, %v6229_v28  ;;  %v4004_v24 = vpop.f32.mrb[0].mxu0  ;;  %v4018_v40 = vpop.f32.mrb[1].mxu1 }
0x114e   :  { %v1846_v4 = vpop.f32.mrb[1].mxu0 }
0x114f   :  { %v2173_v9 = vsub.f32 %v4004_v24, %v5426_v50  ;;  %v2436_v31 = vsub.f32 %v4004_v24, %v5429_v23  ;;  %v2172_v42 = vsub.f32 %v1846_v4, %v5426_v50  ;;  %v2435_v33 = vsub.f32 %v1846_v4, %v5429_v23 }
0x1150   :  { %v1976_v58 = vsub.f32 %v4004_v24, %v5423_v0  ;;  %v1975_v48 = vsub.f32 %v1846_v4, %v5423_v0 }
0x1151   :  { %v5437_v55 = vpop.f32.mrb[2].mxu0  ;;  %v2213_v60 = vmul.f32 %v2191_v30, %v2173_v9  ;;  %v2212_v22 = vmul.f32 %v2189_v10, %v2172_v42  ;;  %v2475_v10 = vmul.f32 %v2452_v34, %v2435_v33 }
0x1152   :  { %v2175_v40 = vsub.f32 %v5437_v55, %v5426_v50  ;;  %v2438_v35 = vsub.f32 %v5437_v55, %v5429_v23  ;;  %v1856_v41 = vpop.f32.mrb[3].mxu0  ;;  %v1978_v4 = vsub.f32 %v5437_v55, %v5423_v0 }
0x1153   :  { %v2174_v32 = vsub.f32 %v1856_v41, %v5426_v50  ;;  %v2437_v27 = vsub.f32 %v1856_v41, %v5429_v23  ;;  %2230 = vrot.lane.b32.xlu0 %v2213_v60, %s4616_s10  ;;  %2228 = vrot.lane.b32.xlu1 %v2212_v22, %s4616_s10  ;;  %v1977_v24 = vsub.f32 %v1856_v41, %v5423_v0  ;;  %v2454_v22 = vpop.permute.xlu1 %2453 }
0x1154   :  { %v2476_v56 = vmul.f32 %v2454_v22, %v2436_v31  ;;  %v5486_v22 = vrot.slane %v5316_v54, %v4776_v39  ;;  %v2215_v43 = vmul.f32 %v2195_v6, %v2175_v40 }
0x1155   :  { %v5448_v30 = vpop.f32.mrb[4].mxu0 }
0x1156   :  { %v2177_v9 = vsub.f32 %v5448_v30, %v5426_v50  ;;  %v2440_v42 = vsub.f32 %v5448_v30, %v5429_v23  ;;  %v5456_v3 = vpop.f32.mrb[5].mxu0  ;;  %v1980_v60 = vsub.f32 %v5448_v30, %v5423_v0  ;;  %v5490_v2 = vsub.f32 %v6235_v57, %v5486_v22 }
0x1157   :  { %v2176_v41 = vsub.f32 %v5456_v3, %v5426_v50  ;;  %v2439_v34 = vsub.f32 %v5456_v3, %v5429_v23  ;;  %2491 = vrot.lane.b32.xlu1 %v2475_v10, %s4618_s12  ;;  %v2456_v54 = vpop.permute.xlu1 %2455 }
0x1159   :  { %v5467_v33 = vpop.f32.mrb[6].mxu0 }
0x115a   :  { %v2179_v61 = vsub.f32 %v5467_v33, %v5426_v50  ;;  %v5471_v30 = vpop.f32.mrb[7].mxu0  ;;  %v2442_v38 = vsub.f32 %v5467_v33, %v5429_v23  ;;  %v1982_v36 = vsub.f32 %v5467_v33, %v5423_v0  ;;  %v1984_v33 = vmul.f32 %v1976_v58, %v5490_v2 }
0x115b   :  { %v2441_v55 = vsub.f32 %v5471_v30, %v5429_v23  ;;  %2493 = vrot.lane.b32.xlu1 %v2476_v56, %s4618_s12  ;;  %v5496_v23 = vsub.f32 %v6236_v37, %v5486_v22  ;;  %v2458_v57 = vpop.permute.xlu1 %2457  ;;  %v2214_v58 = vmul.f32 %v2193_v29, %v2174_v32  ;;  %v2477_v37 = vmul.f32 %v2456_v54, %v2437_v27  ;;  %v2197_v27 = vpop.permute.xlu0 %2196 }
0x115c   :  { %v1994_v10 = vsel %vm51_vm1, %v1984_v33, 0.0  ;;  %v2478_v33 = vmul.f32 %v2458_v57, %v2438_v35  ;;  %v5515_v32 = vsub.f32 %v4722_v15, %v5486_v22  ;;  %v2216_v54 = vmul.f32 %v2197_v27, %v2176_v41 }
0x115d   :  { %v1983_v56 = vmul.f32 %v1975_v48, %v5496_v23  ;;  %v5527_v15 = vsub.f32 %v4745_v21, %v5486_v22 }
0x115f   :  { %v1991_v31 = vsel %vm51_vm1, %v1983_v56, 0.0 }
0x1172   :  { %1995 = vadd.xlane.f32.xlu0 %v1994_v10  ;;  %v2460_v10 = vpop.permute.xlu1 %2459 }
0x1176   :  { %v2462_v11 = vpop.permute.xlu1 %2461 }
0x1177   :  { %v2480_v48 = vmul.f32 %v2462_v11, %v2440_v42  ;;  %v2199_v11 = vpop.permute.xlu0 %2198 }
0x1178   :  { %v2217_v42 = vmul.f32 %v2199_v11, %v2177_v9 }
0x117a   :  { %v2464_v56 = vpop.permute.xlu1 %2463 }
0x117b   :  { %v2481_v6 = vmul.f32 %v2464_v56, %v2441_v55  ;;  %v2201_v40 = vpop.permute.xlu0 %2200  ;;  %v5520_v55 = vsub.f32 %v4737_v19, %v5486_v22  ;;  %v1990_v19 = vmul.f32 %v1982_v36, %v5527_v15  ;;  %v5542_v36 = vsub.f32 %v4726_v16, %v5486_v22 }
0x117d   :  { %v1988_v57 = vmul.f32 %v1980_v60, %v5520_v55  ;;  %v2012_v41 = vsel %vm51_vm1, %v1990_v19, 0.0 }
0x117f   :  { %1992 = vadd.xlane.f32.xlu1 %v1991_v31  ;;  %v2479_v31 = vmul.f32 %v2460_v10, %v2439_v34  ;;  %v1986_v34 = vmul.f32 %v1978_v4, %v5515_v32  ;;  %v2006_v4 = vsel %vm51_vm1, %v1988_v57, 0.0 }
0x1188   :  { %2234 = vrot.lane.b32.xlu0 %v2215_v43, %s4616_s10  ;;  %v5509_v43 = vsub.f32 %v4718_v14, %v5486_v22  ;;  %v2203_v14 = vpop.permute.xlu0 %2202 }
0x1189   :  { %v2219_v9 = vmul.f32 %v2203_v14, %v2179_v61 }
0x118a   :  { %v1985_v35 = vmul.f32 %v1977_v24, %v5509_v43  ;;  %v2000_v24 = vsel %vm51_vm1, %v1986_v34, 0.0 }
0x118c   :  { %2232 = vrot.lane.b32.xlu0 %v2214_v58, %s4616_s10  ;;  %v1997_v29 = vsel %vm51_vm1, %v1985_v35, 0.0  ;;  %v2466_v58 = vpop.permute.xlu0 %2465 }
0x118d   :  { %v2482_v10 = vmul.f32 %v2466_v58, %v2442_v38  ;;  %v6245_v38 = vsub.f32 %v5456_v3, %v5423_v0 }
0x118f   :  { %v1987_v61 = vmul.f32 %v6245_v38, %v5542_v36 }
0x1190   :  { %2497 = vrot.lane.b32.xlu1 %v2478_v33, %s4618_s12  ;;  %v6244_v33 = vsub.f32 %v5471_v30, %v5426_v50  ;;  %v6246_v50 = vsub.f32 %v5471_v30, %v5423_v0 }
0x1194   :  { %2495 = vrot.lane.b32.xlu1 %v2477_v37, %s4618_s12  ;;  %v2218_v37 = vmul.f32 %v2201_v40, %v6244_v33 }
0x1198   :  { %2501 = vrot.lane.b32.xlu1 %v2480_v48, %s4618_s12  ;;  %v5550_v48 = vsub.f32 %v4741_v20, %v5486_v22 }
0x119a   :  { %v1989_v56 = vmul.f32 %v6246_v50, %v5550_v48 }
0x119c   :  { %2499 = vrot.lane.b32.xlu1 %v2479_v31, %s4618_s12  ;;  %v2003_v31 = vsel %vm51_vm1, %v1987_v61, 0.0  ;;  %v2009_v16 = vsel %vm51_vm1, %v1989_v56, 0.0 }
0x11a0   :  { %2503 = vrot.lane.b32.xlu1 %v2481_v6, %s4618_s12 }
0x11ab   :  { %1998 = vadd.xlane.f32.xlu0 %v1997_v29 }
0x11c1   :  { %2238 = vrot.lane.b32.xlu0 %v2217_v42, %s4616_s10 }
0x11c4   :  { %2001 = vadd.xlane.f32.xlu1 %v2000_v24 }
0x11c5   :  { %2236 = vrot.lane.b32.xlu0 %v2216_v54, %s4616_s10  ;;  %v2231_v60 = vpop.permute.xlu0 %2230  ;;  %v2229_v6 = vpop.permute.xlu1 %2228 }
0x11c6   :  { %v2255_v21 = vsel %vm51_vm1, %v2231_v60, 0.0  ;;  %v2252_v3 = vsel %vm51_vm1, %v2229_v6, 0.0 }
0x11c8   :  { %2007 = vadd.xlane.f32.xlu1 %v2006_v4 }
0x11c9   :  { %2242 = vrot.lane.b32.xlu0 %v2219_v9, %s4616_s10  ;;  %v2492_v35 = vpop.permute.xlu1 %2491 }
0x11ca   :  { %v2515_v29 = vsel %vm51_vm1, %v2492_v35, 0.0 }
0x11cc   :  { %2013 = vadd.xlane.f32.xlu1 %v2012_v41 }
0x11cd   :  { %2505 = vrot.lane.b32.xlu0 %v2482_v10, %s4618_s12  ;;  %v2494_v20 = vpop.permute.xlu1 %2493 }
0x11ce   :  { %v2518_v27 = vsel %vm51_vm1, %v2494_v20, 0.0 }
0x11d0   :  { %2256 = vadd.xlane.f32.xlu1 %v2255_v21 }
0x11d1   :  { %2240 = vrot.lane.b32.xlu0 %v2218_v37, %s4616_s10 }
0x11f0   :  { %2004 = vadd.xlane.f32.xlu0 %v2003_v31 }
0x11f4   :  { %2010 = vadd.xlane.f32.xlu0 %v2009_v16 }
0x11f8   :  { %2253 = vadd.xlane.f32.xlu0 %v2252_v3 }
0x11fc   :  { %2516 = vadd.xlane.f32.xlu0 %v2515_v29 }
0x11ff   :  { %v1996_v22 = vpop.xlane.xlu0 %1995 }
0x1200   :  { %2519 = vadd.xlane.f32.xlu0 %v2518_v27  ;;  %v2016_v35 = vmul.f32 %v1996_v22, %v5490_v2  ;;  %v4166_v27 = vpack.c.bf16 %v5490_v2, %v5496_v23  ;;  %v4174_v22 = vpack.c.bf16 %v5520_v55, %v5542_v36  ;;  %v4182_v2 = vpack.c.bf16 %v5329_v25, %v5332_v13 }
0x1202   :  { %4167 = vmatprep.subr.bf16.mxu0 %v4166_v27  ;;  %4183 = vmatprep.subr.bf16.mxu1 %v4182_v2 }
0x1203   :  { %v2235_v11 = vpop.permute.xlu0 %2234  ;;  %4169 = vmatpush3.bf16.msra.mxu0 %v4166_v27  ;;  %4185 = vmatpush3.bf16.msra.mxu1 %v4182_v2 }
0x1204   :  { %v2261_v0 = vsel %vm51_vm1, %v2235_v11, 0.0  ;;  %v4170_v11 = vpack.c.bf16 %v5515_v32, %v5509_v43 }
0x1205   :  { %2262 = vadd.xlane.f32.xlu1 %v2261_v0  ;;  %v4178_v0 = vpack.c.bf16 %v5527_v15, %v5550_v48 }
0x1206   :  { %4171 = vmatprep.subr.bf16.mxu0 %v4170_v11 }
0x1207   :  { %v2233_v30 = vpop.permute.xlu0 %2232  ;;  %4173 = vmatpush3.bf16.msra.mxu0 %v4170_v11 }
0x1208   :  { %v2258_v40 = vsel %vm51_vm1, %v2233_v30, 0.0  ;;  %4175 = vmatprep.subr.bf16.mxu0 %v4174_v22 }
0x1209   :  { %2259 = vadd.xlane.f32.xlu1 %v2258_v40 }
0x120b   :  { %4177 = vmatpush3.bf16.msra.mxu0 %v4174_v22 }
0x120c   :  { %v1993_v42 = vpop.xlane.xlu1 %1992  ;;  %4179 = vmatprep.subr.bf16.mxu0 %v4178_v0 }
0x120d   :  { %v2015_v6 = vmul.f32 %v1993_v42, %v5496_v23  ;;  %v5589_v23 = vpack.c.bf16 %v5351_v46, %v5342_v12 }
0x120f   :  { %4181 = vmatpush3.bf16.msra.mxu0 %v4178_v0 }
0x1210   :  { %v2498_v34 = vpop.permute.xlu1 %2497  ;;  %4199 = vmatprep.subr.bf16.mxu0 %v5589_v23 }
0x1211   :  { %v2524_v14 = vsel %vm51_vm1, %v2498_v34, 0.0 }
0x1212   :  { %2525 = vadd.xlane.f32.xlu0 %v2524_v14 }
0x1214   :  { %v2496_v24 = vpop.permute.xlu1 %2495 }
0x1215   :  { %v2521_v54 = vsel %vm51_vm1, %v2496_v24, 0.0 }
0x1216   :  { %2522 = vadd.xlane.f32.xlu0 %v2521_v54 }
0x1218   :  { %v2502_v57 = vpop.permute.xlu1 %2501 }
0x1219   :  { %v2530_v4 = vsel %vm51_vm1, %v2502_v57, 0.0 }
0x121a   :  { %2531 = vadd.xlane.f32.xlu0 %v2530_v4 }
0x121c   :  { %v2500_v9 = vpop.permute.xlu1 %2499 }
0x121d   :  { %v2527_v19 = vsel %vm51_vm1, %v2500_v9, 0.0 }
0x121e   :  { %2528 = vadd.xlane.f32.xlu0 %v2527_v19 }
0x1220   :  { %v2504_v58 = vpop.permute.xlu1 %2503 }
0x1221   :  { %v2533_v10 = vsel %vm51_vm1, %v2504_v58, 0.0 }
0x1222   :  { %2534 = vadd.xlane.f32.xlu0 %v2533_v10 }
0x1238   :  { %v1999_v41 = vpop.xlane.xlu0 %1998 }
0x1239   :  { %v2017_v3 = vmul.f32 %v1999_v41, %v5509_v43  ;;  %v4186_v43 = vpack.c.bf16 %v5348_v47, %v5339_v8 }
0x123b   :  { %4187 = vmatprep.subr.bf16.mxu1 %v4186_v43 }
0x123c   :  { %v2239_v60 = vpop.permute.xlu0 %2238  ;;  %4189 = vmatpush3.bf16.msra.mxu1 %v4186_v43 }
0x123d   :  { %v2267_v21 = vsel %vm51_vm1, %v2239_v60, 0.0 }
0x123e   :  { %2268 = vadd.xlane.f32.xlu1 %v2267_v21 }
0x1240   :  { %v2237_v33 = vpop.permute.xlu0 %2236 }
0x1241   :  { %v2264_v37 = vsel %vm51_vm1, %v2237_v33, 0.0 }
0x1242   :  { %2265 = vadd.xlane.f32.xlu1 %v2264_v37 }
0x1244   :  { %v2243_v38 = vpop.permute.xlu0 %2242 }
0x1245   :  { %v2273_v61 = vsel %vm51_vm1, %v2243_v38, 0.0 }
0x1246   :  { %2274 = vadd.xlane.f32.xlu1 %v2273_v61 }
0x1248   :  { %v2506_v31 = vpop.permute.xlu0 %2505 }
0x1249   :  { %v2536_v50 = vsel %vm51_vm1, %v2506_v31, 0.0  ;;  %v4194_v31 = vpack.c.bf16 %v5384_v51, %v5375_v1 }
0x124a   :  { %2537 = vadd.xlane.f32.xlu1 %v2536_v50 }
0x124c   :  { %v2241_v56 = vpop.permute.xlu0 %2240 }
0x124d   :  { %v2270_v16 = vsel %vm51_vm1, %v2241_v56, 0.0 }
0x124e   :  { %2271 = vadd.xlane.f32.xlu1 %v2270_v16 }
0x124f   :  { %2023 = vxpose.xlu0.b32.start [1/8] (short) (narrow) %v2015_v6, 16 }
0x1251   :  { %v2002_v29 = vpop.xlane.xlu1 %2001 }
0x1252   :  { %v2018_v20 = vmul.f32 %v2002_v29, %v5515_v32  ;;  %v4190_v32 = vpack.c.bf16 %v5366_v5, %v5357_v44 }
0x1253   :  { %2024 = vxpose.xlu0.b32.cont [2/8] (short) (narrow) %v2016_v35, 16 }
0x1254   :  { %4191 = vmatprep.subr.bf16.mxu1 %v4190_v32 }
0x1255   :  { %v2008_v30 = vpop.xlane.xlu1 %2007  ;;  %4193 = vmatpush3.bf16.msra.mxu1 %v4190_v32 }
0x1256   :  { %v2020_v24 = vmul.f32 %v2008_v30, %v5520_v55  ;;  %4195 = vmatprep.subr.bf16.mxu1 %v4194_v31 }
0x1257   :  { %2025 = vxpose.xlu0.b32.cont [3/8] (short) (narrow) %v2017_v3, 16 }
0x1259   :  { %v2014_v34 = vpop.xlane.xlu1 %2013  ;;  %4197 = vmatpush3.bf16.msra.mxu1 %v4194_v31 }
0x125a   :  { %v2022_v58 = vmul.f32 %v2014_v34, %v5527_v15 }
0x125b   :  { %2026 = vxpose.xlu0.b32.cont [4/8] (short) (narrow) %v2018_v20, 16 }
0x125d   :  { %v2257_v9 = vpop.xlane.xlu1 %2256 }
0x127d   :  { %v2005_v40 = vpop.xlane.xlu0 %2004 }
0x127e   :  { %v2019_v42 = vmul.f32 %v2005_v40, %v5542_v36  ;;  %v2277_v36 = vmul.f32 %v2257_v9, %v5329_v25 }
0x1280   :  { %2027 = vxpose.xlu0.b32.cont [5/8] (short) (narrow) %v2019_v42, 16 }
0x1281   :  { %v2011_v14 = vpop.xlane.xlu0 %2010 }
0x1282   :  { %v2021_v57 = vmul.f32 %v2011_v14, %v5550_v48 }
0x1284   :  { %2028 = vxpose.xlu0.b32.cont [6/8] (short) (narrow) %v2020_v24, 16 }
0x1285   :  { %v2254_v54 = vpop.xlane.xlu0 %2253 }
0x1286   :  { %v2276_v4 = vmul.f32 %v2254_v54, %v5332_v13 }
0x1288   :  { %2284 = vxpose.xlu1.b32.start [1/8] (short) (narrow) %v2276_v4, 16  ;;  %2029 = vxpose.xlu0.b32.cont [7/8] (short) (narrow) %v2021_v57, 16 }
0x1289   :  { %v2517_v19 = vpop.xlane.xlu0 %2516 }
0x128a   :  { %v2539_v10 = vmul.f32 %v2517_v19, %v5342_v12 }
0x128c   :  { %2030 = vxpose.xlu0.b32.end [8/8] (short) (narrow) %v2022_v58, 16  ;;  %2285 = vxpose.xlu1.b32.cont [2/8] (short) (narrow) %v2277_v36, 16 }
0x128d   :  { %v2520_v41 = vpop.xlane.xlu0 %2519 }
0x128e   :  { %v2540_v55 = vmul.f32 %v2520_v41, %v5351_v46 }
0x1290   :  { %2547 = vxpose.xlu0.b32.start [1/8] (short) (narrow) %v2539_v10, 16 }
0x1292   :  { %v2263_v60 = vpop.xlane.xlu1 %2262 }
0x1293   :  { %v2279_v21 = vmul.f32 %v2263_v60, %v5348_v47 }
0x1294   :  { %2548 = vxpose.xlu0.b32.cont [2/8] (short) (narrow) %v2540_v55, 16 }
0x1296   :  { %v2260_v48 = vpop.xlane.xlu1 %2259 }
0x1297   :  { %v2278_v13 = vmul.f32 %v2260_v48, %v5339_v8 }
0x1299   :  { %2286 = vxpose.xlu1.b32.cont [3/8] (short) (narrow) %v2278_v13, 16 }
0x129d   :  { %2287 = vxpose.xlu1.b32.cont [4/8] (short) (narrow) %v2279_v21, 16 }
0x129f   :  { %v2526_v15 = vpop.xlane.xlu0 %2525 }
0x12a0   :  { %v2542_v12 = vmul.f32 %v2526_v15, %v5369_v45 }
0x12a3   :  { %v2523_v33 = vpop.xlane.xlu0 %2522 }
0x12a4   :  { %v2541_v25 = vmul.f32 %v2523_v33, %v5360_v59 }
0x12a6   :  { %2549 = vxpose.xlu0.b32.cont [3/8] (short) (narrow) %v2541_v25, 16  ;;  %v6249_v25 = vmov 1  }
0x12a7   :  { %v2532_v37 = vpop.xlane.xlu0 %2531 }
0x12a8   :  { %v2544_v61 = vmul.f32 %v2532_v37, %v5387_v53 }
0x12aa   :  { %2550 = vxpose.xlu0.b32.cont [4/8] (short) (narrow) %v2542_v12, 16 }
0x12ab   :  { %v2529_v38 = vpop.xlane.xlu0 %2528 }
0x12ac   :  { %v2543_v46 = vmul.f32 %v2529_v38, %v5378_v18 }
0x12ae   :  { %2551 = vxpose.xlu0.b32.cont [5/8] (short) (narrow) %v2543_v46, 16 }
0x12af   :  { %v2535_v8 = vpop.xlane.xlu0 %2534 }
0x12b0   :  { %v2545_v47 = vmul.f32 %v2535_v8, %v5396_v63 }
0x12b2   :  { %2552 = vxpose.xlu0.b32.cont [6/8] (short) (narrow) %v2544_v61, 16 }
0x12b6   :  { %2553 = vxpose.xlu0.b32.cont [7/8] (short) (narrow) %v2545_v47, 16 }
0x12cb   :  { %v2269_v50 = vpop.xlane.xlu1 %2268 }
0x12cc   :  { %v2281_v35 = vmul.f32 %v2269_v50, %v5366_v5  ;;  %v4206_v5 = vpack.c.bf16 %v5387_v53, %v5378_v18 }
0x12cf   :  { %v2266_v56 = vpop.xlane.xlu1 %2265 }
0x12d0   :  { %v2280_v6 = vmul.f32 %v2266_v56, %v5357_v44  ;;  %v4202_v44 = vpack.c.bf16 %v5369_v45, %v5360_v59  ;;  %v6248_v59 = vmov 2  }
0x12d2   :  { %2288 = vxpose.xlu1.b32.cont [5/8] (short) (narrow) %v2280_v6, 16 }
0x12d3   :  { %v2275_v16 = vpop.xlane.xlu1 %2274 }
0x12d4   :  { %v2283_v11 = vmul.f32 %v2275_v16, %v5384_v51  ;;  %v6247_v51 = vmov 0  }
0x12d6   :  { %2289 = vxpose.xlu1.b32.cont [6/8] (short) (narrow) %v2281_v35, 16 }
0x12d7   :  { %v2538_v3 = vpop.xlane.xlu1 %2537 }
0x12d8   :  { %v2546_v29 = vmul.f32 %v2538_v3, %v5393_v52 }
0x12da   :  { %2554 = vxpose.xlu0.b32.end [8/8] (short) (narrow) %v2546_v29, 16 }
0x12db   :  { %v2272_v20 = vpop.xlane.xlu1 %2271 }
0x12dc   :  { %v2282_v27 = vmul.f32 %v2272_v20, %v5375_v1  ;;  %v4210_v1 = vpack.c.bf16 %v5393_v52, %v5396_v63 }
0x12de   :  { %2290 = vxpose.xlu1.b32.cont [7/8] (short) (narrow) %v2282_v27, 16 }
0x12e2   :  { %2291 = vxpose.xlu1.b32.end [8/8] (short) (narrow) %v2283_v11, 16 }
0x12f0   :  { %v2039_v22 = vpop.trf.xlu0 }
0x12f1   :  { %4035 = vmatprep.mubr.msk.f32.mxu0 %vm745_vm13, %v2039_v22 }
0x12f4   :  { %v2040_v0 = vpop.trf.xlu0 }
0x12f5   :  { %4036 = vmatmul.mubr.msk.f32.vlgmr.msra.gmra.mrb[8].mxu0 %vm745_vm13, %v2040_v0 }
0x12f6   :  { %4201 = vmatpush3.bf16.msra.mxu0 %v5589_v23 }
0x12f7   :  { %4203 = vmatprep.subr.bf16.mxu0 %v4202_v44 }
0x12fa   :  { %4205 = vmatpush3.bf16.msra.mxu0 %v4202_v44 }
0x12fb   :  { %4207 = vmatprep.subr.bf16.mxu0 %v4206_v5 }
0x12fe   :  { %4209 = vmatpush3.bf16.msra.mxu0 %v4206_v5 }
0x12ff   :  { %4211 = vmatprep.subr.bf16.mxu0 %v4210_v1 }
0x1300   :  { %4365 = vset.pattern.permute.xlu1 %v6247_v51 }
0x1302   :  { %4213 = vmatpush3.bf16.msra.mxu0 %v4210_v1 }
0x1303   :  { %4368 = vset.pattern.permute.xlu0 %v6248_v59 }
0x133e   :  { %v2563_v45 = vpop.trf.xlu0 }
0x133f   :  { %4073 = vmatprep.mubr.msk.f32.mxu0 %vm745_vm13, %v2563_v45 }
0x1342   :  { %v2564_v2 = vpop.trf.xlu0 }
0x1343   :  { %4074 = vmatmul.mubr.msk.f32.vlgmr.msra.gmra.mrb[10].mxu0 %vm745_vm13, %v2564_v2 }
0x1346   :  { %v2300_v23 = vpop.trf.xlu1 }
0x1347   :  { %4054 = vmatprep.mubr.msk.f32.mxu1 %vm745_vm13, %v2300_v23 }
0x134a   :  { %v2301_v18 = vpop.trf.xlu1 }
0x134b   :  { %4055 = vmatmul.mubr.msk.f32.vlgmr.msra.gmra.mrb[2].mxu1 %vm745_vm13, %v2301_v18 }
0x13c8   :  { %v5633_v53 = vpop.f32.mrb[8].mxu0 }
0x13c9   :  { %2145 = vrot.lane.b32.xlu1 %v5633_v53, %s4616_s10  ;;  %v2128_v52 = vpop.f32.mrb[9].mxu0 }
0x1416   :  { %v5637_v63 = vpop.f32.mrb[10].mxu0 }
0x1417   :  { %2671 = vrot.lane.b32.xlu1 %v5637_v63, %s4616_s10  ;;  %v2651_v43 = vpop.f32.mrb[11].mxu0 }
0x141e   :  { %v5641_v32 = vpop.f32.mrb[2].mxu1 }
0x141f   :  { %2408 = vrot.lane.b32.xlu0 %v5641_v32, %s4616_s10  ;;  %v2388_v30 = vpop.f32.mrb[3].mxu1 }
0x143b   :  { %v2146_v40 = vpop.permute.xlu1 %2145 }
0x143c   :  { %4222 = vpush %v2146_v40 }
0x146d   :  { %s4223_s13 = spop %4222 }
0x146e   :  { %v2148_v42 = vstv %s4223_s13 }
0x146f   :  { %4430 = vrcp.f32 %v2148_v42 }
0x1479   :  { %v4431_v34 = vpop.eup %4430 }
0x147a   :  { %v2151_v14 = vmul.f32 %v4431_v34, %v2128_v52 }
0x147c   :  { %v2152_v24 = vadd.f32 %v2151_v14, %v4761_v26 }
0x147e   :  { %2155 = vst.msk [vmem:[#allocation9] sm:$0xff] %vm51_vm1, %v2152_v24 }
0x1485   :  { %v2683_v54 = vld [vmem:[#allocation9] sm:$0xff] }
0x1486   :  { %v5649_v57 = vsel %vm51_vm1, %v2683_v54, %v5224_v49 }
0x1487   :  { %2687 = vperm.xlu1 %4365, %v5649_v57  }
0x1489   :  { %v2672_v4 = vpop.permute.xlu1 %2671 }
0x1491   :  { %v2409_v9 = vpop.permute.xlu0 %2408 }
0x1492   :  { %4224 = vpush %v2409_v9 }
0x1493   :  { %4226 = vpush %v2672_v4 }
0x14c3   :  { %s4225_s14 = spop %4224 }
0x14c4   :  { %v2411_v19 = vstv %s4225_s14  ;;  %s4227_s15 = spop %4226 }
0x14c5   :  { %4432 = vrcp.f32 %v2411_v19  ;;  %v2674_v58 = vstv %s4227_s15  ;;  %v6250_v19 = vmov 3  }
0x14c6   :  { %4434 = vrcp.f32 %v2674_v58 }
0x14cf   :  { %v4433_v36 = vpop.eup %4432 }
0x14d0   :  { %v4435_v10 = vpop.eup %4434  ;;  %v2414_v41 = vmul.f32 %v4433_v36, %v2388_v30 }
0x14d1   :  { %v2677_v55 = vmul.f32 %v4435_v10, %v2651_v43 }
0x14d2   :  { %v2415_v60 = vadd.f32 %v2414_v41, %v4761_v26 }
0x14d3   :  { %v2678_v48 = vadd.f32 %v2677_v55, %v4761_v26 }
0x14d4   :  { %2418 = vst.msk [vmem:[#allocation9 + $0x8] sm:$0xff] %vm51_vm1, %v2415_v60 }
0x14d5   :  { %2681 = vst.msk [vmem:[#allocation9 + $0x10] sm:$0xff] %vm51_vm1, %v2678_v48 }
0x14db   :  { %v3028_v13 = vld [vmem:[#allocation9 + $0x8] sm:$0xff] }
0x14dc   :  { %v5658_v21 = vsel %vm51_vm1, %v3028_v13, %v5224_v49  ;;  %v3366_v15 = vld [vmem:[#allocation9 + $0x10] sm:$0xff] }
0x14dd   :  { %3032 = vperm.xlu1 %4365, %v5658_v21   ;;  %v5663_v33 = vsel %vm51_vm1, %v3366_v15, %v5224_v49 }
0x14e1   :  { %3370 = vperm.xlu1 %4365, %v5663_v33  }
0x14e5   :  { %4366 = vset.pattern.permute.xlu1 %v6249_v25 }
0x1506   :  { %v2688_v26 = vpop.permute.xlu1 %2687 }
0x1507   :  { %4436 = vrcp.f32 %v2688_v26 }
0x1511   :  { %v4437_v37 = vpop.eup %4436 }
0x1512   :  { %v2691_v12 = vmul.f32 %v4437_v37, %v5649_v57 }
0x1514   :  { %v2695_v38 = vrot.slane %v2691_v12, %v4776_v39 }
0x1516   :  { %v2696_v46 = vmul.f32 %v2695_v38, %v2688_v26 }
0x1518   :  { %v2697_v61 = vsub.f32 %v5649_v57, %v2696_v46 }
0x151a   :  { %v5672_v8 = vsel %vm94_vm3, %v2695_v38, %v2697_v61 }
0x151b   :  { %2701 = vperm.xlu1 %4366, %v5672_v8  }
0x155c   :  { %v3033_v49 = vpop.permute.xlu1 %3032 }
0x155d   :  { %4438 = vrcp.f32 %v3033_v49 }
0x1560   :  { %v3371_v47 = vpop.permute.xlu1 %3370 }
0x1561   :  { %4440 = vrcp.f32 %v3371_v47 }
0x1567   :  { %v4439_v31 = vpop.eup %4438 }
0x1568   :  { %v3036_v50 = vmul.f32 %v4439_v31, %v5658_v21 }
0x156a   :  { %v3040_v56 = vrot.slane %v3036_v50, %v4776_v39 }
0x156b   :  { %v4441_v6 = vpop.eup %4440 }
0x156c   :  { %v3041_v16 = vmul.f32 %v3040_v56, %v3033_v49  ;;  %v3374_v35 = vmul.f32 %v4441_v6, %v5663_v33  ;;  %v6251_v6 = vmov 4  }
0x156e   :  { %v3042_v3 = vsub.f32 %v5658_v21, %v3041_v16  ;;  %v3378_v29 = vrot.slane %v3374_v35, %v4776_v39 }
0x1570   :  { %v3379_v20 = vmul.f32 %v3378_v29, %v3371_v47  ;;  %v5682_v27 = vsel %vm94_vm3, %v3040_v56, %v3042_v3 }
0x1571   :  { %3046 = vperm.xlu1 %4366, %v5682_v27  }
0x1572   :  { %v3380_v11 = vsub.f32 %v5663_v33, %v3379_v20 }
0x1574   :  { %v5688_v22 = vsel %vm94_vm3, %v3378_v29, %v3380_v11  ;;  %vm2811_vm3 = vcmask 7168  }
0x1575   :  { %3384 = vperm.xlu1 %4366, %v5688_v22  }
0x1579   :  { %4367 = vset.pattern.permute.xlu1 %v6248_v59 }
0x159a   :  { %v2702_v44 = vpop.permute.xlu1 %2701 }
0x159b   :  { %4442 = vrcp.f32 %v2702_v44 }
0x15a5   :  { %v4443_v0 = vpop.eup %4442 }
0x15a6   :  { %v2705_v5 = vmul.f32 %v4443_v0, %v5672_v8 }
0x15a8   :  { %v2709_v1 = vrot.slane %v2705_v5, %v4789_v62 }
0x15aa   :  { %v2710_v51 = vmul.f32 %v2709_v1, %v2702_v44 }
0x15ac   :  { %v2711_v45 = vsub.f32 %v5672_v8, %v2710_v51 }
0x15ae   :  { %v5697_v2 = vsel %vm109_vm4, %v2709_v1, %v2711_v45 }
0x15af   :  { %2715 = vperm.xlu1 %4367, %v5697_v2  }
0x15f0   :  { %v3047_v23 = vpop.permute.xlu1 %3046 }
0x15f1   :  { %4444 = vrcp.f32 %v3047_v23 }
0x15f4   :  { %v3385_v18 = vpop.permute.xlu1 %3384 }
0x15f5   :  { %4446 = vrcp.f32 %v3385_v18 }
0x15fb   :  { %v4445_v59 = vpop.eup %4444 }
0x15fc   :  { %v3050_v52 = vmul.f32 %v4445_v59, %v5682_v27 }
0x15fe   :  { %v3054_v43 = vrot.slane %v3050_v52, %v4789_v62 }
0x15ff   :  { %v4447_v30 = vpop.eup %4446 }
0x1600   :  { %v3055_v40 = vmul.f32 %v3054_v43, %v3047_v23  ;;  %v3388_v42 = vmul.f32 %v4447_v30, %v5688_v22 }
0x1602   :  { %v3056_v34 = vsub.f32 %v5682_v27, %v3055_v40  ;;  %v3392_v14 = vrot.slane %v3388_v42, %v4789_v62 }
0x1604   :  { %v3393_v24 = vmul.f32 %v3392_v14, %v3385_v18  ;;  %v5707_v54 = vsel %vm109_vm4, %v3054_v43, %v3056_v34 }
0x1605   :  { %3060 = vperm.xlu1 %4367, %v5707_v54  }
0x1606   :  { %v3394_v4 = vsub.f32 %v5688_v22, %v3393_v24 }
0x1608   :  { %v5713_v9 = vsel %vm109_vm4, %v3392_v14, %v3394_v4  ;;  %v6252_v14 = vmov 5   ;;  %vm2813_vm4 = vcmask 15360  }
0x1609   :  { %3398 = vperm.xlu0 %4368, %v5713_v9   ;;  %4369 = vset.pattern.permute.xlu1 %v6250_v19 }
0x160d   :  { %4370 = vset.pattern.permute.xlu0 %v6250_v19  ;;  %v6253_v19 = vld [vmem:[#allocation25_spill] sm:$0xff] }
0x162e   :  { %v2716_v58 = vpop.permute.xlu1 %2715 }
0x162f   :  { %4448 = vrcp.f32 %v2716_v58 }
0x1639   :  { %v4449_v36 = vpop.eup %4448 }
0x163a   :  { %v2719_v10 = vmul.f32 %v4449_v36, %v5697_v2 }
0x163c   :  { %v2723_v41 = vrot.slane %v2719_v10, %v6229_v28 }
0x163e   :  { %v2724_v55 = vmul.f32 %v2723_v41, %v2716_v58 }
0x1640   :  { %v2725_v60 = vsub.f32 %v5697_v2, %v2724_v55 }
0x1642   :  { %v5723_v48 = vsel %vm124_vm5, %v2723_v41, %v2725_v60 }
0x1643   :  { %2729 = vperm.xlu1 %4369, %v5723_v48   ;;  %v2801_v7 = vrot.slane %v5723_v48, 3 }
0x1684   :  { %v3061_v13 = vpop.permute.xlu1 %3060 }
0x1685   :  { %4450 = vrcp.f32 %v3061_v13 }
0x1688   :  { %v3399_v15 = vpop.permute.xlu0 %3398 }
0x1689   :  { %4452 = vrcp.f32 %v3399_v15 }
0x168f   :  { %v4451_v25 = vpop.eup %4450 }
0x1690   :  { %v3064_v26 = vmul.f32 %v4451_v25, %v5707_v54 }
0x1692   :  { %v3068_v37 = vrot.slane %v3064_v26, %v6229_v28 }
0x1693   :  { %v4453_v12 = vpop.eup %4452 }
0x1694   :  { %v3069_v38 = vmul.f32 %v3068_v37, %v3061_v13  ;;  %v3402_v46 = vmul.f32 %v4453_v12, %v5713_v9 }
0x1696   :  { %v3070_v61 = vsub.f32 %v5707_v54, %v3069_v38  ;;  %v3406_v49 = vrot.slane %v3402_v46, %v6229_v28 }
0x1698   :  { %v3407_v47 = vmul.f32 %v3406_v49, %v3399_v15  ;;  %v5733_v31 = vsel %vm124_vm5, %v3068_v37, %v3070_v61 }
0x1699   :  { %3074 = vperm.xlu1 %4369, %v5733_v31  }
0x169a   :  { %v3408_v50 = vsub.f32 %v5713_v9, %v3407_v47 }
0x169c   :  { %v5739_v56 = vsel %vm124_vm5, %v3406_v49, %v3408_v50  ;;  %vm2815_vm5 = vcmask 23552  }
0x169d   :  { %3412 = vperm.xlu0 %4370, %v5739_v56   ;;  %4371 = vset.pattern.permute.xlu1 %v6251_v6 }
0x16a1   :  { %4372 = vset.pattern.permute.xlu0 %v6251_v6  ;;  %v6254_v6 = vmov 6  }
0x16c2   :  { %v2730_v16 = vpop.permute.xlu1 %2729 }
0x16c3   :  { %4454 = vrcp.f32 %v2730_v16 }
0x16cd   :  { %v4455_v35 = vpop.eup %4454 }
0x16ce   :  { %v2733_v3 = vmul.f32 %v4455_v35, %v5723_v48 }
0x16d0   :  { %v2737_v29 = vrot.slane %v2733_v3, %v6230_v17 }
0x16d2   :  { %v2738_v20 = vmul.f32 %v2737_v29, %v2730_v16 }
0x16d4   :  { %v2739_v11 = vsub.f32 %v5723_v48, %v2738_v20 }
0x16d6   :  { %v5749_v44 = vsel %vm139_vm6, %v2737_v29, %v2739_v11  ;;  %v6255_v29 = vld [vmem:[#allocation26_spill] sm:$0xff] }
0x16d7   :  { %2743 = vperm.xlu1 %4371, %v5749_v44  }
0x1718   :  { %v3075_v0 = vpop.permute.xlu1 %3074 }
0x1719   :  { %4456 = vrcp.f32 %v3075_v0 }
0x171c   :  { %v3413_v5 = vpop.permute.xlu0 %3412 }
0x171d   :  { %4458 = vrcp.f32 %v3413_v5 }
0x1723   :  { %v4457_v1 = vpop.eup %4456 }
0x1724   :  { %v3078_v51 = vmul.f32 %v4457_v1, %v5733_v31 }
0x1726   :  { %v3082_v45 = vrot.slane %v3078_v51, %v6230_v17 }
0x1727   :  { %v4459_v23 = vpop.eup %4458 }
0x1728   :  { %v3083_v18 = vmul.f32 %v3082_v45, %v3075_v0  ;;  %v3416_v59 = vmul.f32 %v4459_v23, %v5739_v56 }
0x172a   :  { %v3084_v52 = vsub.f32 %v5733_v31, %v3083_v18  ;;  %v3420_v43 = vrot.slane %v3416_v59, %v6230_v17 }
0x172c   :  { %v3421_v30 = vmul.f32 %v3420_v43, %v3413_v5  ;;  %v5759_v40 = vsel %vm139_vm6, %v3082_v45, %v3084_v52 }
0x172d   :  { %3088 = vperm.xlu1 %4371, %v5759_v40  }
0x172e   :  { %v3422_v42 = vsub.f32 %v5739_v56, %v3421_v30 }
0x1730   :  { %v5765_v34 = vsel %vm139_vm6, %v3420_v43, %v3422_v42  ;;  %vm2817_vm6 = vcmask 31744  }
0x1731   :  { %3426 = vperm.xlu0 %4372, %v5765_v34   ;;  %4373 = vset.pattern.permute.xlu1 %v6252_v14 }
0x1735   :  { %4374 = vset.pattern.permute.xlu0 %v6252_v14 }
0x1756   :  { %v2744_v17 = vpop.permute.xlu1 %2743 }
0x1757   :  { %4460 = vrcp.f32 %v2744_v17 }
0x1761   :  { %v4461_v24 = vpop.eup %4460 }
0x1762   :  { %v2747_v4 = vmul.f32 %v4461_v24, %v5749_v44 }
0x1764   :  { %v2751_v58 = vrot.slane %v2747_v4, %v6253_v19 }
0x1766   :  { %v2752_v36 = vmul.f32 %v2751_v58, %v2744_v17 }
0x1768   :  { %v2753_v10 = vsub.f32 %v5749_v44, %v2752_v36 }
0x176a   :  { %v5775_v41 = vsel %vm154_vm7, %v2751_v58, %v2753_v10 }
0x176b   :  { %2757 = vperm.xlu1 %4373, %v5775_v41  }
0x17ac   :  { %v3089_v55 = vpop.permute.xlu1 %3088 }
0x17ad   :  { %4462 = vrcp.f32 %v3089_v55 }
0x17b0   :  { %v3427_v60 = vpop.permute.xlu0 %3426 }
0x17b1   :  { %4464 = vrcp.f32 %v3427_v60 }
0x17b7   :  { %v4463_v13 = vpop.eup %4462 }
0x17b8   :  { %v3092_v15 = vmul.f32 %v4463_v13, %v5759_v40 }
0x17ba   :  { %v3096_v25 = vrot.slane %v3092_v15, %v6253_v19 }
0x17bb   :  { %v4465_v26 = vpop.eup %4464 }
0x17bc   :  { %v3097_v37 = vmul.f32 %v3096_v25, %v3089_v55  ;;  %v3430_v12 = vmul.f32 %v4465_v26, %v5765_v34  ;;  %v6257_v55 = vld [vmem:[#allocation27_spill] sm:$0xff] }
0x17be   :  { %v3098_v38 = vsub.f32 %v5759_v40, %v3097_v37  ;;  %v3434_v46 = vrot.slane %v3430_v12, %v6253_v19  ;;  %v6256_v19 = vmov 7  }
0x17c0   :  { %v3435_v61 = vmul.f32 %v3434_v46, %v3427_v60  ;;  %v5785_v49 = vsel %vm154_vm7, %v3096_v25, %v3098_v38 }
0x17c1   :  { %3102 = vperm.xlu1 %4373, %v5785_v49  }
0x17c2   :  { %v3436_v47 = vsub.f32 %v5765_v34, %v3435_v61 }
0x17c4   :  { %v5791_v50 = vsel %vm154_vm7, %v3434_v46, %v3436_v47  ;;  %vm2819_vm7 = vcmask 39936  }
0x17c5   :  { %3440 = vperm.xlu0 %4374, %v5791_v50   ;;  %4375 = vset.pattern.permute.xlu1 %v6254_v6 }
0x17c9   :  { %4376 = vset.pattern.permute.xlu0 %v6254_v6 }
0x17ea   :  { %v2758_v16 = vpop.permute.xlu1 %2757 }
0x17eb   :  { %4466 = vrcp.f32 %v2758_v16 }
0x17f5   :  { %v4467_v35 = vpop.eup %4466 }
0x17f6   :  { %v2761_v3 = vmul.f32 %v4467_v35, %v5775_v41 }
0x17f8   :  { %v2765_v20 = vrot.slane %v2761_v3, %v6255_v29 }
0x17fa   :  { %v2766_v11 = vmul.f32 %v2765_v20, %v2758_v16 }
0x17fc   :  { %v2767_v0 = vsub.f32 %v5775_v41, %v2766_v11 }
0x17fe   :  { %v5801_v5 = vsel %vm169_vm8, %v2765_v20, %v2767_v0  ;;  %v4619_v0 = vmov 8  }
0x17ff   :  { %2771 = vperm.xlu1 %4375, %v5801_v5  }
0x1840   :  { %v3103_v1 = vpop.permute.xlu1 %3102 }
0x1841   :  { %4468 = vrcp.f32 %v3103_v1 }
0x1844   :  { %v3441_v51 = vpop.permute.xlu0 %3440 }
0x1845   :  { %4470 = vrcp.f32 %v3441_v51 }
0x184b   :  { %v4469_v45 = vpop.eup %4468 }
0x184c   :  { %v3106_v23 = vmul.f32 %v4469_v45, %v5785_v49 }
0x184e   :  { %v3110_v18 = vrot.slane %v3106_v23, %v6255_v29  ;;  %v6258_v23 = vld [vmem:[#allocation28_spill] sm:$0xff] }
0x184f   :  { %v4471_v59 = vpop.eup %4470 }
0x1850   :  { %v3111_v52 = vmul.f32 %v3110_v18, %v3103_v1  ;;  %v3444_v43 = vmul.f32 %v4471_v59, %v5791_v50 }
0x1852   :  { %v3112_v30 = vsub.f32 %v5785_v49, %v3111_v52  ;;  %v3448_v42 = vrot.slane %v3444_v43, %v6255_v29 }
0x1854   :  { %v3449_v14 = vmul.f32 %v3448_v42, %v3441_v51  ;;  %v5811_v17 = vsel %vm169_vm8, %v3110_v18, %v3112_v30 }
0x1855   :  { %3116 = vperm.xlu1 %4375, %v5811_v17  }
0x1856   :  { %v3450_v24 = vsub.f32 %v5791_v50, %v3449_v14 }
0x1858   :  { %v5817_v4 = vsel %vm169_vm8, %v3448_v42, %v3450_v24  ;;  %vm2821_vm8 = vcmask 48128  }
0x1859   :  { %3454 = vperm.xlu0 %4376, %v5817_v4   ;;  %4377 = vset.pattern.permute.xlu1 %v6256_v19 }
0x185d   :  { %4378 = vset.pattern.permute.xlu0 %v6256_v19 }
0x187e   :  { %v2772_v58 = vpop.permute.xlu1 %2771 }
0x187f   :  { %4472 = vrcp.f32 %v2772_v58 }
0x1889   :  { %v4473_v36 = vpop.eup %4472 }
0x188a   :  { %v2775_v10 = vmul.f32 %v4473_v36, %v5801_v5 }
0x188c   :  { %v2779_v60 = vrot.slane %v2775_v10, %v6257_v55 }
0x188e   :  { %v2780_v13 = vmul.f32 %v2779_v60, %v2772_v58 }
0x1890   :  { %v2781_v15 = vsub.f32 %v5801_v5, %v2780_v13 }
0x1892   :  { %v5827_v25 = vsel %vm184_vm9, %v2779_v60, %v2781_v15 }
0x1893   :  { %2785 = vperm.xlu1 %4377, %v5827_v25  }
0x18d4   :  { %v3117_v26 = vpop.permute.xlu1 %3116 }
0x18d5   :  { %4474 = vrcp.f32 %v3117_v26 }
0x18d8   :  { %v3455_v37 = vpop.permute.xlu0 %3454 }
0x18d9   :  { %4476 = vrcp.f32 %v3455_v37 }
0x18df   :  { %v4475_v12 = vpop.eup %4474 }
0x18e0   :  { %v3120_v38 = vmul.f32 %v4475_v12, %v5811_v17 }
0x18e2   :  { %v3124_v46 = vrot.slane %v3120_v38, %v6257_v55 }
0x18e3   :  { %v4477_v61 = vpop.eup %4476 }
0x18e4   :  { %v3125_v47 = vmul.f32 %v3124_v46, %v3117_v26  ;;  %v3458_v6 = vmul.f32 %v4477_v61, %v5817_v4 }
0x18e6   :  { %v3126_v16 = vsub.f32 %v5811_v17, %v3125_v47  ;;  %v3462_v35 = vrot.slane %v3458_v6, %v6257_v55 }
0x18e8   :  { %v3463_v3 = vmul.f32 %v3462_v35, %v3455_v37  ;;  %v5837_v29 = vsel %vm184_vm9, %v3124_v46, %v3126_v16  ;;  %v4496_v16 = vld [vmem:[#allocation7] sm:$0x7] }
0x18e9   :  { %3130 = vperm.xlu1 %4377, %v5837_v29  }
0x18ea   :  { %v3464_v20 = vsub.f32 %v5817_v4, %v3463_v3 }
0x18ec   :  { %v5843_v11 = vsel %vm184_vm9, %v3462_v35, %v3464_v20  ;;  %vm2823_vm9 = vcmask 56320  }
0x18ed   :  { %3468 = vperm.xlu0 %4378, %v5843_v11   ;;  %4379 = vset.pattern.permute.xlu1 %v4619_v0 }
0x18ee   :  { %2399 = vperm.xlu1 %4379, %v5641_v32  }
0x18f1   :  { %4380 = vset.pattern.permute.xlu0 %v4619_v0  ;;  %v2797_v0 = vrot.slane %v5672_v8, 1 }
0x18f2   :  { %2139 = vperm.xlu0 %4380, %v5633_v53   ;;  %2662 = vperm.xlu1 %4379, %v5637_v63  }
0x18f3   :  { %v2812_v8 = vsel %vm2811_vm3, %v5649_v57, %v2797_v0  ;;  %v2803_v57 = vrot.slane %v5749_v44, 4  ;;  %v2809_v44 = vrot.slane %v5827_v25, 7 }
0x18f6   :  { %4381 = vset.pattern.permute.xlu0 %v6256_v19 }
0x1912   :  { %v2786_v1 = vpop.permute.xlu1 %2785 }
0x1913   :  { %4478 = vrcp.f32 %v2786_v1 }
0x191d   :  { %v4479_v51 = vpop.eup %4478 }
0x191e   :  { %v2789_v45 = vmul.f32 %v4479_v51, %v5827_v25  ;;  %v3480_v51 = vrot.slane %v5688_v22, 1 }
0x1920   :  { %v2793_v18 = vrot.slane %v2789_v45, %v6258_v23  ;;  %v3494_v22 = vsel %vm2811_vm3, %v5663_v33, %v3480_v51  ;;  %v3146_v33 = vrot.slane %v5733_v31, 3  ;;  %v3148_v31 = vrot.slane %v5759_v40, 4  ;;  %v6263_v51 = vld [vmem:[#allocation17_spill] sm:$0xff] }
0x1922   :  { %v2794_v59 = vmul.f32 %v2793_v18, %v2786_v1  ;;  %v3142_v1 = vrot.slane %v5682_v27, 1 }
0x1924   :  { %v2795_v52 = vsub.f32 %v5827_v25, %v2794_v59  ;;  %v3482_v59 = vrot.slane %v5713_v9, 2  ;;  %v3156_v27 = vsel %vm2811_vm3, %v5658_v21, %v3142_v1  ;;  %v3486_v9 = vrot.slane %v5765_v34, 4 }
0x1925   :  { %v3488_v21 = vrot.slane %v5791_v50, 5  ;;  %v2807_v34 = vrot.slane %v5801_v5, 6  ;;  %v3150_v5 = vrot.slane %v5785_v49, 5 }
0x1926   :  { %v2796_v43 = vsel %vm199_vm11, %v2793_v18, %v2795_v52 }
0x1927   :  { %2843 = vrot.lane.b32.xlu1 %v2796_v43, %s4616_s10  ;;  %v3144_v43 = vrot.slane %v5707_v54, 2 }
0x1968   :  { %v3131_v30 = vpop.permute.xlu1 %3130 }
0x1969   :  { %4480 = vrcp.f32 %v3131_v30 }
0x196c   :  { %v3469_v42 = vpop.permute.xlu0 %3468 }
0x196d   :  { %4482 = vrcp.f32 %v3469_v42  ;;  %v2400_v14 = vpop.permute.xlu1 %2399 }
0x196e   :  { %4484 = vrcp.f32 %v2400_v14  ;;  %v3492_v14 = vrot.slane %v5843_v11, 7 }
0x1971   :  { %v2140_v24 = vpop.permute.xlu0 %2139  ;;  %v2663_v19 = vpop.permute.xlu1 %2662 }
0x1972   :  { %4486 = vrcp.f32 %v2140_v24  ;;  %v3157_v24 = vsel %vm2813_vm4, %v3156_v27, %v3144_v43 }
0x1973   :  { %v4481_v58 = vpop.eup %4480  ;;  %4488 = vrcp.f32 %v2663_v19  ;;  %v3158_v25 = vsel %vm2815_vm5, %v3157_v24, %v3146_v33 }
0x1974   :  { %v3134_v36 = vmul.f32 %v4481_v58, %v5837_v29  ;;  %v3152_v58 = vrot.slane %v5811_v17, 6 }
0x1976   :  { %v3138_v10 = vrot.slane %v3134_v36, %v6258_v23 }
0x1977   :  { %v4483_v55 = vpop.eup %4482 }
0x1978   :  { %v4485_v60 = vpop.eup %4484  ;;  %v3139_v13 = vmul.f32 %v3138_v10, %v3131_v30  ;;  %v3472_v15 = vmul.f32 %v4483_v55, %v5843_v11  ;;  %v3495_v30 = vsel %vm2813_vm4, %v3494_v22, %v3482_v59  ;;  %v3154_v55 = vrot.slane %v5837_v29, 7 }
0x1979   :  { %v2403_v26 = vmul.f32 %v4485_v60, %v5641_v32 }
0x197a   :  { %v3140_v37 = vsub.f32 %v5837_v29, %v3139_v13  ;;  %v3476_v12 = vrot.slane %v3472_v15, %v6258_v23  ;;  %v2799_v23 = vrot.slane %v5697_v2, 2  ;;  %v3484_v2 = vrot.slane %v5739_v56, 3 }
0x197b   :  { %v2405_v38 = vrot.slane %v2403_v26, 7  ;;  %v2805_v56 = vrot.slane %v5775_v41, 5  ;;  %v3159_v15 = vsel %vm2817_vm6, %v3158_v25, %v3148_v31  ;;  %v6259_v26 = vld [vmem:[#allocation13_spill] sm:$0xff] }
0x197c   :  { %v4487_v46 = vpop.eup %4486  ;;  %v3477_v61 = vmul.f32 %v3476_v12, %v3469_v42  ;;  %v3141_v47 = vsel %vm199_vm11, %v3138_v10, %v3140_v37  ;;  %v2814_v52 = vsel %vm2813_vm4, %v2812_v8, %v2799_v23  ;;  %v3490_v42 = vrot.slane %v5817_v4, 6 }
0x197d   :  { %v4489_v6 = vpop.eup %4488  ;;  %v2407_v35 = vadd.f32 %v4496_v16, %v2405_v38  ;;  %v2143_v3 = vmul.f32 %v4487_v46, %v5633_v53  ;;  %3181 = vrot.lane.b32.xlu1 %v3141_v47, %s4616_s10  ;;  %v3496_v48 = vsel %vm2815_vm5, %v3495_v30, %v3484_v2  ;;  %v2816_v54 = vsel %vm2815_vm5, %v2814_v52, %v2801_v7  ;;  %v6266_v2 = vld [vmem:[#allocation20_spill] sm:$0xff] }
0x197e   :  { %v3478_v20 = vsub.f32 %v5843_v11, %v3477_v61  ;;  %v2666_v32 = vmul.f32 %v4489_v6, %v5637_v63  ;;  %v3497_v50 = vsel %vm2817_vm6, %v3496_v48, %v3486_v9  ;;  %v2818_v4 = vsel %vm2817_vm6, %v2816_v54, %v2803_v57  ;;  %v6260_v61 = vld [vmem:[#allocation14_spill] sm:$0xff]  ;;  %v6261_v6 = vld [vmem:[#allocation15_spill] sm:$0xff] }
0x197f   :  { %2417 = vst.msk [vmem:[#allocation7] sm:$0x2] %vm1106_vm14, %v2407_v35  ;;  %v2144_v45 = vadd.f32 %v4496_v16, %v2143_v3  ;;  %v3498_v41 = vsel %vm2819_vm7, %v3497_v50, %v3488_v21  ;;  %v2820_v19 = vsel %vm2819_vm7, %v2818_v4, %v2805_v56 }
0x1980   :  { %v2668_v18 = vrot.slane %v2666_v32, 6  ;;  %v3479_v53 = vsel %vm199_vm11, %v3476_v12, %v3478_v20  ;;  %v3499_v11 = vsel %vm2821_vm8, %v3498_v41, %v3490_v42  ;;  %v2822_v10 = vsel %vm2821_vm8, %v2820_v19, %v2807_v34  ;;  %v6262_v32 = vld [vmem:[#allocation16_spill] sm:$0xff] }
0x1981   :  { %2154 = vst.msk [vmem:[#allocation7] sm:$0x1] %vm843_vm15, %v2144_v45  ;;  %3519 = vrot.lane.b32.xlu0 %v3479_v53, %s4616_s10  ;;  %v3500_v40 = vsel %vm2823_vm9, %v3499_v11, %v3492_v14  ;;  %v2824_v49 = vsel %vm2823_vm9, %v2822_v10, %v2809_v44  ;;  %v3160_v12 = vsel %vm2819_vm7, %v3159_v15, %v3150_v5  ;;  %v6264_v53 = vld [vmem:[#allocation18_spill] sm:$0xff] }
0x1982   :  { %v2670_v63 = vadd.f32 %v4496_v16, %v2668_v18  ;;  %4490 = vlog2.f32 %v3500_v40 }
0x1983   :  { %4492 = vlog2.f32 %v2824_v49 }
0x1984   :  { %2680 = vst.msk [vmem:[#allocation7] sm:$0x4] %vm1369_vm2, %v2670_v63  ;;  %v6265_v63 = vld [vmem:[#allocation19_spill] sm:$0xff] }
0x198b   :  { %v2682_v36 = vld [vmem:[#allocation7] sm:$0x7] }
0x198c   :  { %v2833_v60 = vrot.slane %v2682_v36, %v4776_v39  ;;  %v5913_v13 = vrot.slane %v2682_v36, %v4789_v62  ;;  %v3161_v39 = vsel %vm2821_vm8, %v3160_v12, %v3152_v58  ;;  %v4491_v29 = vpop.eup %4490  ;;  %v3509_v27 = vrot.slane %v2682_v36, %v6229_v28 }
0x198d   :  { %v3162_v62 = vsel %vm2823_vm9, %v3161_v39, %v3154_v55  ;;  %v4493_v38 = vpop.eup %4492  ;;  %v3502_v35 = vmul.f32 0.6931472, %v4491_v29 }
0x198e   :  { %v5918_v37 = vsub.f32 %v6259_v26, %v2833_v60  ;;  %v5922_v17 = vsub.f32 %v6259_v26, %v5913_v13  ;;  %4494 = vlog2.f32 %v3162_v62  ;;  %v5932_v47 = vsub.f32 %v6260_v61, %v2833_v60 }
0x198f   :  { %v5935_v16 = vsub.f32 %v6261_v6, %v2833_v60  ;;  %v2826_v3 = vmul.f32 0.6931472, %v4493_v38  ;;  %v5942_v0 = vsub.f32 %v6262_v32, %v2833_v60  ;;  %v3503_v1 = vsel %vm843_vm15, %v3502_v35, 0.0 }
0x1990   :  { %4078 = vmatprep.mubr.msk.f32.mxu1 %vm51_vm1, %v5918_v37  ;;  %4092 = vmatprep.mubr.msk.f32.mxu0 %vm51_vm1, %v5922_v17  ;;  %v5946_v45 = vsub.f32 %v6263_v51, %v2833_v60  ;;  %v5954_v59 = vsub.f32 %v6264_v53, %v2833_v60  ;;  %v5957_v8 = vsub.f32 %v6265_v63, %v2833_v60 }
0x1991   :  { %v2827_v23 = vsel %vm843_vm15, %v2826_v3, 0.0  ;;  %v5966_v52 = vsub.f32 %v6266_v2, %v2833_v60  ;;  %v5969_v7 = vsub.f32 %v6259_v26, %v3509_v27  ;;  %v5977_v9 = vsub.f32 %v6260_v61, %v5913_v13 }
0x1992   :  { %v5981_v43 = vsub.f32 %v6261_v6, %v5913_v13  ;;  %v5989_v57 = vsub.f32 %v6262_v32, %v5913_v13  ;;  %v5992_v21 = vsub.f32 %v6260_v61, %v3509_v27  ;;  %v5996_v33 = vsub.f32 %v6263_v51, %v5913_v13 }
0x1993   :  { %v5999_v56 = vsub.f32 %v6261_v6, %v3509_v27  ;;  %v6011_v42 = vsub.f32 %v6264_v53, %v5913_v13  ;;  %v6014_v48 = vsub.f32 %v6262_v32, %v3509_v27  ;;  %v6018_v34 = vsub.f32 %v6265_v63, %v5913_v13 }
0x1994   :  { %v6021_v14 = vsub.f32 %v6263_v51, %v3509_v27  ;;  %v6033_v54 = vsub.f32 %v6266_v2, %v5913_v13  ;;  %v6036_v44 = vsub.f32 %v6264_v53, %v3509_v27  ;;  %v6039_v50 = vsub.f32 %v6265_v63, %v3509_v27 }
0x1995   :  { %v6048_v31 = vsub.f32 %v6266_v2, %v3509_v27 }
0x1998   :  { %v4495_v20 = vpop.eup %4494 }
0x1999   :  { %v2844_v46 = vpop.permute.xlu1 %2843  ;;  %v3164_v18 = vmul.f32 0.6931472, %v4495_v20 }
0x199a   :  { %4076 = vmatprep.subr.mxu1 %v2844_v46 }
0x199b   :  { %4077 = vmatpush3.msra.mxu1 %v2844_v46  ;;  %v3165_v22 = vsel %vm843_vm15, %v3164_v18, 0.0 }
0x199c   :  { %4079 = vmatmul.mubr.msk.f32.vlgmr.msra.gmra.mrb[4].mxu1 %vm51_vm1, %v5932_v47 }
0x199d   :  { %4081 = vmatprep.mubr.msk.f32.mxu1 %vm51_vm1, %v5935_v16 }
0x19a0   :  { %3504 = vadd.xlane.f32.xlu0 %v3503_v1  ;;  %4082 = vmatmul.mubr.msk.f32.gmra.mrb[6].mxu1 %vm51_vm1, %v5942_v0 }
0x19a1   :  { %2828 = vadd.xlane.f32.xlu1 %v2827_v23  ;;  %4084 = vmatprep.mubr.msk.f32.mxu1 %vm51_vm1, %v5946_v45 }
0x19a4   :  { %4085 = vmatmul.mubr.msk.f32.gmra.mrb[8].mxu1 %vm51_vm1, %v5954_v59 }
0x19a5   :  { %3166 = vadd.xlane.f32.xlu1 %v3165_v22  ;;  %4087 = vmatprep.mubr.msk.f32.mxu1 %vm51_vm1, %v5957_v8 }
0x19a8   :  { %4088 = vmatmul.mubr.msk.f32.gmra.mrb[10].mxu1 %vm51_vm1, %v5966_v52 }
0x19a9   :  { %4106 = vmatprep.mubr.msk.f32.mxu1 %vm51_vm1, %v5969_v7 }
0x19ef   :  { %v3182_v28 = vpop.permute.xlu1 %3181 }
0x19f0   :  { %4090 = vmatprep.subr.mxu0 %v3182_v28 }
0x19f1   :  { %4091 = vmatpush3.msra.mxu0 %v3182_v28 }
0x19f2   :  { %4093 = vmatmul.mubr.msk.f32.vlgmr.msra.gmra.mrb[12].mxu0 %vm51_vm1, %v5977_v9 }
0x19f3   :  { %v3520_v30 = vpop.permute.xlu0 %3519  ;;  %4095 = vmatprep.mubr.msk.f32.mxu0 %vm51_vm1, %v5981_v43 }
0x19f4   :  { %4104 = vmatprep.subr.mxu1 %v3520_v30 }
0x19f5   :  { %4105 = vmatpush3.msra.mxu1 %v3520_v30 }
0x19f6   :  { %4096 = vmatmul.mubr.msk.f32.gmra.mrb[14].mxu0 %vm51_vm1, %v5989_v57  ;;  %4107 = vmatmul.mubr.msk.f32.vlgmr.msra.gmra.mrb[12].mxu1 %vm51_vm1, %v5992_v21 }
0x19f7   :  { %4098 = vmatprep.mubr.msk.f32.mxu0 %vm51_vm1, %v5996_v33  ;;  %4109 = vmatprep.mubr.msk.f32.mxu1 %vm51_vm1, %v5999_v56 }
0x19fa   :  { %4099 = vmatmul.mubr.msk.f32.gmra.mrb[16].mxu0 %vm51_vm1, %v6011_v42  ;;  %4110 = vmatmul.mubr.msk.f32.gmra.mrb[14].mxu1 %vm51_vm1, %v6014_v48 }
0x19fb   :  { %4101 = vmatprep.mubr.msk.f32.mxu0 %vm51_vm1, %v6018_v34  ;;  %4112 = vmatprep.mubr.msk.f32.mxu1 %vm51_vm1, %v6021_v14 }
0x19fe   :  { %4102 = vmatmul.mubr.msk.f32.gmra.mrb[18].mxu0 %vm51_vm1, %v6033_v54  ;;  %4113 = vmatmul.mubr.msk.f32.gmra.mrb[16].mxu1 %vm51_vm1, %v6036_v44 }
0x19ff   :  { %4115 = vmatprep.mubr.msk.f32.mxu1 %vm51_vm1, %v6039_v50 }
0x1a02   :  { %4116 = vmatmul.mubr.msk.f32.gmra.mrb[18].mxu1 %vm51_vm1, %v6048_v31 }
0x1a6f   :  { %v4080_v41 = vpop.f32.mrb[4].mxu1 }
0x1a70   :  { %v2976_v4 = vmul.f32 %v4080_v41, %v5932_v47  ;;  %v2936_v24 = vpop.f32.mrb[5].mxu1 }
0x1a71   :  { %v2975_v11 = vmul.f32 %v2936_v24, %v5918_v37 }
0x1a72   :  { %v2986_v5 = vsel %vm51_vm1, %v2976_v4, 0.0 }
0x1a73   :  { %2987 = vadd.xlane.f32.xlu0 %v2986_v5  ;;  %v4083_v19 = vpop.f32.mrb[6].mxu1  ;;  %v2983_v36 = vsel %vm51_vm1, %v2975_v11, 0.0 }
0x1a74   :  { %v2946_v25 = vpop.f32.mrb[7].mxu1  ;;  %v2978_v40 = vmul.f32 %v4083_v19, %v5942_v0 }
0x1a75   :  { %v2977_v58 = vmul.f32 %v2946_v25, %v5935_v16 }
0x1a76   :  { %v2992_v49 = vsel %vm51_vm1, %v2978_v40, 0.0 }
0x1a77   :  { %v2989_v10 = vsel %vm51_vm1, %v2977_v58, 0.0  ;;  %2984 = vadd.xlane.f32.xlu0 %v2983_v36  ;;  %v4086_v55 = vpop.f32.mrb[8].mxu1 }
0x1a78   :  { %2990 = vadd.xlane.f32.xlu1 %v2989_v10  ;;  %v2956_v60 = vpop.f32.mrb[9].mxu1  ;;  %v2980_v15 = vmul.f32 %v4086_v55, %v5954_v59 }
0x1a79   :  { %v2979_v13 = vmul.f32 %v2956_v60, %v5946_v45 }
0x1a7a   :  { %v2998_v62 = vsel %vm51_vm1, %v2980_v15, 0.0 }
0x1a7b   :  { %v2995_v26 = vsel %vm51_vm1, %v2979_v13, 0.0  ;;  %2993 = vadd.xlane.f32.xlu0 %v2992_v49  ;;  %v4089_v37 = vpop.f32.mrb[10].mxu1 }
0x1a7c   :  { %2996 = vadd.xlane.f32.xlu1 %v2995_v26  ;;  %v2966_v12 = vpop.f32.mrb[11].mxu1  ;;  %v2982_v29 = vmul.f32 %v4089_v37, %v5966_v52 }
0x1a7d   :  { %v2981_v39 = vmul.f32 %v2966_v12, %v5957_v8 }
0x1a7e   :  { %v3004_v46 = vsel %vm51_vm1, %v2982_v29, 0.0 }
0x1a7f   :  { %v3001_v38 = vsel %vm51_vm1, %v2981_v39, 0.0  ;;  %2999 = vadd.xlane.f32.xlu0 %v2998_v62 }
0x1a80   :  { %3002 = vadd.xlane.f32.xlu1 %v3001_v38 }
0x1a83   :  { %3005 = vadd.xlane.f32.xlu0 %v3004_v46 }
0x1ac5   :  { %v4094_v61 = vpop.f32.mrb[12].mxu0 }
0x1ac6   :  { %v3314_v47 = vmul.f32 %v4094_v61, %v5977_v9  ;;  %v3274_v6 = vpop.f32.mrb[13].mxu0 }
0x1ac7   :  { %v3313_v51 = vmul.f32 %v3274_v6, %v5922_v17 }
0x1ac8   :  { %v3324_v16 = vsel %vm51_vm1, %v3314_v47, 0.0 }
0x1ac9   :  { %v4108_v35 = vpop.f32.mrb[12].mxu1  ;;  %3325 = vadd.xlane.f32.xlu1 %v3324_v16  ;;  %v4097_v3 = vpop.f32.mrb[14].mxu0  ;;  %v3321_v27 = vsel %vm51_vm1, %v3313_v51, 0.0 }
0x1aca   :  { %v3652_v20 = vmul.f32 %v4108_v35, %v5992_v21  ;;  %v3284_v32 = vpop.f32.mrb[15].mxu0  ;;  %v3612_v0 = vpop.f32.mrb[13].mxu1  ;;  %v3316_v23 = vmul.f32 %v4097_v3, %v5989_v57 }
0x1acb   :  { %v3651_v1 = vmul.f32 %v3612_v0, %v5969_v7  ;;  %v3315_v30 = vmul.f32 %v3284_v32, %v5981_v43 }
0x1acc   :  { %v3662_v45 = vsel %vm51_vm1, %v3652_v20, 0.0  ;;  %v3330_v2 = vsel %vm51_vm1, %v3316_v23, 0.0 }
0x1acd   :  { %v3659_v18 = vsel %vm51_vm1, %v3651_v1, 0.0  ;;  %3663 = vadd.xlane.f32.xlu0 %v3662_v45  ;;  %v4100_v53 = vpop.f32.mrb[16].mxu0  ;;  %v4111_v59 = vpop.f32.mrb[14].mxu1 }
0x1ace   :  { %v3622_v63 = vpop.f32.mrb[15].mxu1  ;;  %3660 = vadd.xlane.f32.xlu1 %v3659_v18  ;;  %v3294_v8 = vpop.f32.mrb[17].mxu0  ;;  %v3654_v22 = vmul.f32 %v4111_v59, %v6014_v48  ;;  %v3318_v21 = vmul.f32 %v4100_v53, %v6011_v42 }
0x1acf   :  { %v3653_v17 = vmul.f32 %v3622_v63, %v5999_v56  ;;  %v3327_v56 = vsel %vm51_vm1, %v3315_v30, 0.0  ;;  %v3317_v43 = vmul.f32 %v3294_v8, %v5996_v33 }
0x1ad0   :  { %v3668_v57 = vsel %vm51_vm1, %v3654_v22, 0.0  ;;  %v3336_v5 = vsel %vm51_vm1, %v3318_v21, 0.0 }
0x1ad1   :  { %v4114_v52 = vpop.f32.mrb[16].mxu1  ;;  %3322 = vadd.xlane.f32.xlu0 %v3321_v27  ;;  %v4103_v7 = vpop.f32.mrb[18].mxu0  ;;  %v3665_v41 = vsel %vm51_vm1, %v3653_v17, 0.0  ;;  %v3333_v58 = vsel %vm51_vm1, %v3317_v43, 0.0 }
0x1ad2   :  { %v3632_v28 = vpop.f32.mrb[17].mxu1  ;;  %3331 = vadd.xlane.f32.xlu1 %v3330_v2  ;;  %v3304_v9 = vpop.f32.mrb[19].mxu0  ;;  %v3656_v24 = vmul.f32 %v4114_v52, %v6036_v44  ;;  %v3320_v19 = vmul.f32 %v4103_v7, %v6033_v54 }
0x1ad3   :  { %v3655_v11 = vmul.f32 %v3632_v28, %v6021_v14  ;;  %v3319_v44 = vmul.f32 %v3304_v9, %v6018_v34 }
0x1ad4   :  { %v3674_v42 = vsel %vm51_vm1, %v3656_v24, 0.0  ;;  %v3342_v36 = vsel %vm51_vm1, %v3320_v19, 0.0 }
0x1ad5   :  { %v4117_v4 = vpop.f32.mrb[18].mxu1  ;;  %3669 = vadd.xlane.f32.xlu0 %v3668_v57  ;;  %v3671_v25 = vsel %vm51_vm1, %v3655_v11, 0.0  ;;  %v3339_v33 = vsel %vm51_vm1, %v3319_v44, 0.0 }
0x1ad6   :  { %v3642_v48 = vpop.f32.mrb[19].mxu1  ;;  %3666 = vadd.xlane.f32.xlu1 %v3665_v41  ;;  %v3658_v40 = vmul.f32 %v4117_v4, %v6048_v31 }
0x1ad7   :  { %v3657_v14 = vmul.f32 %v3642_v48, %v6039_v50 }
0x1ad8   :  { %v3680_v10 = vsel %vm51_vm1, %v3658_v40, 0.0 }
0x1ad9   :  { %3328 = vadd.xlane.f32.xlu0 %v3327_v56  ;;  %v3677_v54 = vsel %vm51_vm1, %v3657_v14, 0.0 }
0x1ada   :  { %3337 = vadd.xlane.f32.xlu1 %v3336_v5 }
0x1add   :  { %3675 = vadd.xlane.f32.xlu0 %v3674_v42 }
0x1ade   :  { %3672 = vadd.xlane.f32.xlu1 %v3671_v25 }
0x1ae1   :  { %3334 = vadd.xlane.f32.xlu0 %v3333_v58 }
0x1ae2   :  { %3343 = vadd.xlane.f32.xlu1 %v3342_v36 }
0x1ae5   :  { %3340 = vadd.xlane.f32.xlu0 %v3339_v33 }
0x1ae6   :  { %3678 = vadd.xlane.f32.xlu1 %v3677_v54 }
0x1ae9   :  { %3681 = vadd.xlane.f32.xlu0 %v3680_v10 }
0x1aea   :  { %4520 = shalt.err (!%p4517_p13)
}
0x1aeb   :  { %s4521_s20 = scalar_lea.hbm %s6145_s5, 64 }
0x1aec   :  { %p4522_p0 = scmp.ne.s32.totalorder %s6145_s5, %s4521_s20  ;;  %p4525_p1 = scmp.lt.u32.totalorder %s4521_s20, %s6145_s5 }
0x1aee   :  { %p4527_p2 = pnand %p4525_p1, %p4522_p0 }
0x1af0   :  { %4530 = shalt.err (!%p4527_p2)
}
0x1af1   :  { %3725 = dma.vmem_to_hbm [thread:$0]  %s3723_s17, 64, %s6145_s5, [#allocation8]  }
0x1af2   :  { %s4621_s1 = smov [#allocation9]  }
0x1af3   :  { %s3731_s2 = sshll.u32 %s4621_s1, 4  ;;  %s3732_s2 = int_to_ptr.vmem [resolvable:$true] %s3731_s2 }
0x1af4   :  { %s4531_s27 = scalar_lea.vmem %s3732_s2, 384  ;;  %p4536_p4 = scmp.lt.s32.totalorder %s3732_s2, %s3732_s2 }
0x1af5   :  { %p4532_p3 = scmp.ne.s32.totalorder %s3732_s2, %s4531_s27  ;;  %p4537_p5 = scmp.lt.s32.totalorder %s4531_s27, %s4531_s27 }
0x1af7   :  { %p4538_p6 = por %p4537_p5, %p4536_p4 }
0x1af9   :  { %p4539_p7 = pnand %p4538_p6, %p4532_p3 }
0x1afb   :  { %4542 = shalt.err (!%p4539_p7)
}
0x1afc   :  { %s4543_s29 = scalar_lea.hbm %s6146_s6, 384 }
0x1afd   :  { %p4544_p8 = scmp.ne.s32.totalorder %s6146_s6, %s4543_s29  ;;  %p4547_p9 = scmp.lt.u32.totalorder %s4543_s29, %s6146_s6 }
0x1aff   :  { %p4549_p10 = pnand %p4547_p9, %p4544_p8 }
0x1b01   :  { %4552 = shalt.err (!%p4549_p10)
}
0x1b02   :  { %s4622_s10 = smov 128   ;;  %v6125_v34 = vpop.xlane.xlu0 %3504  ;;  %v2829_v50 = vpop.xlane.xlu1 %2828  ;;  %s3814_s13 = sld [smem:[#allocation3 + $0x2]]  ;;  %vm3704_vm1 = vcmask 0  }
0x1b03   :  { %3737 = dma.vmem_to_hbm [thread:$0]  %s3732_s2, 384, %s6146_s6, [#allocation8], %s4622_s10, %s4622_s10, %s4606_s9   ;;  %v3022_v58 = vadd.f32 14.703016, %v2829_v50  ;;  %v3698_v10 = vadd.f32 14.703016, %v6125_v34 }
0x1b04   :  { %s3020_s6 = sld [smem:[#allocation3]]  ;;  %s3805_s9 = sld [smem:[#allocation3 + $0x1]] }
0x1b05   :  { %s4623_s17 = smov [#allocation6]  }
0x1b06   :  { %v2988_v31 = vpop.xlane.xlu0 %2987  ;;  %v3167_v55 = vpop.xlane.xlu1 %3166  ;;  %s3712_s18 = sshll.u32 %s4623_s17, 4  ;;  %s3713_s18 = int_to_ptr.vmem [resolvable:$true] %s3712_s18 }
0x1b07   :  { %v3360_v14 = vadd.f32 14.703016, %v3167_v55  ;;  %s4553_s0 = scalar_lea.vmem %s3713_s18, 16  ;;  %s4557_s19 = scalar_lea.vmem %s3713_s18, 32 }
0x1b08   :  { %s3697_s16 = smul.f32 0.5, %s3814_s13  ;;  %p4554_p11 = scmp.ne.s32.totalorder %s3713_s18, %s4553_s0 }
0x1b09   :  { %p4558_p12 = scmp.lt.s32.totalorder %s3713_s18, %s3713_s18  ;;  %p4559_p13 = scmp.lt.s32.totalorder %s4557_s19, %s4553_s0 }
0x1b0a   :  { %v2985_v60 = vpop.xlane.xlu0 %2984  ;;  %v2991_v13 = vpop.xlane.xlu1 %2990  ;;  %s3021_s14 = smul.f32 0.5, %s3020_s6 }
0x1b0b   :  { %v3007_v26 = vadd.f32 %v2988_v31, %v2985_v60  ;;  %s3359_s15 = smul.f32 0.5, %s3805_s9  ;;  %v3023_v31 = vmul.f32 64.0, %v3022_v58  ;;  %p4560_p0 = por %p4559_p13, %p4558_p12 }
0x1b0d   :  { %v3008_v12 = vadd.f32 %v3007_v26, %v2991_v13  ;;  %v3363_v50 = vstv %s3359_s15  ;;  %p4561_p1 = pnand %p4560_p0, %p4554_p11 }
0x1b0e   :  { %v2994_v49 = vpop.xlane.xlu0 %2993  ;;  %v2997_v15 = vpop.xlane.xlu1 %2996 }
0x1b0f   :  { %v3009_v62 = vadd.f32 %v3008_v12, %v2994_v49  ;;  %v3361_v49 = vmul.f32 64.0, %v3360_v14  ;;  %v3025_v12 = vstv %s3021_s14 }
0x1b11   :  { %v3010_v46 = vadd.f32 %v3009_v62, %v2997_v15 }
0x1b12   :  { %v3000_v37 = vpop.xlane.xlu0 %2999  ;;  %v3003_v39 = vpop.xlane.xlu1 %3002 }
0x1b13   :  { %v3011_v6 = vadd.f32 %v3010_v46, %v3000_v37 }
0x1b15   :  { %v3012_v3 = vadd.f32 %v3011_v6, %v3003_v39  ;;  %v3699_v39 = vmul.f32 64.0, %v3698_v10 }
0x1b16   :  { %v3006_v29 = vpop.xlane.xlu0 %3005 }
0x1b17   :  { %v3013_v0 = vadd.f32 %v3012_v3, %v3006_v29  ;;  %v3701_v29 = vstv %s3697_s16 }
0x1b19   :  { %v3014_v53 = vrot.slane %v3013_v0, 4 }
0x1b1b   :  { %v3015_v22 = vadd.f32 %v3014_v53, %v3013_v0 }
0x1b1d   :  { %v3016_v9 = vrot.slane %v3015_v22, 2 }
0x1b1f   :  { %v3017_v56 = vadd.f32 %v3016_v9, %v3015_v22 }
0x1b21   :  { %v3018_v42 = vrot.slane %v3017_v56, 1 }
0x1b23   :  { %v3019_v33 = vadd.f32 %v3018_v42, %v3017_v56 }
0x1b25   :  { %v3024_v37 = vadd.f32 %v3023_v31, %v3019_v33 }
0x1b56   :  { %v3326_v38 = vpop.xlane.xlu1 %3325 }
0x1b5a   :  { %v3664_v61 = vpop.xlane.xlu0 %3663 }
0x1b5b   :  { %v3661_v47 = vpop.xlane.xlu1 %3660 }
0x1b5c   :  { %v3683_v1 = vadd.f32 %v3664_v61, %v3661_v47 }
0x1b5e   :  { %v3323_v16 = vpop.xlane.xlu0 %3322 }
0x1b5f   :  { %v3332_v35 = vpop.xlane.xlu1 %3331  ;;  %v3345_v45 = vadd.f32 %v3326_v38, %v3323_v16  ;;  %v3026_v38 = vmul.f32 %v3025_v12, %v3024_v37 }
0x1b62   :  { %v3670_v20 = vpop.xlane.xlu0 %3669 }
0x1b63   :  { %v3667_v32 = vpop.xlane.xlu1 %3666 }
0x1b64   :  { %v3684_v18 = vadd.f32 %v3683_v1, %v3667_v32 }
0x1b66   :  { %v3329_v51 = vpop.xlane.xlu0 %3328  ;;  %v3685_v27 = vadd.f32 %v3684_v18, %v3670_v20 }
0x1b67   :  { %v3338_v23 = vpop.xlane.xlu1 %3337  ;;  %v3346_v59 = vadd.f32 %v3345_v45, %v3329_v51 }
0x1b69   :  { %v3347_v2 = vadd.f32 %v3346_v59, %v3332_v35 }
0x1b6a   :  { %v3676_v63 = vpop.xlane.xlu0 %3675 }
0x1b6b   :  { %v3673_v8 = vpop.xlane.xlu1 %3672 }
0x1b6c   :  { %v3686_v17 = vadd.f32 %v3685_v27, %v3673_v8 }
0x1b6e   :  { %v3335_v52 = vpop.xlane.xlu0 %3334  ;;  %v3687_v21 = vadd.f32 %v3686_v17, %v3676_v63 }
0x1b6f   :  { %v3348_v7 = vadd.f32 %v3347_v2, %v3335_v52  ;;  %v3344_v28 = vpop.xlane.xlu1 %3343 }
0x1b71   :  { %v3349_v30 = vadd.f32 %v3348_v7, %v3338_v23 }
0x1b72   :  { %v3341_v57 = vpop.xlane.xlu0 %3340 }
0x1b73   :  { %v3350_v41 = vadd.f32 %v3349_v30, %v3341_v57  ;;  %v3679_v4 = vpop.xlane.xlu1 %3678 }
0x1b74   :  { %v3688_v48 = vadd.f32 %v3687_v21, %v3679_v4 }
0x1b75   :  { %v3351_v24 = vadd.f32 %v3350_v41, %v3344_v28 }
0x1b76   :  { %v3682_v5 = vpop.xlane.xlu0 %3681 }
0x1b77   :  { %v3352_v11 = vrot.slane %v3351_v24, 4  ;;  %v3689_v43 = vadd.f32 %v3688_v48, %v3682_v5 }
0x1b79   :  { %v3353_v19 = vadd.f32 %v3352_v11, %v3351_v24  ;;  %v3690_v25 = vrot.slane %v3689_v43, 4 }
0x1b7b   :  { %v3354_v44 = vrot.slane %v3353_v19, 2  ;;  %v3691_v36 = vadd.f32 %v3690_v25, %v3689_v43 }
0x1b7d   :  { %v3355_v40 = vadd.f32 %v3354_v44, %v3353_v19  ;;  %v3692_v54 = vrot.slane %v3691_v36, 2 }
0x1b7f   :  { %v3356_v60 = vrot.slane %v3355_v40, 1  ;;  %v3693_v13 = vadd.f32 %v3692_v54, %v3691_v36 }
0x1b81   :  { %v3357_v15 = vadd.f32 %v3356_v60, %v3355_v40  ;;  %v3694_v26 = vrot.slane %v3693_v13, 1 }
0x1b83   :  { %v3695_v62 = vadd.f32 %v3694_v26, %v3693_v13  ;;  %v3362_v55 = vadd.f32 %v3361_v49, %v3357_v15 }
0x1b85   :  { %v3364_v46 = vmul.f32 %v3363_v50, %v3362_v55  ;;  %v3700_v61 = vadd.f32 %v3699_v39, %v3695_v62 }
0x1b87   :  { %v3365_v34 = vadd.f32 %v3364_v46, %v3026_v38  ;;  %v3702_v47 = vmul.f32 %v3701_v29, %v3700_v61 }
0x1b89   :  { %v3703_v6 = vadd.f32 %v3702_v47, %v3365_v34 }
0x1b8b   :  { %3705 = vst.msk [vmem:[#allocation6] sm:$0x1] %vm3704_vm1, %v3703_v6 }
0x1b8c   :  { %4564 = shalt.err (!%p4561_p1)
}
0x1b8d   :  { %s4565_s22 = scalar_lea.hbm %s6144_s4, 16 }
0x1b8e   :  { %p4566_p2 = scmp.ne.s32.totalorder %s6144_s4, %s4565_s22  ;;  %p4569_p3 = scmp.lt.u32.totalorder %s4565_s22, %s6144_s4 }
0x1b90   :  { %p4571_p4 = pnand %p4569_p3, %p4566_p2 }
0x1b92   :  { %4574 = shalt.err (!%p4571_p4)
}
0x1b93   :  { %3715 = dma.vmem_to_hbm [thread:$0]  %s3713_s18, 16, %s6144_s4, [#allocation4]  }
0x1b94   :  { %4581 = dma.done.wait [#allocation4], 16  }
0x1b95   :  { %4582 = vsyncadd [#allocation4], 4294967280 }
0x1b96   :  { %4583 = dma.done.wait [#allocation8], 448  }
0x1b97   :  { %4584 = vsyncadd [#allocation8], 4294966848 }
0x1b98   :  { %3747 = vsyncpa [#allocation4], 1 }
0x1b99   :  { %3748 = vsyncpa [#allocation8], 1 }
0x1b9a   :  { %3749 = vsyncpa [#allocation5], 1 }

</bundles_post_ra>
